<compile_context>
chip_gen: v7x
topology: tpu7x:2x2x1
jax: 0.10.0
libtpu: 0.0.40
codegen_flags: <defaults>
</compile_context>

<pallas_src>
import functools
import math

import jax
import jax.numpy as jnp
from jax import lax
from jax.experimental import pallas as pl
from jax.experimental.pallas import tpu as pltpu

# Reduced, self-consistent config (same structure as chatgpt_cfg, small sizes,
# lane-dense emb_dim).
CFG = dict(vocab_size=256, context_length=64, emb_dim=128, n_heads=4,
           drop_rate=0.0, n_layers=2, qkv_bias=False)


# ----------------------------- in-kernel helpers -----------------------------

def _layernorm(x, g, b, eps=1e-5):
    mu = jnp.mean(x, axis=-1, keepdims=True)
    var = jnp.mean((x - mu) ** 2, axis=-1, keepdims=True)
    return (x - mu) * lax.rsqrt(var + eps) * g + b


def _gelu_tanh(x):
    # Matches the book's GELU (tanh approximation).
    c = math.sqrt(2.0 / math.pi)
    return 0.5 * x * (1.0 + jnp.tanh(c * (x + 0.044715 * x * x * x)))


# ------------------------- fused transformer-stack kernel ---------------------

def _gpt_stack_kernel(B, S, H,
                      x_ref, sp_ref, wqkv_ref, wo_ref, w1_ref, b1_ref, w2_ref,
                      fin_ref, wout_ref,
                      logits_ref, acc_ref):
    l = pl.program_id(0)
    M, D = acc_ref.shape
    hd = D // H
    bf16 = jnp.bfloat16

    # Load the embedded tokens into the resident activation on the first layer.
    @pl.when(l == 0)
    def _():
        acc_ref[...] = x_ref[...]

    x = acc_ref[...]                                   # (M, D) f32, VMEM-resident

    # Packed per-layer small params: [ln1_g, ln1_b, bo, ln2_g, ln2_b, b2, pad, pad]
    sp = sp_ref[0]                                     # (8, D) f32
    ln1_g, ln1_b = sp[0:1], sp[1:2]
    bo = sp[2:3]
    ln2_g, ln2_b = sp[3:4], sp[4:5]
    b2 = sp[5:6]

    # ---- attention sub-block: x = x + Wo(MHA(LN1(x))) ----
    h1 = _layernorm(x, ln1_g, ln1_b)
    # Single lane-dense fused QKV projection: (M, D) @ (D, 3D) -> (M, 3D).
    qkv = jnp.dot(h1.astype(bf16), wqkv_ref[0],
                  preferred_element_type=jnp.float32).astype(bf16)

    # Additive causal bias generated in-kernel (VPU compares are free).
    r = lax.broadcasted_iota(jnp.int32, (S, S), 0)
    c = lax.broadcasted_iota(jnp.int32, (S, S), 1)
    bias = jnp.where(c > r, -1e30, 0.0).astype(jnp.float32)

    # Per-(batch, head) attention cores; B and H are tiny compile-time constants,
    # everything stays 2D (no sublane<->leading transposes).
    ctx_rows = []
    for b in range(B):
        qkv_b = qkv[b * S:(b + 1) * S]                 # (S, 3D) bf16
        heads = []
        for hh in range(H):
            q = qkv_b[:, hh * hd:(hh + 1) * hd]
            k = qkv_b[:, D + hh * hd:D + (hh + 1) * hd]
            v = qkv_b[:, 2 * D + hh * hd:2 * D + (hh + 1) * hd]
            # 1/sqrt(hd) is already folded into Wq.
            sc = jnp.einsum('qd,kd->qk', q, k,
                            preferred_element_type=jnp.float32) + bias
            m = jnp.max(sc, axis=-1, keepdims=True)
            e = jnp.exp(sc - m)
            p = e * pl.reciprocal(jnp.sum(e, axis=-1, keepdims=True), approx=True)
            heads.append(jnp.dot(p.astype(bf16), v,
                                 preferred_element_type=jnp.float32))  # (S, hd)
        ctx_rows.append(jnp.concatenate(heads, axis=-1))               # (S, D)
    ctx = jnp.concatenate(ctx_rows, axis=0)                            # (M, D) f32

    # Head-merged context -> single full-width out-projection (M, D) @ (D, D).
    attn = jnp.dot(ctx.astype(bf16), wo_ref[0],
                   preferred_element_type=jnp.float32) + bo
    x = x + attn                                       # residual (dropout = id)

    # ---- feed-forward sub-block: x = x + W2(gelu(W1(LN2(x)))) ----
    h2 = _layernorm(x, ln2_g, ln2_b)
    f = jnp.dot(h2.astype(bf16), w1_ref[0],
                preferred_element_type=jnp.float32) + b1_ref[0]
    f = _gelu_tanh(f)
    f = jnp.dot(f.astype(bf16), w2_ref[0],
                preferred_element_type=jnp.float32) + b2
    x = x + f
    acc_ref[...] = x

    # ---- final norm + LM head on the last layer (bf16 logits) ----
    @pl.when(l == pl.num_programs(0) - 1)
    def _():
        fin = fin_ref[...]                             # (8, D): row0 gamma, row1 beta
        hf = _layernorm(x, fin[0:1], fin[1:2])
        logits = jnp.dot(hf.astype(bf16), wout_ref[...],
                         preferred_element_type=jnp.float32)
        logits_ref[...] = logits.astype(logits_ref.dtype)


def gpt_stack(x2d, blocks, fin, w_out, n_heads, B, S):
    M, D = x2d.shape
    L = blocks['small'].shape[0]
    Dff = blocks['w1'].shape[-1]
    V = w_out.shape[-1]
    kernel = functools.partial(_gpt_stack_kernel, B, S, n_heads)

    in_specs = [
        pl.BlockSpec((M, D), lambda l: (0, 0)),            # embedded tokens (resident)
        pl.BlockSpec((1, 8, D), lambda l: (l, 0, 0)),      # packed small per-layer params
        pl.BlockSpec((1, D, 3 * D), lambda l: (l, 0, 0)),  # fused Wqkv  (lane-dense)
        pl.BlockSpec((1, D, D), lambda l: (l, 0, 0)),      # Wo
        pl.BlockSpec((1, D, Dff), lambda l: (l, 0, 0)),    # W1
        pl.BlockSpec((1, 1, Dff), lambda l: (l, 0, 0)),    # b1
        pl.BlockSpec((1, Dff, D), lambda l: (l, 0, 0)),    # W2
        pl.BlockSpec((8, D), lambda l: (0, 0)),            # final norm gamma/beta (packed)
        pl.BlockSpec((D, V), lambda l: (0, 0)),            # LM head W_out
    ]

    return pl.pallas_call(
        kernel,
        out_shape=jax.ShapeDtypeStruct((M, V), jnp.bfloat16),
        grid=(L,),
        in_specs=in_specs,
        out_specs=pl.BlockSpec((M, V), lambda l: (0, 0)),
        scratch_shapes=[pltpu.VMEM((M, D), jnp.float32)],
        compiler_params=pltpu.CompilerParams(
            dimension_semantics=("arbitrary",),
            vmem_limit_bytes=32 * 1024 * 1024),
    )(x2d, blocks['small'], blocks['wqkv'], blocks['wo'], blocks['w1'],
      blocks['b1'], blocks['w2'], fin, w_out)


# ------------------------------ params / forward ------------------------------

def init_params(key, cfg):
    D, V, C = cfg['emb_dim'], cfg['vocab_size'], cfg['context_length']
    L, H = cfg['n_layers'], cfg['n_heads']
    hd = D // H
    Dff = 4 * D
    keys = iter(jax.random.split(key, 3 + 6 * L))

    def nrm(shape, std=0.02):
        return (std * jax.random.normal(next(keys), shape)).astype(jnp.float32)

    small, wqkv, wo, w1, b1, w2 = [], [], [], [], [], []
    for _ in range(L):
        wq = nrm((D, D)) * (1.0 / math.sqrt(hd))   # fold score scale into Wq
        wk = nrm((D, D))
        wv = nrm((D, D))
        wqkv.append(jnp.concatenate([wq, wk, wv], axis=-1).astype(jnp.bfloat16))
        wo.append(nrm((D, D)).astype(jnp.bfloat16))
        w1.append(nrm((D, Dff)).astype(jnp.bfloat16))
        b1.append(jnp.zeros((1, Dff), jnp.float32))
        w2.append(nrm((Dff, D)).astype(jnp.bfloat16))
        small.append(jnp.stack([
            jnp.ones((D,), jnp.float32),    # ln1 gamma
            jnp.zeros((D,), jnp.float32),   # ln1 beta
            jnp.zeros((D,), jnp.float32),   # out-proj bias
            jnp.ones((D,), jnp.float32),    # ln2 gamma
            jnp.zeros((D,), jnp.float32),   # ln2 beta
            jnp.zeros((D,), jnp.float32),   # ff b2
            jnp.zeros((D,), jnp.float32),   # pad
            jnp.zeros((D,), jnp.float32),   # pad
        ], axis=0))

    blocks = dict(small=jnp.stack(small), wqkv=jnp.stack(wqkv),
                  wo=jnp.stack(wo), w1=jnp.stack(w1),
                  b1=jnp.stack(b1), w2=jnp.stack(w2))

    fin = jnp.zeros((8, D), jnp.float32).at[0, :].set(1.0)  # row0 gamma, row1 beta

    return dict(
        tok_emb=nrm((V, D)),
        pos_emb=nrm((C, D)),
        blocks=blocks,
        fin=fin,
        w_out=nrm((D, V)).astype(jnp.bfloat16),
    )


def gpt_forward(params, tokens, cfg):
    B, S = tokens.shape
    D = cfg['emb_dim']
    # Embedding gather + positional add are plain-JAX glue (no clean Pallas gather
    # needed at this size); drop_emb is identity in eval mode.
    tok = jnp.take(params['tok_emb'], tokens, axis=0)            # (B, S, D)
    x2d = (tok + params['pos_emb'][:S][None, :, :]).reshape(B * S, D)

    logits2d = gpt_stack(x2d, params['blocks'], params['fin'], params['w_out'],
                         cfg['n_heads'], B, S)
    return logits2d.reshape(B, S, -1)


if __name__ == "__main__":
    key = jax.random.PRNGKey(0)
    pkey, xkey = jax.random.split(key)
    params = init_params(pkey, CFG)

    B, S = 2, 32
    tokens = jax.random.randint(xkey, (B, S), 0, CFG['vocab_size'],
                                dtype=jnp.int32)

    logits = gpt_forward(params, tokens, CFG)
    jax.block_until_ready(logits)
    assert logits.shape == (B, S, CFG['vocab_size'])
    assert bool(jnp.all(jnp.isfinite(logits.astype(jnp.float32))))
    print("KERNEL_OK")
</pallas_src>

<mosaic_0001>
module attributes {stable_mosaic.version = 11 : i64} {
  func.func @_gpt_stack_kernel(%arg0: i32, %arg1: memref<64x128xf32, #tpu.memory_space<vmem>>, %arg2: memref<1x8x128xf32, #tpu.memory_space<vmem>>, %arg3: memref<1x128x384xbf16, #tpu.memory_space<vmem>>, %arg4: memref<1x128x128xbf16, #tpu.memory_space<vmem>>, %arg5: memref<1x128x512xbf16, #tpu.memory_space<vmem>>, %arg6: memref<1x1x512xf32, #tpu.memory_space<vmem>>, %arg7: memref<1x512x128xbf16, #tpu.memory_space<vmem>>, %arg8: memref<8x128xf32, #tpu.memory_space<vmem>>, %arg9: memref<128x256xbf16, #tpu.memory_space<vmem>>, %arg10: memref<64x256xbf16, #tpu.memory_space<vmem>>, %arg11: memref<64x128xf32, #tpu.memory_space<vmem>>) attributes {dimension_semantics = [#tpu.dimension_semantics<arbitrary>], iteration_bounds = array<i64: 2>, scalar_prefetch = 0 : i64, scratch_operands = 1 : i64, tpu.core_type = #tpu.core_type<tc>, window_params = [{pipeline_mode = #tpu.pipeline_mode<synchronous>, transform_indices = @transform_0, window_bounds = array<i64: 64, 128>}, {transform_indices = @transform_1, window_bounds = array<i64: 1, 8, 128>}, {transform_indices = @transform_2, window_bounds = array<i64: 1, 128, 384>}, {transform_indices = @transform_3, window_bounds = array<i64: 1, 128, 128>}, {transform_indices = @transform_4, window_bounds = array<i64: 1, 128, 512>}, {transform_indices = @transform_5, window_bounds = array<i64: 1, 1, 512>}, {transform_indices = @transform_6, window_bounds = array<i64: 1, 512, 128>}, {pipeline_mode = #tpu.pipeline_mode<synchronous>, transform_indices = @transform_7, window_bounds = array<i64: 8, 128>}, {pipeline_mode = #tpu.pipeline_mode<synchronous>, transform_indices = @transform_8, window_bounds = array<i64: 128, 256>}, {pipeline_mode = #tpu.pipeline_mode<synchronous>, transform_indices = @transform_9, window_bounds = array<i64: 64, 256>}]} {
    %c0_i32 = arith.constant 0 : i32
    %0 = arith.cmpi eq, %arg0, %c0_i32 : i32
    %1 = arith.extui %0 : i1 to i32
    %c0_i32_0 = arith.constant 0 : i32
    %2 = arith.cmpi ne, %1, %c0_i32_0 : i32
    scf.if %2 {
      %c0_74 = arith.constant 0 : index
      %c0_75 = arith.constant 0 : index
      %247 = vector.load %arg1[%c0_74, %c0_75] : memref<64x128xf32, #tpu.memory_space<vmem>>, vector<64x128xf32>
      %c0_76 = arith.constant 0 : index
      %c0_77 = arith.constant 0 : index
      %248 = vector.load %arg11[%c0_76, %c0_77] : memref<64x128xf32, #tpu.memory_space<vmem>>, vector<64x128xf32>
      tpu.vector_store %arg11[%c0_76, %c0_77], %247 {strides = array<i32>} : memref<64x128xf32, #tpu.memory_space<vmem>>, vector<64x128xf32>,
    } else {
    }
    %c0 = arith.constant 0 : index
    %c0_1 = arith.constant 0 : index
    %3 = vector.load %arg11[%c0, %c0_1] : memref<64x128xf32, #tpu.memory_space<vmem>>, vector<64x128xf32>
    %c0_2 = arith.constant 0 : index
    %c0_3 = arith.constant 0 : index
    %c0_4 = arith.constant 0 : index
    %4 = vector.load %arg2[%c0_2, %c0_3, %c0_4] : memref<1x8x128xf32, #tpu.memory_space<vmem>>, vector<1x8x128xf32>
    %5 = vector.shape_cast %4 : vector<1x8x128xf32> to vector<8x128xf32>
    %6 = vector.extract_strided_slice %5 {offsets = [0, 0], sizes = [1, 128], strides = [1, 1]} : vector<8x128xf32> to vector<1x128xf32>
    %7 = vector.extract_strided_slice %5 {offsets = [1, 0], sizes = [1, 128], strides = [1, 1]} : vector<8x128xf32> to vector<1x128xf32>
    %8 = vector.extract_strided_slice %5 {offsets = [2, 0], sizes = [1, 128], strides = [1, 1]} : vector<8x128xf32> to vector<1x128xf32>
    %9 = vector.extract_strided_slice %5 {offsets = [3, 0], sizes = [1, 128], strides = [1, 1]} : vector<8x128xf32> to vector<1x128xf32>
    %10 = vector.extract_strided_slice %5 {offsets = [4, 0], sizes = [1, 128], strides = [1, 1]} : vector<8x128xf32> to vector<1x128xf32>
    %11 = vector.extract_strided_slice %5 {offsets = [5, 0], sizes = [1, 128], strides = [1, 1]} : vector<8x128xf32> to vector<1x128xf32>
    %cst = arith.constant dense<0.000000e+00> : vector<64xf32>
    %12 = vector.multi_reduction <add>, %3, %cst [1] : vector<64x128xf32> to vector<64xf32>
    %13 = vector.shape_cast %12 : vector<64xf32> to vector<64x1xf32>
    %cst_5 = arith.constant 1.280000e+02 : f32
    %14 = vector.broadcast %cst_5 : f32 to vector<64x1xf32>
    %15 = arith.divf %13, %14 : vector<64x1xf32>
    %16 = vector.broadcast %15 : vector<64x1xf32> to vector<64x128xf32>
    %17 = arith.subf %3, %16 : vector<64x128xf32>
    %18 = arith.mulf %17, %17 : vector<64x128xf32>
    %cst_6 = arith.constant dense<0.000000e+00> : vector<64xf32>
    %19 = vector.multi_reduction <add>, %18, %cst_6 [1] : vector<64x128xf32> to vector<64xf32>
    %20 = vector.shape_cast %19 : vector<64xf32> to vector<64x1xf32>
    %cst_7 = arith.constant 1.280000e+02 : f32
    %21 = vector.broadcast %cst_7 : f32 to vector<64x1xf32>
    %22 = arith.divf %20, %21 : vector<64x1xf32>
    %23 = vector.broadcast %15 : vector<64x1xf32> to vector<64x128xf32>
    %24 = arith.subf %3, %23 : vector<64x128xf32>
    %cst_8 = arith.constant 9.99999974E-6 : f32
    %25 = vector.broadcast %cst_8 : f32 to vector<64x1xf32>
    %26 = arith.addf %22, %25 : vector<64x1xf32>
    %27 = math.rsqrt %26 : vector<64x1xf32>
    %28 = vector.broadcast %27 : vector<64x1xf32> to vector<64x128xf32>
    %29 = arith.mulf %24, %28 : vector<64x128xf32>
    %30 = vector.broadcast %6 : vector<1x128xf32> to vector<64x128xf32>
    %31 = arith.mulf %29, %30 : vector<64x128xf32>
    %32 = vector.broadcast %7 : vector<1x128xf32> to vector<64x128xf32>
    %33 = arith.addf %31, %32 : vector<64x128xf32>
    %34 = arith.truncf %33 : vector<64x128xf32> to vector<64x128xbf16>
    %c0_9 = arith.constant 0 : index
    %c0_10 = arith.constant 0 : index
    %c0_11 = arith.constant 0 : index
    %35 = vector.load %arg3[%c0_9, %c0_10, %c0_11] : memref<1x128x384xbf16, #tpu.memory_space<vmem>>, vector<1x128x384xbf16>
    %36 = vector.shape_cast %35 : vector<1x128x384xbf16> to vector<128x384xbf16>
    %cst_12 = arith.constant dense<0.000000e+00> : vector<64x384xf32>
    %37 = tpu.matmul %34, %36, %cst_12 {dimension_numbers = #tpu.dot_dimension_numbers<[1], [0], [0], [1], [0, 0, 1, 1], [], []>} : vector<64x128xbf16>, vector<128x384xbf16>, vector<64x384xf32> -> vector<64x384xf32>
    %38 = arith.truncf %37 : vector<64x384xf32> to vector<64x384xbf16>
    %39 = tpu.iota {dimensions = array<i32: 0>} : vector<32x32xi32>
    %40 = tpu.iota {dimensions = array<i32: 1>} : vector<32x32xi32>
    %41 = arith.cmpi sgt, %40, %39 : vector<32x32xi32>
    %cst_13 = arith.constant -1.000000e+30 : f32
    %cst_14 = arith.constant 0.000000e+00 : f32
    %42 = vector.broadcast %cst_13 : f32 to vector<32x32xf32>
    %43 = vector.broadcast %cst_14 : f32 to vector<32x32xf32>
    %44 = arith.select %41, %42, %43 : vector<32x32xi1>, vector<32x32xf32>
    %45 = vector.extract_strided_slice %38 {offsets = [0, 0], sizes = [32, 384], strides = [1, 1]} : vector<64x384xbf16> to vector<32x384xbf16>
    %46 = vector.extract_strided_slice %45 {offsets = [0, 0], sizes = [32, 32], strides = [1, 1]} : vector<32x384xbf16> to vector<32x32xbf16>
    %47 = vector.extract_strided_slice %45 {offsets = [0, 128], sizes = [32, 32], strides = [1, 1]} : vector<32x384xbf16> to vector<32x32xbf16>
    %48 = vector.extract_strided_slice %45 {offsets = [0, 256], sizes = [32, 32], strides = [1, 1]} : vector<32x384xbf16> to vector<32x32xbf16>
    "tpu.trace_start"() <{level = 10 : i32, message = "qd,kd->qk"}> : () -> ()
    %cst_15 = arith.constant dense<0.000000e+00> : vector<32x32xf32>
    %49 = tpu.matmul %46, %47, %cst_15 {dimension_numbers = #tpu.dot_dimension_numbers<[1], [1], [0], [0], [0, 0, 1, 0], [], []>} : vector<32x32xbf16>, vector<32x32xbf16>, vector<32x32xf32> -> vector<32x32xf32>
    "tpu.trace_stop"() : () -> ()
    %50 = arith.addf %49, %44 : vector<32x32xf32>
    %cst_16 = arith.constant dense<0xFF800000> : vector<32xf32>
    %51 = vector.multi_reduction <maximumf>, %50, %cst_16 [1] : vector<32x32xf32> to vector<32xf32>
    %52 = vector.shape_cast %51 : vector<32xf32> to vector<32x1xf32>
    %53 = vector.broadcast %52 : vector<32x1xf32> to vector<32x32xf32>
    %54 = arith.subf %50, %53 : vector<32x32xf32>
    %55 = math.exp %54 : vector<32x32xf32>
    %cst_17 = arith.constant dense<0.000000e+00> : vector<32xf32>
    %56 = vector.multi_reduction <add>, %55, %cst_17 [1] : vector<32x32xf32> to vector<32xf32>
    %57 = vector.shape_cast %56 : vector<32xf32> to vector<32x1xf32>
    %58 = tpu.reciprocal %57 {approx = true} : vector<32x1xf32> -> vector<32x1xf32>
    %59 = vector.broadcast %58 : vector<32x1xf32> to vector<32x32xf32>
    %60 = arith.mulf %55, %59 : vector<32x32xf32>
    %61 = arith.truncf %60 : vector<32x32xf32> to vector<32x32xbf16>
    %cst_18 = arith.constant dense<0.000000e+00> : vector<32x32xf32>
    %62 = tpu.matmul %61, %48, %cst_18 {dimension_numbers = #tpu.dot_dimension_numbers<[1], [0], [0], [1], [0, 0, 1, 1], [], []>} : vector<32x32xbf16>, vector<32x32xbf16>, vector<32x32xf32> -> vector<32x32xf32>
    %63 = vector.extract_strided_slice %45 {offsets = [0, 32], sizes = [32, 32], strides = [1, 1]} : vector<32x384xbf16> to vector<32x32xbf16>
    %64 = vector.extract_strided_slice %45 {offsets = [0, 160], sizes = [32, 32], strides = [1, 1]} : vector<32x384xbf16> to vector<32x32xbf16>
    %65 = vector.extract_strided_slice %45 {offsets = [0, 288], sizes = [32, 32], strides = [1, 1]} : vector<32x384xbf16> to vector<32x32xbf16>
    "tpu.trace_start"() <{level = 10 : i32, message = "qd,kd->qk"}> : () -> ()
    %cst_19 = arith.constant dense<0.000000e+00> : vector<32x32xf32>
    %66 = tpu.matmul %63, %64, %cst_19 {dimension_numbers = #tpu.dot_dimension_numbers<[1], [1], [0], [0], [0, 0, 1, 0], [], []>} : vector<32x32xbf16>, vector<32x32xbf16>, vector<32x32xf32> -> vector<32x32xf32>
    "tpu.trace_stop"() : () -> ()
    %67 = arith.addf %66, %44 : vector<32x32xf32>
    %cst_20 = arith.constant dense<0xFF800000> : vector<32xf32>
    %68 = vector.multi_reduction <maximumf>, %67, %cst_20 [1] : vector<32x32xf32> to vector<32xf32>
    %69 = vector.shape_cast %68 : vector<32xf32> to vector<32x1xf32>
    %70 = vector.broadcast %69 : vector<32x1xf32> to vector<32x32xf32>
    %71 = arith.subf %67, %70 : vector<32x32xf32>
    %72 = math.exp %71 : vector<32x32xf32>
    %cst_21 = arith.constant dense<0.000000e+00> : vector<32xf32>
    %73 = vector.multi_reduction <add>, %72, %cst_21 [1] : vector<32x32xf32> to vector<32xf32>
    %74 = vector.shape_cast %73 : vector<32xf32> to vector<32x1xf32>
    %75 = tpu.reciprocal %74 {approx = true} : vector<32x1xf32> -> vector<32x1xf32>
    %76 = vector.broadcast %75 : vector<32x1xf32> to vector<32x32xf32>
    %77 = arith.mulf %72, %76 : vector<32x32xf32>
    %78 = arith.truncf %77 : vector<32x32xf32> to vector<32x32xbf16>
    %cst_22 = arith.constant dense<0.000000e+00> : vector<32x32xf32>
    %79 = tpu.matmul %78, %65, %cst_22 {dimension_numbers = #tpu.dot_dimension_numbers<[1], [0], [0], [1], [0, 0, 1, 1], [], []>} : vector<32x32xbf16>, vector<32x32xbf16>, vector<32x32xf32> -> vector<32x32xf32>
    %80 = vector.extract_strided_slice %45 {offsets = [0, 64], sizes = [32, 32], strides = [1, 1]} : vector<32x384xbf16> to vector<32x32xbf16>
    %81 = vector.extract_strided_slice %45 {offsets = [0, 192], sizes = [32, 32], strides = [1, 1]} : vector<32x384xbf16> to vector<32x32xbf16>
    %82 = vector.extract_strided_slice %45 {offsets = [0, 320], sizes = [32, 32], strides = [1, 1]} : vector<32x384xbf16> to vector<32x32xbf16>
    "tpu.trace_start"() <{level = 10 : i32, message = "qd,kd->qk"}> : () -> ()
    %cst_23 = arith.constant dense<0.000000e+00> : vector<32x32xf32>
    %83 = tpu.matmul %80, %81, %cst_23 {dimension_numbers = #tpu.dot_dimension_numbers<[1], [1], [0], [0], [0, 0, 1, 0], [], []>} : vector<32x32xbf16>, vector<32x32xbf16>, vector<32x32xf32> -> vector<32x32xf32>
    "tpu.trace_stop"() : () -> ()
    %84 = arith.addf %83, %44 : vector<32x32xf32>
    %cst_24 = arith.constant dense<0xFF800000> : vector<32xf32>
    %85 = vector.multi_reduction <maximumf>, %84, %cst_24 [1] : vector<32x32xf32> to vector<32xf32>
    %86 = vector.shape_cast %85 : vector<32xf32> to vector<32x1xf32>
    %87 = vector.broadcast %86 : vector<32x1xf32> to vector<32x32xf32>
    %88 = arith.subf %84, %87 : vector<32x32xf32>
    %89 = math.exp %88 : vector<32x32xf32>
    %cst_25 = arith.constant dense<0.000000e+00> : vector<32xf32>
    %90 = vector.multi_reduction <add>, %89, %cst_25 [1] : vector<32x32xf32> to vector<32xf32>
    %91 = vector.shape_cast %90 : vector<32xf32> to vector<32x1xf32>
    %92 = tpu.reciprocal %91 {approx = true} : vector<32x1xf32> -> vector<32x1xf32>
    %93 = vector.broadcast %92 : vector<32x1xf32> to vector<32x32xf32>
    %94 = arith.mulf %89, %93 : vector<32x32xf32>
    %95 = arith.truncf %94 : vector<32x32xf32> to vector<32x32xbf16>
    %cst_26 = arith.constant dense<0.000000e+00> : vector<32x32xf32>
    %96 = tpu.matmul %95, %82, %cst_26 {dimension_numbers = #tpu.dot_dimension_numbers<[1], [0], [0], [1], [0, 0, 1, 1], [], []>} : vector<32x32xbf16>, vector<32x32xbf16>, vector<32x32xf32> -> vector<32x32xf32>
    %97 = vector.extract_strided_slice %45 {offsets = [0, 96], sizes = [32, 32], strides = [1, 1]} : vector<32x384xbf16> to vector<32x32xbf16>
    %98 = vector.extract_strided_slice %45 {offsets = [0, 224], sizes = [32, 32], strides = [1, 1]} : vector<32x384xbf16> to vector<32x32xbf16>
    %99 = vector.extract_strided_slice %45 {offsets = [0, 352], sizes = [32, 32], strides = [1, 1]} : vector<32x384xbf16> to vector<32x32xbf16>
    "tpu.trace_start"() <{level = 10 : i32, message = "qd,kd->qk"}> : () -> ()
    %cst_27 = arith.constant dense<0.000000e+00> : vector<32x32xf32>
    %100 = tpu.matmul %97, %98, %cst_27 {dimension_numbers = #tpu.dot_dimension_numbers<[1], [1], [0], [0], [0, 0, 1, 0], [], []>} : vector<32x32xbf16>, vector<32x32xbf16>, vector<32x32xf32> -> vector<32x32xf32>
    "tpu.trace_stop"() : () -> ()
    %101 = arith.addf %100, %44 : vector<32x32xf32>
    %cst_28 = arith.constant dense<0xFF800000> : vector<32xf32>
    %102 = vector.multi_reduction <maximumf>, %101, %cst_28 [1] : vector<32x32xf32> to vector<32xf32>
    %103 = vector.shape_cast %102 : vector<32xf32> to vector<32x1xf32>
    %104 = vector.broadcast %103 : vector<32x1xf32> to vector<32x32xf32>
    %105 = arith.subf %101, %104 : vector<32x32xf32>
    %106 = math.exp %105 : vector<32x32xf32>
    %cst_29 = arith.constant dense<0.000000e+00> : vector<32xf32>
    %107 = vector.multi_reduction <add>, %106, %cst_29 [1] : vector<32x32xf32> to vector<32xf32>
    %108 = vector.shape_cast %107 : vector<32xf32> to vector<32x1xf32>
    %109 = tpu.reciprocal %108 {approx = true} : vector<32x1xf32> -> vector<32x1xf32>
    %110 = vector.broadcast %109 : vector<32x1xf32> to vector<32x32xf32>
    %111 = arith.mulf %106, %110 : vector<32x32xf32>
    %112 = arith.truncf %111 : vector<32x32xf32> to vector<32x32xbf16>
    %cst_30 = arith.constant dense<0.000000e+00> : vector<32x32xf32>
    %113 = tpu.matmul %112, %99, %cst_30 {dimension_numbers = #tpu.dot_dimension_numbers<[1], [0], [0], [1], [0, 0, 1, 1], [], []>} : vector<32x32xbf16>, vector<32x32xbf16>, vector<32x32xf32> -> vector<32x32xf32>
    %114 = tpu.concatenate %62, %79, %96, %113 in 1 : vector<32x32xf32>, vector<32x32xf32>, vector<32x32xf32>, vector<32x32xf32> -> vector<32x128xf32>
    %115 = vector.extract_strided_slice %38 {offsets = [32, 0], sizes = [32, 384], strides = [1, 1]} : vector<64x384xbf16> to vector<32x384xbf16>
    %116 = vector.extract_strided_slice %115 {offsets = [0, 0], sizes = [32, 32], strides = [1, 1]} : vector<32x384xbf16> to vector<32x32xbf16>
    %117 = vector.extract_strided_slice %115 {offsets = [0, 128], sizes = [32, 32], strides = [1, 1]} : vector<32x384xbf16> to vector<32x32xbf16>
    %118 = vector.extract_strided_slice %115 {offsets = [0, 256], sizes = [32, 32], strides = [1, 1]} : vector<32x384xbf16> to vector<32x32xbf16>
    "tpu.trace_start"() <{level = 10 : i32, message = "qd,kd->qk"}> : () -> ()
    %cst_31 = arith.constant dense<0.000000e+00> : vector<32x32xf32>
    %119 = tpu.matmul %116, %117, %cst_31 {dimension_numbers = #tpu.dot_dimension_numbers<[1], [1], [0], [0], [0, 0, 1, 0], [], []>} : vector<32x32xbf16>, vector<32x32xbf16>, vector<32x32xf32> -> vector<32x32xf32>
    "tpu.trace_stop"() : () -> ()
    %120 = arith.addf %119, %44 : vector<32x32xf32>
    %cst_32 = arith.constant dense<0xFF800000> : vector<32xf32>
    %121 = vector.multi_reduction <maximumf>, %120, %cst_32 [1] : vector<32x32xf32> to vector<32xf32>
    %122 = vector.shape_cast %121 : vector<32xf32> to vector<32x1xf32>
    %123 = vector.broadcast %122 : vector<32x1xf32> to vector<32x32xf32>
    %124 = arith.subf %120, %123 : vector<32x32xf32>
    %125 = math.exp %124 : vector<32x32xf32>
    %cst_33 = arith.constant dense<0.000000e+00> : vector<32xf32>
    %126 = vector.multi_reduction <add>, %125, %cst_33 [1] : vector<32x32xf32> to vector<32xf32>
    %127 = vector.shape_cast %126 : vector<32xf32> to vector<32x1xf32>
    %128 = tpu.reciprocal %127 {approx = true} : vector<32x1xf32> -> vector<32x1xf32>
    %129 = vector.broadcast %128 : vector<32x1xf32> to vector<32x32xf32>
    %130 = arith.mulf %125, %129 : vector<32x32xf32>
    %131 = arith.truncf %130 : vector<32x32xf32> to vector<32x32xbf16>
    %cst_34 = arith.constant dense<0.000000e+00> : vector<32x32xf32>
    %132 = tpu.matmul %131, %118, %cst_34 {dimension_numbers = #tpu.dot_dimension_numbers<[1], [0], [0], [1], [0, 0, 1, 1], [], []>} : vector<32x32xbf16>, vector<32x32xbf16>, vector<32x32xf32> -> vector<32x32xf32>
    %133 = vector.extract_strided_slice %115 {offsets = [0, 32], sizes = [32, 32], strides = [1, 1]} : vector<32x384xbf16> to vector<32x32xbf16>
    %134 = vector.extract_strided_slice %115 {offsets = [0, 160], sizes = [32, 32], strides = [1, 1]} : vector<32x384xbf16> to vector<32x32xbf16>
    %135 = vector.extract_strided_slice %115 {offsets = [0, 288], sizes = [32, 32], strides = [1, 1]} : vector<32x384xbf16> to vector<32x32xbf16>
    "tpu.trace_start"() <{level = 10 : i32, message = "qd,kd->qk"}> : () -> ()
    %cst_35 = arith.constant dense<0.000000e+00> : vector<32x32xf32>
    %136 = tpu.matmul %133, %134, %cst_35 {dimension_numbers = #tpu.dot_dimension_numbers<[1], [1], [0], [0], [0, 0, 1, 0], [], []>} : vector<32x32xbf16>, vector<32x32xbf16>, vector<32x32xf32> -> vector<32x32xf32>
    "tpu.trace_stop"() : () -> ()
    %137 = arith.addf %136, %44 : vector<32x32xf32>
    %cst_36 = arith.constant dense<0xFF800000> : vector<32xf32>
    %138 = vector.multi_reduction <maximumf>, %137, %cst_36 [1] : vector<32x32xf32> to vector<32xf32>
    %139 = vector.shape_cast %138 : vector<32xf32> to vector<32x1xf32>
    %140 = vector.broadcast %139 : vector<32x1xf32> to vector<32x32xf32>
    %141 = arith.subf %137, %140 : vector<32x32xf32>
    %142 = math.exp %141 : vector<32x32xf32>
    %cst_37 = arith.constant dense<0.000000e+00> : vector<32xf32>
    %143 = vector.multi_reduction <add>, %142, %cst_37 [1] : vector<32x32xf32> to vector<32xf32>
    %144 = vector.shape_cast %143 : vector<32xf32> to vector<32x1xf32>
    %145 = tpu.reciprocal %144 {approx = true} : vector<32x1xf32> -> vector<32x1xf32>
    %146 = vector.broadcast %145 : vector<32x1xf32> to vector<32x32xf32>
    %147 = arith.mulf %142, %146 : vector<32x32xf32>
    %148 = arith.truncf %147 : vector<32x32xf32> to vector<32x32xbf16>
    %cst_38 = arith.constant dense<0.000000e+00> : vector<32x32xf32>
    %149 = tpu.matmul %148, %135, %cst_38 {dimension_numbers = #tpu.dot_dimension_numbers<[1], [0], [0], [1], [0, 0, 1, 1], [], []>} : vector<32x32xbf16>, vector<32x32xbf16>, vector<32x32xf32> -> vector<32x32xf32>
    %150 = vector.extract_strided_slice %115 {offsets = [0, 64], sizes = [32, 32], strides = [1, 1]} : vector<32x384xbf16> to vector<32x32xbf16>
    %151 = vector.extract_strided_slice %115 {offsets = [0, 192], sizes = [32, 32], strides = [1, 1]} : vector<32x384xbf16> to vector<32x32xbf16>
    %152 = vector.extract_strided_slice %115 {offsets = [0, 320], sizes = [32, 32], strides = [1, 1]} : vector<32x384xbf16> to vector<32x32xbf16>
    "tpu.trace_start"() <{level = 10 : i32, message = "qd,kd->qk"}> : () -> ()
    %cst_39 = arith.constant dense<0.000000e+00> : vector<32x32xf32>
    %153 = tpu.matmul %150, %151, %cst_39 {dimension_numbers = #tpu.dot_dimension_numbers<[1], [1], [0], [0], [0, 0, 1, 0], [], []>} : vector<32x32xbf16>, vector<32x32xbf16>, vector<32x32xf32> -> vector<32x32xf32>
    "tpu.trace_stop"() : () -> ()
    %154 = arith.addf %153, %44 : vector<32x32xf32>
    %cst_40 = arith.constant dense<0xFF800000> : vector<32xf32>
    %155 = vector.multi_reduction <maximumf>, %154, %cst_40 [1] : vector<32x32xf32> to vector<32xf32>
    %156 = vector.shape_cast %155 : vector<32xf32> to vector<32x1xf32>
    %157 = vector.broadcast %156 : vector<32x1xf32> to vector<32x32xf32>
    %158 = arith.subf %154, %157 : vector<32x32xf32>
    %159 = math.exp %158 : vector<32x32xf32>
    %cst_41 = arith.constant dense<0.000000e+00> : vector<32xf32>
    %160 = vector.multi_reduction <add>, %159, %cst_41 [1] : vector<32x32xf32> to vector<32xf32>
    %161 = vector.shape_cast %160 : vector<32xf32> to vector<32x1xf32>
    %162 = tpu.reciprocal %161 {approx = true} : vector<32x1xf32> -> vector<32x1xf32>
    %163 = vector.broadcast %162 : vector<32x1xf32> to vector<32x32xf32>
    %164 = arith.mulf %159, %163 : vector<32x32xf32>
    %165 = arith.truncf %164 : vector<32x32xf32> to vector<32x32xbf16>
    %cst_42 = arith.constant dense<0.000000e+00> : vector<32x32xf32>
    %166 = tpu.matmul %165, %152, %cst_42 {dimension_numbers = #tpu.dot_dimension_numbers<[1], [0], [0], [1], [0, 0, 1, 1], [], []>} : vector<32x32xbf16>, vector<32x32xbf16>, vector<32x32xf32> -> vector<32x32xf32>
    %167 = vector.extract_strided_slice %115 {offsets = [0, 96], sizes = [32, 32], strides = [1, 1]} : vector<32x384xbf16> to vector<32x32xbf16>
    %168 = vector.extract_strided_slice %115 {offsets = [0, 224], sizes = [32, 32], strides = [1, 1]} : vector<32x384xbf16> to vector<32x32xbf16>
    %169 = vector.extract_strided_slice %115 {offsets = [0, 352], sizes = [32, 32], strides = [1, 1]} : vector<32x384xbf16> to vector<32x32xbf16>
    "tpu.trace_start"() <{level = 10 : i32, message = "qd,kd->qk"}> : () -> ()
    %cst_43 = arith.constant dense<0.000000e+00> : vector<32x32xf32>
    %170 = tpu.matmul %167, %168, %cst_43 {dimension_numbers = #tpu.dot_dimension_numbers<[1], [1], [0], [0], [0, 0, 1, 0], [], []>} : vector<32x32xbf16>, vector<32x32xbf16>, vector<32x32xf32> -> vector<32x32xf32>
    "tpu.trace_stop"() : () -> ()
    %171 = arith.addf %170, %44 : vector<32x32xf32>
    %cst_44 = arith.constant dense<0xFF800000> : vector<32xf32>
    %172 = vector.multi_reduction <maximumf>, %171, %cst_44 [1] : vector<32x32xf32> to vector<32xf32>
    %173 = vector.shape_cast %172 : vector<32xf32> to vector<32x1xf32>
    %174 = vector.broadcast %173 : vector<32x1xf32> to vector<32x32xf32>
    %175 = arith.subf %171, %174 : vector<32x32xf32>
    %176 = math.exp %175 : vector<32x32xf32>
    %cst_45 = arith.constant dense<0.000000e+00> : vector<32xf32>
    %177 = vector.multi_reduction <add>, %176, %cst_45 [1] : vector<32x32xf32> to vector<32xf32>
    %178 = vector.shape_cast %177 : vector<32xf32> to vector<32x1xf32>
    %179 = tpu.reciprocal %178 {approx = true} : vector<32x1xf32> -> vector<32x1xf32>
    %180 = vector.broadcast %179 : vector<32x1xf32> to vector<32x32xf32>
    %181 = arith.mulf %176, %180 : vector<32x32xf32>
    %182 = arith.truncf %181 : vector<32x32xf32> to vector<32x32xbf16>
    %cst_46 = arith.constant dense<0.000000e+00> : vector<32x32xf32>
    %183 = tpu.matmul %182, %169, %cst_46 {dimension_numbers = #tpu.dot_dimension_numbers<[1], [0], [0], [1], [0, 0, 1, 1], [], []>} : vector<32x32xbf16>, vector<32x32xbf16>, vector<32x32xf32> -> vector<32x32xf32>
    %184 = tpu.concatenate %132, %149, %166, %183 in 1 : vector<32x32xf32>, vector<32x32xf32>, vector<32x32xf32>, vector<32x32xf32> -> vector<32x128xf32>
    %185 = tpu.concatenate %114, %184 in 0 : vector<32x128xf32>, vector<32x128xf32> -> vector<64x128xf32>
    %186 = arith.truncf %185 : vector<64x128xf32> to vector<64x128xbf16>
    %c0_47 = arith.constant 0 : index
    %c0_48 = arith.constant 0 : index
    %c0_49 = arith.constant 0 : index
    %187 = vector.load %arg4[%c0_47, %c0_48, %c0_49] : memref<1x128x128xbf16, #tpu.memory_space<vmem>>, vector<1x128x128xbf16>
    %188 = vector.shape_cast %187 : vector<1x128x128xbf16> to vector<128x128xbf16>
    %cst_50 = arith.constant dense<0.000000e+00> : vector<64x128xf32>
    %189 = tpu.matmul %186, %188, %cst_50 {dimension_numbers = #tpu.dot_dimension_numbers<[1], [0], [0], [1], [0, 0, 1, 1], [], []>} : vector<64x128xbf16>, vector<128x128xbf16>, vector<64x128xf32> -> vector<64x128xf32>
    %190 = vector.broadcast %8 : vector<1x128xf32> to vector<64x128xf32>
    %191 = arith.addf %189, %190 : vector<64x128xf32>
    %192 = arith.addf %3, %191 : vector<64x128xf32>
    %cst_51 = arith.constant dense<0.000000e+00> : vector<64xf32>
    %193 = vector.multi_reduction <add>, %192, %cst_51 [1] : vector<64x128xf32> to vector<64xf32>
    %194 = vector.shape_cast %193 : vector<64xf32> to vector<64x1xf32>
    %cst_52 = arith.constant 1.280000e+02 : f32
    %195 = vector.broadcast %cst_52 : f32 to vector<64x1xf32>
    %196 = arith.divf %194, %195 : vector<64x1xf32>
    %197 = vector.broadcast %196 : vector<64x1xf32> to vector<64x128xf32>
    %198 = arith.subf %192, %197 : vector<64x128xf32>
    %199 = arith.mulf %198, %198 : vector<64x128xf32>
    %cst_53 = arith.constant dense<0.000000e+00> : vector<64xf32>
    %200 = vector.multi_reduction <add>, %199, %cst_53 [1] : vector<64x128xf32> to vector<64xf32>
    %201 = vector.shape_cast %200 : vector<64xf32> to vector<64x1xf32>
    %cst_54 = arith.constant 1.280000e+02 : f32
    %202 = vector.broadcast %cst_54 : f32 to vector<64x1xf32>
    %203 = arith.divf %201, %202 : vector<64x1xf32>
    %204 = vector.broadcast %196 : vector<64x1xf32> to vector<64x128xf32>
    %205 = arith.subf %192, %204 : vector<64x128xf32>
    %cst_55 = arith.constant 9.99999974E-6 : f32
    %206 = vector.broadcast %cst_55 : f32 to vector<64x1xf32>
    %207 = arith.addf %203, %206 : vector<64x1xf32>
    %208 = math.rsqrt %207 : vector<64x1xf32>
    %209 = vector.broadcast %208 : vector<64x1xf32> to vector<64x128xf32>
    %210 = arith.mulf %205, %209 : vector<64x128xf32>
    %211 = vector.broadcast %9 : vector<1x128xf32> to vector<64x128xf32>
    %212 = arith.mulf %210, %211 : vector<64x128xf32>
    %213 = vector.broadcast %10 : vector<1x128xf32> to vector<64x128xf32>
    %214 = arith.addf %212, %213 : vector<64x128xf32>
    %215 = arith.truncf %214 : vector<64x128xf32> to vector<64x128xbf16>
    %c0_56 = arith.constant 0 : index
    %c0_57 = arith.constant 0 : index
    %c0_58 = arith.constant 0 : index
    %216 = vector.load %arg5[%c0_56, %c0_57, %c0_58] : memref<1x128x512xbf16, #tpu.memory_space<vmem>>, vector<1x128x512xbf16>
    %217 = vector.shape_cast %216 : vector<1x128x512xbf16> to vector<128x512xbf16>
    %cst_59 = arith.constant dense<0.000000e+00> : vector<64x512xf32>
    %218 = tpu.matmul %215, %217, %cst_59 {dimension_numbers = #tpu.dot_dimension_numbers<[1], [0], [0], [1], [0, 0, 1, 1], [], []>} : vector<64x128xbf16>, vector<128x512xbf16>, vector<64x512xf32> -> vector<64x512xf32>
    %c0_60 = arith.constant 0 : index
    %c0_61 = arith.constant 0 : index
    %c0_62 = arith.constant 0 : index
    %219 = vector.load %arg6[%c0_60, %c0_61, %c0_62] : memref<1x1x512xf32, #tpu.memory_space<vmem>>, vector<1x1x512xf32>
    %220 = vector.shape_cast %219 : vector<1x1x512xf32> to vector<1x512xf32>
    %221 = vector.broadcast %220 : vector<1x512xf32> to vector<64x512xf32>
    %222 = arith.addf %218, %221 : vector<64x512xf32>
    %cst_63 = arith.constant 5.000000e-01 : f32
    %223 = vector.broadcast %cst_63 : f32 to vector<64x512xf32>
    %224 = arith.mulf %223, %222 : vector<64x512xf32>
    %cst_64 = arith.constant 4.471500e-02 : f32
    %225 = vector.broadcast %cst_64 : f32 to vector<64x512xf32>
    %226 = arith.mulf %225, %222 : vector<64x512xf32>
    %227 = arith.mulf %226, %222 : vector<64x512xf32>
    %228 = arith.mulf %227, %222 : vector<64x512xf32>
    %229 = arith.addf %222, %228 : vector<64x512xf32>
    %cst_65 = arith.constant 0.797884583 : f32
    %230 = vector.broadcast %cst_65 : f32 to vector<64x512xf32>
    %231 = arith.mulf %230, %229 : vector<64x512xf32>
    %232 = math.tanh %231 : vector<64x512xf32>
    %cst_66 = arith.constant 1.000000e+00 : f32
    %233 = vector.broadcast %cst_66 : f32 to vector<64x512xf32>
    %234 = arith.addf %233, %232 : vector<64x512xf32>
    %235 = arith.mulf %224, %234 : vector<64x512xf32>
    %236 = arith.truncf %235 : vector<64x512xf32> to vector<64x512xbf16>
    %c0_67 = arith.constant 0 : index
    %c0_68 = arith.constant 0 : index
    %c0_69 = arith.constant 0 : index
    %237 = vector.load %arg7[%c0_67, %c0_68, %c0_69] : memref<1x512x128xbf16, #tpu.memory_space<vmem>>, vector<1x512x128xbf16>
    %238 = vector.shape_cast %237 : vector<1x512x128xbf16> to vector<512x128xbf16>
    %cst_70 = arith.constant dense<0.000000e+00> : vector<64x128xf32>
    %239 = tpu.matmul %236, %238, %cst_70 {dimension_numbers = #tpu.dot_dimension_numbers<[1], [0], [0], [1], [0, 0, 1, 1], [], []>} : vector<64x512xbf16>, vector<512x128xbf16>, vector<64x128xf32> -> vector<64x128xf32>
    %240 = vector.broadcast %11 : vector<1x128xf32> to vector<64x128xf32>
    %241 = arith.addf %239, %240 : vector<64x128xf32>
    %242 = arith.addf %192, %241 : vector<64x128xf32>
    %c0_71 = arith.constant 0 : index
    %c0_72 = arith.constant 0 : index
    %243 = vector.load %arg11[%c0_71, %c0_72] : memref<64x128xf32, #tpu.memory_space<vmem>>, vector<64x128xf32>
    tpu.vector_store %arg11[%c0_71, %c0_72], %242 {strides = array<i32>} : memref<64x128xf32, #tpu.memory_space<vmem>>, vector<64x128xf32>,
    %c1_i32 = arith.constant 1 : i32
    %244 = arith.cmpi eq, %arg0, %c1_i32 : i32
    %245 = arith.extui %244 : i1 to i32
    %c0_i32_73 = arith.constant 0 : i32
    %246 = arith.cmpi ne, %245, %c0_i32_73 : i32
    scf.if %246 {
      %c0_74 = arith.constant 0 : index
      %c0_75 = arith.constant 0 : index
      %247 = vector.load %arg8[%c0_74, %c0_75] : memref<8x128xf32, #tpu.memory_space<vmem>>, vector<8x128xf32>
      %248 = vector.extract_strided_slice %247 {offsets = [0, 0], sizes = [1, 128], strides = [1, 1]} : vector<8x128xf32> to vector<1x128xf32>
      %249 = vector.extract_strided_slice %247 {offsets = [1, 0], sizes = [1, 128], strides = [1, 1]} : vector<8x128xf32> to vector<1x128xf32>
      %cst_76 = arith.constant dense<0.000000e+00> : vector<64xf32>
      %250 = vector.multi_reduction <add>, %242, %cst_76 [1] : vector<64x128xf32> to vector<64xf32>
      %251 = vector.shape_cast %250 : vector<64xf32> to vector<64x1xf32>
      %cst_77 = arith.constant 1.280000e+02 : f32
      %252 = vector.broadcast %cst_77 : f32 to vector<64x1xf32>
      %253 = arith.divf %251, %252 : vector<64x1xf32>
      %254 = vector.broadcast %253 : vector<64x1xf32> to vector<64x128xf32>
      %255 = arith.subf %242, %254 : vector<64x128xf32>
      %256 = arith.mulf %255, %255 : vector<64x128xf32>
      %cst_78 = arith.constant dense<0.000000e+00> : vector<64xf32>
      %257 = vector.multi_reduction <add>, %256, %cst_78 [1] : vector<64x128xf32> to vector<64xf32>
      %258 = vector.shape_cast %257 : vector<64xf32> to vector<64x1xf32>
      %cst_79 = arith.constant 1.280000e+02 : f32
      %259 = vector.broadcast %cst_79 : f32 to vector<64x1xf32>
      %260 = arith.divf %258, %259 : vector<64x1xf32>
      %261 = vector.broadcast %253 : vector<64x1xf32> to vector<64x128xf32>
      %262 = arith.subf %242, %261 : vector<64x128xf32>
      %cst_80 = arith.constant 9.99999974E-6 : f32
      %263 = vector.broadcast %cst_80 : f32 to vector<64x1xf32>
      %264 = arith.addf %260, %263 : vector<64x1xf32>
      %265 = math.rsqrt %264 : vector<64x1xf32>
      %266 = vector.broadcast %265 : vector<64x1xf32> to vector<64x128xf32>
      %267 = arith.mulf %262, %266 : vector<64x128xf32>
      %268 = vector.broadcast %248 : vector<1x128xf32> to vector<64x128xf32>
      %269 = arith.mulf %267, %268 : vector<64x128xf32>
      %270 = vector.broadcast %249 : vector<1x128xf32> to vector<64x128xf32>
      %271 = arith.addf %269, %270 : vector<64x128xf32>
      %272 = arith.truncf %271 : vector<64x128xf32> to vector<64x128xbf16>
      %c0_81 = arith.constant 0 : index
      %c0_82 = arith.constant 0 : index
      %273 = vector.load %arg9[%c0_81, %c0_82] : memref<128x256xbf16, #tpu.memory_space<vmem>>, vector<128x256xbf16>
      %cst_83 = arith.constant dense<0.000000e+00> : vector<64x256xf32>
      %274 = tpu.matmul %272, %273, %cst_83 {dimension_numbers = #tpu.dot_dimension_numbers<[1], [0], [0], [1], [0, 0, 1, 1], [], []>} : vector<64x128xbf16>, vector<128x256xbf16>, vector<64x256xf32> -> vector<64x256xf32>
      %275 = arith.truncf %274 : vector<64x256xf32> to vector<64x256xbf16>
      %c0_84 = arith.constant 0 : index
      %c0_85 = arith.constant 0 : index
      %276 = vector.load %arg10[%c0_84, %c0_85] : memref<64x256xbf16, #tpu.memory_space<vmem>>, vector<64x256xbf16>
      tpu.vector_store %arg10[%c0_84, %c0_85], %275 {strides = array<i32>} : memref<64x256xbf16, #tpu.memory_space<vmem>>, vector<64x256xbf16>,
    } else {
    }
    return
  }
  func.func @transform_0(%arg0: i32) -> (i32, i32) {
    %c0_i32 = arith.constant 0 : i32
    %c0_i32_0 = arith.constant 0 : i32
    %c0_i32_1 = arith.constant 0 : i32
    return %c0_i32, %c0_i32_0 : i32, i32
  }
  func.func @transform_1(%arg0: i32) -> (i32, i32, i32) {
    %c0_i32 = arith.constant 0 : i32
    %c0_i32_0 = arith.constant 0 : i32
    %c0_i32_1 = arith.constant 0 : i32
    return %arg0, %c0_i32, %c0_i32_0 : i32, i32, i32
  }
  func.func @transform_2(%arg0: i32) -> (i32, i32, i32) {
    %c0_i32 = arith.constant 0 : i32
    %c0_i32_0 = arith.constant 0 : i32
    %c0_i32_1 = arith.constant 0 : i32
    return %arg0, %c0_i32, %c0_i32_0 : i32, i32, i32
  }
  func.func @transform_3(%arg0: i32) -> (i32, i32, i32) {
    %c0_i32 = arith.constant 0 : i32
    %c0_i32_0 = arith.constant 0 : i32
    %c0_i32_1 = arith.constant 0 : i32
    return %arg0, %c0_i32, %c0_i32_0 : i32, i32, i32
  }
  func.func @transform_4(%arg0: i32) -> (i32, i32, i32) {
    %c0_i32 = arith.constant 0 : i32
    %c0_i32_0 = arith.constant 0 : i32
    %c0_i32_1 = arith.constant 0 : i32
    return %arg0, %c0_i32, %c0_i32_0 : i32, i32, i32
  }
  func.func @transform_5(%arg0: i32) -> (i32, i32, i32) {
    %c0_i32 = arith.constant 0 : i32
    %c0_i32_0 = arith.constant 0 : i32
    %c0_i32_1 = arith.constant 0 : i32
    return %arg0, %c0_i32, %c0_i32_0 : i32, i32, i32
  }
  func.func @transform_6(%arg0: i32) -> (i32, i32, i32) {
    %c0_i32 = arith.constant 0 : i32
    %c0_i32_0 = arith.constant 0 : i32
    %c0_i32_1 = arith.constant 0 : i32
    return %arg0, %c0_i32, %c0_i32_0 : i32, i32, i32
  }
  func.func @transform_7(%arg0: i32) -> (i32, i32) {
    %c0_i32 = arith.constant 0 : i32
    %c0_i32_0 = arith.constant 0 : i32
    %c0_i32_1 = arith.constant 0 : i32
    return %c0_i32, %c0_i32_0 : i32, i32
  }
  func.func @transform_8(%arg0: i32) -> (i32, i32) {
    %c0_i32 = arith.constant 0 : i32
    %c0_i32_0 = arith.constant 0 : i32
    %c0_i32_1 = arith.constant 0 : i32
    return %c0_i32, %c0_i32_0 : i32, i32
  }
  func.func @transform_9(%arg0: i32) -> (i32, i32) {
    %c0_i32 = arith.constant 0 : i32
    %c0_i32_0 = arith.constant 0 : i32
    %c0_i32_1 = arith.constant 0 : i32
    return %c0_i32, %c0_i32_0 : i32, i32
  }
}

</mosaic_0001>

<bundles_post_ra>
// kernel: tpu_custom_call.1
= control target key start
LH: loop header
LB: loop body
LE: loop exit
PB: predicated region body
PF: predicated region fallthrough
CT: control target
= control target key end

     0   :  { %s7324_s0 = inlined_call_operand.hbm [shape: f32[64,128], index: 0, kind: input, shape index: {}]   ;;  %s7325_s1 = inlined_call_operand.hbm [shape: f32[2,8,128], index: 1, kind: input, shape index: {}]   ;;  %s7326_s2 = inlined_call_operand.hbm [shape: bf16[2,128,384], index: 2, kind: input, shape index: {}]   ;;  %s7327_s3 = inlined_call_operand.hbm [shape: bf16[2,128,128], index: 3, kind: input, shape index: {}]   ;;  %s7328_s4 = inlined_call_operand.hbm [shape: bf16[2,128,512], index: 4, kind: input, shape index: {}]   ;;  %s7329_s5 = inlined_call_operand.vmem [shape: f32[2,1,512], index: 5, kind: input, shape index: {}]   ;;  %s7330_s6 = inlined_call_operand.hbm [shape: bf16[2,512,128], index: 6, kind: input, shape index: {}]   ;;  %s7331_s7 = inlined_call_operand.vmem [shape: f32[8,128], index: 7, kind: input, shape index: {}]   ;;  %s7332_s8 = inlined_call_operand.hbm [shape: bf16[128,256], index: 8, kind: input, shape index: {}]   ;;  %s7333_s9 = inlined_call_operand.hbm [shape: bf16[64,256], index: 9, kind: output, shape index: {}]  }
   0x1   :  { %7351 = sst [smem:[#allocation25_spill]] %s7325_s1 }
   0x2   :  { %7352 = sst [smem:[#allocation26_spill]] %s7327_s3 }
   0x3   :  { %7353 = sst [smem:[#allocation27_spill]] %s7331_s7 }
   0x4   :  { %7354 = sst [smem:[#allocation28_spill]] %s7332_s8 }
   0x5   :  { %7355 = sst [smem:[#allocation29_spill]] %s7333_s9 }
   0x6   :  { %14 = vsyncpa [#allocation4], 0 }
   0x7   :  { %15 = vsyncpa [#allocation7], 0 }
   0x8   :  { %17 = vsyncpa [#allocation7 + $0x1], 0 }
   0x9   :  { %18 = vsyncpa [#allocation10], 0 }
   0xa   :  { %20 = vsyncpa [#allocation10 + $0x1], 0 }
   0xb   :  { %21 = vsyncpa [#allocation13], 0 }
   0xc   :  { %23 = vsyncpa [#allocation13 + $0x1], 0 }
   0xd   :  { %24 = vsyncpa [#allocation5], 0  ;;  %s5870_s30 = smov 0   ;;  %s5872_s10 = smov 0  }
   0xe   :  { %s5874_s11 = smov 0   ;;  %s5876_s12 = smov 0  }
   0xf LB: > { %7356 = sst [smem:[#allocation22_spill]] %s5790_s11  ;;  %s5889_s13 = sadd.s32 4294967295, %s5794_s12   ;;  %s5794_s12 = sphi %s5876_s12, %s7389_s12   ;;  %s5790_s11 = sphi %s5874_s11, %s7391_s11   ;;  %s5786_s10 = sphi %s5872_s10, %s7393_s10   ;;  %s5782_s30 = sphi %s5870_s30, %s7392_s30  }
  0x10   : > { %p71_p0 = scmp.ne.s32.totalorder %s5786_s10, %s5782_s30  ;;  %p7334_p1 = scmp.eq.s32.totalorder %s5889_s13, 0 }
  0x11   : > { %p4379_p2 = scmp.ge.s32.totalorder %s5794_s12, 1  ;;  %p275_p3 = scmp.lt.s32.totalorder %s5794_s12, 3 }
  0x12   : > { %p5898_p5 = por %p7334_p1, %p71_p0  ;;  %s5796_s16 = smov [#allocation14]  }
  0x13   : > { %p5902_p6 = pnand %p4379_p2, %p275_p3  ;;  %s303_s17 = sshll.u32 %s5796_s16, 4  ;;  %s304_s17 = int_to_ptr.vmem [resolvable:$true] %s303_s17 }
  0x14   : > { %s7357_s14 = scalar_select %p5898_p5, 1, 0 }
  0x15   : > { %s7358_s15 = scalar_select %p5902_p6, 1, 0 }
  0x16   : > { %p4973_p7 = pneg %p5902_p6  ;;  %s5915_s19 = sadd.s32 1, %s5794_s12  }
  0x17   : > { %7360 = sst [smem:[#allocation23_spill]] %s5915_s19  ;;  %s58_s20 = sadd.s32 1, %s5790_s11 }
  0x18   : > { %p5910_p8 = pnand %p4973_p7, %p7334_p1  ;;  %s55_s21 = ssub.s32 %s5794_s12, %s5915_s19 }
  0x19   : > { %s7361_s8 = sld [smem:[#allocation28_spill]] }
  0x1a   : > { %s7359_s18 = scalar_select %p5910_p8, 1, 0 }
  0x1b   : > { %p7341_p10 = pneg %p5910_p8 }
  0x1f   : > { %s5508_s24 = scalar_lea.hbm %s7361_s8, 2048 }
  0x20   : > { %p5509_p9 = scmp.ne.s32.totalorder %s7361_s8, %s5508_s24  ;;  %p5515_p13 = scmp.lt.u32.totalorder %s5508_s24, %s7361_s8 }
  0x22   : > { %p5511_p11 = pnand %p7341_p10, %p5509_p9 }
  0x24   : > { %p5512_p12 = pneg %p5511_p11 }
  0x26   : > { %p5517_p0 = pnand %p5515_p13, %p5512_p12 }
  0x28   : > { %5520 = shalt.err (!%p5517_p0)
}
  0x29   : > { %s5521_s29 = scalar_lea.vmem %s304_s17, 2048  ;;  %p5529_p4 = scmp.lt.s32.totalorder %s304_s17, %s304_s17 }
  0x2a   : > { %p5522_p2 = scmp.ne.s32.totalorder %s304_s17, %s5521_s29  ;;  %p5530_p1 = scmp.lt.s32.totalorder %s5521_s29, %s5521_s29 }
  0x2c   : > { %p5524_p3 = pnand %p5522_p2, %p7341_p10  ;;  %p5531_p5 = por %p5530_p1, %p5529_p4 }
  0x2e   : > { %p5525_p7 = pneg %p5524_p3 }
  0x30   : > { %p5532_p6 = pnand %p5531_p5, %p5525_p7 }
  0x32   : > { %5535 = shalt.err (!%p5532_p6)
}
  0x33   : > { %s7339_s30 = smov 128   ;;  %s7340_s16 = smov 8  }
  0x34   : > { %4979 = dma.hbm_to_vmem [thread:$0]  (!%p5910_p8), %s7361_s8, 2048, %s304_s17, [#allocation13], %s7339_s30, %s7339_s30, %s7340_s16  }
  0x35   : > { %p56_p1 = scmp.eq.s32.totalorder %s55_s21, 0  ;;  %p65_p4 = scmp.ne.s32.totalorder %s5790_s11, %s5786_s10 }
  0x36   : > { %p66_p5 = scmp.eq.s32.totalorder %s5794_s12, 0  ;;  %p4998_p6 = scmp.lt.s32.totalorder %s5794_s12, 2 }
  0x37   : > { %s5950_s24 = scalar_select %p56_p1, %s5790_s11, %s58_s20  }
  0x38   : > { %p67_p9 = por %p66_p5, %p65_p4  ;;  %s5953_s25 = sand.u32 1, %s5794_s12  }
  0x39   : > { %7362 = sst [smem:[#allocation24_spill]] %s5950_s24  ;;  %s5956_s26 = sand.u32 1, %s5790_s11  }
  0x3a   : > { %s4383_s27 = sshll.u32 %s5956_s26, 3  ;;  %s4384_s28 = sshll.u32 %s5794_s12, 7 }
  0x3b   : > { %s7363_s1 = sld [smem:[#allocation25_spill]]  ;;  %s321_s20 = scalar_lea.vmem [#allocation6], %s4383_s27 }
  0x3c   : > { %s328_s21 = sshll.u32 %s321_s20, 4  ;;  %p5965_p11 = pnand %p4998_p6, %p67_p9  ;;  %s5969_s21 = int_to_ptr.vmem [resolvable:$true] %s328_s21 }
  0x3d   : > { %s7345_s30 = scalar_lea.sflag [#allocation7], %s5953_s25 }
  0x3e   : > { %s7364_s22 = scalar_select %p5965_p11, 1, 0 }
  0x3f   : > { %p5977_p13 = pneg %p5965_p11 }
  0x41   : > { %s5963_s17 = scalar_lea.hbm %s7363_s1, %s4384_s28  ;;  %s5541_s29 = scalar_lea.hbm %s7363_s1, 256 }
  0x42   : > { %s5536_s16 = scalar_lea.hbm %s5963_s17, 128  ;;  %p5542_p3 = scmp.lt.u32.totalorder %s5963_s17, %s7363_s1 }
  0x43   : > { %p5537_p12 = scmp.ne.s32.totalorder %s5963_s17, %s5536_s16  ;;  %p5543_p7 = scmp.lt.u32.totalorder %s5541_s29, %s5536_s16 }
  0x44   : > { %s7365_s19 = scalar_select %p5977_p13, 1, 0 }
  0x45   : > { %p5539_p0 = pnand %p5977_p13, %p5537_p12  ;;  %p5544_p1 = por %p5543_p7, %p5542_p3 }
  0x46   : > { %p5545_p4 = scmp.lt.u32.totalorder %s5536_s16, %s5963_s17 }
  0x47   : > { %p5540_p2 = pneg %p5539_p0 }
  0x48   : > { %p5546_p5 = por %p5545_p4, %p5544_p1 }
  0x4a   : > { %p5547_p6 = pnand %p5546_p5, %p5540_p2 }
  0x4c   : > { %5550 = shalt.err (!%p5547_p6)
}
  0x4d   : > { %s5551_s23 = scalar_lea.vmem %s5969_s21, 128  ;;  %s5799_s27 = smov [#allocation6]  }
  0x4e   : > { %p5552_p9 = scmp.ne.s32.totalorder %s5969_s21, %s5551_s23  ;;  %s5556_s28 = sshll.u32 %s5799_s27, 4  ;;  %s5557_s28 = int_to_ptr.vmem [resolvable:$false] %s5556_s28 }
  0x4f   : > { %s5558_s8 = scalar_lea.vmem %s5557_s28, 256  ;;  %p5559_p10 = scmp.lt.s32.totalorder %s5969_s21, %s5557_s28 }
  0x50   : > { %p5554_p12 = pnand %p5552_p9, %p5977_p13  ;;  %p5560_p8 = scmp.lt.s32.totalorder %s5558_s8, %s5551_s23 }
  0x52   : > { %p5555_p0 = pneg %p5554_p12  ;;  %p5561_p3 = por %p5560_p8, %p5559_p10 }
  0x54   : > { %p5562_p7 = pnand %p5561_p3, %p5555_p0 }
  0x56   : > { %5565 = shalt.err (!%p5562_p7)
}
  0x57   : > { %4983 = dma.hbm_to_vmem [thread:$0]  (!%p5965_p11), %s5963_s17, 128, %s5969_s21, %s7345_s30  }
  0x58   : > { %s4386_s29 = sshll.u32 %s5956_s26, 6  ;;  %s4561_s20 = sshll.u32 %s5794_s12, 10 }
  0x59   : > { %s7366_s3 = sld [smem:[#allocation26_spill]]  ;;  %s360_s8 = scalar_lea.vmem [#allocation9], %s4386_s29 }
  0x5a   : > { %s367_s1 = sshll.u32 %s360_s8, 4  ;;  %s357_s24 = scalar_lea.sflag [#allocation10], %s5953_s25  ;;  %s6010_s1 = int_to_ptr.vmem [resolvable:$true] %s367_s1 }
  0x5f   : > { %s6008_s28 = scalar_lea.hbm %s7366_s3, %s4561_s20  ;;  %s5571_s27 = scalar_lea.hbm %s7366_s3, 2048 }
  0x60   : > { %s5566_s11 = scalar_lea.hbm %s6008_s28, 1024  ;;  %p5572_p1 = scmp.lt.u32.totalorder %s6008_s28, %s7366_s3 }
  0x61   : > { %p5567_p8 = scmp.ne.s32.totalorder %s6008_s28, %s5566_s11  ;;  %p5573_p4 = scmp.lt.u32.totalorder %s5571_s27, %s5566_s11 }
  0x62   : > { %p5575_p6 = scmp.lt.u32.totalorder %s5566_s11, %s6008_s28 }
  0x63   : > { %p5569_p10 = pnand %p5567_p8, %p5977_p13  ;;  %p5574_p5 = por %p5573_p4, %p5572_p1 }
  0x65   : > { %p5570_p2 = pneg %p5569_p10  ;;  %p5576_p9 = por %p5575_p6, %p5574_p5 }
  0x67   : > { %p5577_p12 = pnand %p5576_p9, %p5570_p2 }
  0x69   : > { %5580 = shalt.err (!%p5577_p12)
}
  0x6a   : > { %s5581_s29 = scalar_lea.vmem %s6010_s1, 1024  ;;  %s5800_s8 = smov [#allocation9]  }
  0x6b   : > { %p5582_p0 = scmp.ne.s32.totalorder %s6010_s1, %s5581_s29  ;;  %s5586_s17 = sshll.u32 %s5800_s8, 4  ;;  %s5587_s17 = int_to_ptr.vmem [resolvable:$false] %s5586_s17 }
  0x6c   : > { %s5588_s21 = scalar_lea.vmem %s5587_s17, 2048  ;;  %p5589_p8 = scmp.lt.s32.totalorder %s6010_s1, %s5587_s17 }
  0x6d   : > { %p5584_p3 = pnand %p5582_p0, %p5977_p13  ;;  %p5590_p10 = scmp.lt.s32.totalorder %s5588_s21, %s5581_s29 }
  0x6f   : > { %p5585_p7 = pneg %p5584_p3  ;;  %p5591_p1 = por %p5590_p10, %p5589_p8 }
  0x71   : > { %p5592_p4 = pnand %p5591_p1, %p5585_p7 }
  0x73   : > { %5595 = shalt.err (!%p5592_p4)
}
  0x74   : > { %s5801_s11 = smov 64   ;;  %s5802_s27 = smov 4  }
  0x75   : > { %4989 = dma.hbm_to_vmem [thread:$0]  (!%p5965_p11), %s6008_s28, 1024, %s6010_s1, %s357_s24, %s5801_s11, %s5801_s11, %s5802_s27  }
  0x76   : > { %s5803_s20 = smov [#allocation3]   ;;  %s4949_s29 = smul.u32 3072, %s5794_s12 }
  0x77   : > { %s287_s23 = sshll.u32 %s5803_s20, 4  ;;  %s7367_s8 = smul.u32 192, %s5956_s26  ;;  %s288_s23 = int_to_ptr.vmem [resolvable:$true] %s287_s23 }
  0x78   : > { %s5596_s3 = scalar_lea.hbm %s7324_s0, 1024  ;;  %p7368_p5 = scmp.ne.s32.totalorder %s7359_s18, 0 }
  0x79   : > { %s339_s17 = scalar_lea.vmem [#allocation8], %s7367_s8  ;;  %p5597_p2 = scmp.ne.s32.totalorder %s7324_s0, %s5596_s3 }
  0x7a   : > { %s346_s21 = sshll.u32 %s339_s17, 4  ;;  %p7369_p6 = pneg %p7368_p5  ;;  %s6070_s21 = int_to_ptr.vmem [resolvable:$true] %s346_s21 }
  0x7b   : > { %p5603_p0 = scmp.lt.u32.totalorder %s5596_s3, %s7324_s0 }
  0x7c   : > { %p5599_p9 = pnand %p5597_p2, %p7369_p6 }
  0x7e   : > { %p5600_p12 = pneg %p5599_p9 }
  0x80   : > { %p5605_p3 = pnand %p5603_p0, %p5600_p12 }
  0x82   : > { %5608 = shalt.err (!%p5605_p3)
}
  0x83   : > { %s5609_s20 = scalar_lea.vmem %s288_s23, 1024  ;;  %p7370_p8 = pmov %p7369_p6 }
  0x84   : > { %p5610_p7 = scmp.ne.s32.totalorder %s288_s23, %s5609_s20  ;;  %p5617_p4 = scmp.lt.s32.totalorder %s288_s23, %s288_s23 }
  0x85   : > { %p5618_p11 = scmp.lt.s32.totalorder %s5609_s20, %s5609_s20 }
  0x86   : > { %p5612_p10 = pnand %p5610_p7, %p7370_p8 }
  0x87   : > { %p5619_p13 = por %p5618_p11, %p5617_p4 }
  0x88   : > { %p5613_p1 = pneg %p5612_p10 }
  0x8a   : > { %p5620_p2 = pnand %p5619_p13, %p5613_p1 }
  0x8c   : > { %5623 = shalt.err (!%p5620_p2)
}
  0x8d   : > { %s7371_s7 = smov 8   ;;  %s7372_s9 = smov 128  }
  0x8e   : > { %4976 = dma.hbm_to_vmem [thread:$0]  (!%p7368_p5), %s7324_s0, 1024, %s288_s23, [#allocation4], %s7372_s9, %s7372_s9, %s7371_s7  }
  0x8f   : > { %s6068_s17 = scalar_lea.hbm %s7326_s2, %s4949_s29  ;;  %p7373_p13 = scmp.ne.s32.totalorder %s7365_s19, 0 }
  0x90   : > { %s5624_s18 = scalar_lea.hbm %s6068_s17, 3072  ;;  %s5629_s23 = scalar_lea.hbm %s7326_s2, 6144 }
  0x91   : > { %p5625_p11 = scmp.ne.s32.totalorder %s6068_s17, %s5624_s18  ;;  %p5630_p5 = scmp.lt.u32.totalorder %s6068_s17, %s7326_s2 }
  0x92   : > { %p5631_p12 = scmp.lt.u32.totalorder %s5629_s23, %s5624_s18  ;;  %p5633_p3 = scmp.lt.u32.totalorder %s5624_s18, %s6068_s17 }
  0x93   : > { %p5627_p6 = pnand %p5625_p11, %p7373_p13 }
  0x94   : > { %p5632_p0 = por %p5631_p12, %p5630_p5 }
  0x95   : > { %p5628_p9 = pneg %p5627_p6 }
  0x96   : > { %p5634_p7 = por %p5633_p3, %p5632_p0 }
  0x98   : > { %p5635_p8 = pnand %p5634_p7, %p5628_p9 }
  0x9a   : > { %5638 = shalt.err (!%p5635_p8)
}
  0x9b   : > { %s5639_s29 = scalar_lea.vmem %s6070_s21, 3072  ;;  %s5804_s9 = smov [#allocation8]  }
  0x9c   : > { %p5640_p10 = scmp.ne.s32.totalorder %s6070_s21, %s5639_s29  ;;  %s5644_s3 = sshll.u32 %s5804_s9, 4  ;;  %s5645_s3 = int_to_ptr.vmem [resolvable:$false] %s5644_s3 }
  0x9d   : > { %s5646_s30 = scalar_lea.vmem %s5645_s3, 6144  ;;  %p5647_p2 = scmp.lt.s32.totalorder %s6070_s21, %s5645_s3 }
  0x9e   : > { %p5642_p1 = pnand %p5640_p10, %p7373_p13  ;;  %p5648_p11 = scmp.lt.s32.totalorder %s5646_s30, %s5639_s29 }
  0xa0   : > { %p5643_p4 = pneg %p5642_p1  ;;  %p5649_p6 = por %p5648_p11, %p5647_p2 }
  0xa2   : > { %p5650_p5 = pnand %p5649_p6, %p5643_p4 }
  0xa4   : > { %5653 = shalt.err (!%p5650_p5)
}
  0xa5   : > { %s5805_s16 = smov 192   ;;  %s5806_s8 = smov 12  }
  0xa6   : > { %p7374_p9 = scmp.ne.s32.totalorder %s7364_s22, 0  ;;  %s7375_s18 = scalar_lea.sflag [#allocation7], %s5953_s25 }
  0xa7   : > { %s4562_s1 = sshll.u32 %s5794_s12, 12  ;;  %s7376_s7 = sshll.u32 %s5956_s26, 8 }
  0xa8   : > { %4986 = dma.hbm_to_vmem [thread:$0]  (!%p7374_p9), %s6068_s17, 3072, %s6070_s21, %s7375_s18, %s5805_s16, %s5805_s16, %s5806_s8  }
  0xa9   : > { %s6101_s20 = scalar_lea.hbm %s7328_s4, %s4562_s1  ;;  %s381_s29 = scalar_lea.vmem [#allocation11], %s7376_s7 }
  0xaa   : > { %s388_s9 = sshll.u32 %s381_s29, 4  ;;  %s5654_s3 = scalar_lea.hbm %s6101_s20, 4096  ;;  %s6105_s9 = int_to_ptr.vmem [resolvable:$true] %s388_s9 }
  0xab   : > { %p5655_p12 = scmp.ne.s32.totalorder %s6101_s20, %s5654_s3  ;;  %s5659_s30 = scalar_lea.hbm %s7328_s4, 8192 }
  0xac   : > { %p5660_p7 = scmp.lt.u32.totalorder %s6101_s20, %s7328_s4  ;;  %p5661_p8 = scmp.lt.u32.totalorder %s5659_s30, %s5654_s3 }
  0xad   : > { %p5657_p0 = pnand %p5655_p12, %p7373_p13  ;;  %p5663_p1 = scmp.lt.u32.totalorder %s5654_s3, %s6101_s20 }
  0xae   : > { %p5662_p10 = por %p5661_p8, %p5660_p7 }
  0xaf   : > { %p5658_p3 = pneg %p5657_p0 }
  0xb0   : > { %p5664_p4 = por %p5663_p1, %p5662_p10 }
  0xb2   : > { %p5665_p2 = pnand %p5664_p4, %p5658_p3 }
  0xb4   : > { %5668 = shalt.err (!%p5665_p2)
}
  0xb5   : > { %s5669_s18 = scalar_lea.vmem %s6105_s9, 4096  ;;  %s5807_s28 = smov [#allocation11]  }
  0xb6   : > { %p5670_p11 = scmp.ne.s32.totalorder %s6105_s9, %s5669_s18  ;;  %s5674_s23 = sshll.u32 %s5807_s28, 4  ;;  %s5675_s23 = int_to_ptr.vmem [resolvable:$false] %s5674_s23 }
  0xb7   : > { %s5676_s7 = scalar_lea.vmem %s5675_s23, 8192  ;;  %p5677_p12 = scmp.lt.s32.totalorder %s6105_s9, %s5675_s23 }
  0xb8   : > { %p5672_p6 = pnand %p5670_p11, %p7373_p13  ;;  %p5678_p0 = scmp.lt.s32.totalorder %s5676_s7, %s5669_s18 }
  0xba   : > { %p5673_p5 = pneg %p5672_p6  ;;  %p5679_p7 = por %p5678_p0, %p5677_p12 }
  0xbc   : > { %p5680_p8 = pnand %p5679_p7, %p5673_p5 }
  0xbe   : > { %5683 = shalt.err (!%p5680_p8)
}
  0xbf   : > { %s5808_s29 = smov 256   ;;  %s5809_s3 = smov 16  }
  0xc0   : > { %4992 = dma.hbm_to_vmem [thread:$0]  (!%p7374_p9), %s6101_s20, 4096, %s6105_s9, %s357_s24, %s5808_s29, %s5808_s29, %s5809_s3  }
  0xc1   : > { %s6135_s30 = scalar_lea.hbm %s7330_s6, %s4562_s1  ;;  %s7377_s16 = sshll.u32 %s5956_s26, 8 }
  0xc2   : > { %s409_s8 = scalar_lea.vmem [#allocation12], %s7377_s16  ;;  %s406_s28 = scalar_lea.sflag [#allocation13], %s5953_s25 }
  0xc3   : > { %s416_s18 = sshll.u32 %s409_s8, 4  ;;  %s5684_s23 = scalar_lea.hbm %s6135_s30, 4096  ;;  %s6139_s18 = int_to_ptr.vmem [resolvable:$true] %s416_s18 }
  0xc4   : > { %p5685_p3 = scmp.ne.s32.totalorder %s6135_s30, %s5684_s23  ;;  %s5689_s1 = scalar_lea.hbm %s7330_s6, 8192 }
  0xc5   : > { %p5690_p4 = scmp.lt.u32.totalorder %s6135_s30, %s7330_s6  ;;  %p5691_p2 = scmp.lt.u32.totalorder %s5689_s1, %s5684_s23 }
  0xc6   : > { %p5687_p10 = pnand %p5685_p3, %p7373_p13  ;;  %p5693_p6 = scmp.lt.u32.totalorder %s5684_s23, %s6135_s30 }
  0xc7   : > { %p5692_p11 = por %p5691_p2, %p5690_p4 }
  0xc8   : > { %p5688_p1 = pneg %p5687_p10 }
  0xc9   : > { %p5694_p5 = por %p5693_p6, %p5692_p11 }
  0xcb   : > { %p5695_p12 = pnand %p5694_p5, %p5688_p1 }
  0xcd   : > { %5698 = shalt.err (!%p5695_p12)
}
  0xce   : > { %s5699_s9 = scalar_lea.vmem %s6139_s18, 4096  ;;  %s5810_s7 = smov [#allocation12]  }
  0xcf   : > { %p5700_p0 = scmp.ne.s32.totalorder %s6139_s18, %s5699_s9  ;;  %s5704_s29 = sshll.u32 %s5810_s7, 4  ;;  %s5705_s29 = int_to_ptr.vmem [resolvable:$false] %s5704_s29 }
  0xd0   : > { %s5706_s3 = scalar_lea.vmem %s5705_s29, 8192  ;;  %p5707_p3 = scmp.lt.s32.totalorder %s6139_s18, %s5705_s29 }
  0xd1   : > { %p5702_p7 = pnand %p5700_p0, %p7373_p13  ;;  %p5708_p10 = scmp.lt.s32.totalorder %s5706_s3, %s5699_s9 }
  0xd3   : > { %p5703_p8 = pneg %p5702_p7  ;;  %p5709_p4 = por %p5708_p10, %p5707_p3 }
  0xd5   : > { %p5710_p2 = pnand %p5709_p4, %p5703_p8 }
  0xd7   : > { %5713 = shalt.err (!%p5710_p2)
}
  0xd8   : > { %4995 = dma.hbm_to_vmem [thread:$0]  (!%p7374_p9), %s6135_s30, 4096, %s6139_s18, %s406_s28, %s5801_s11, %s5801_s11, %s5802_s27  }
  0xd9   : > { %p7378_p13 = scmp.ne.s32.totalorder %s7358_s15, 0 }
  0xda   : > { %p7379_p1 = scmp.eq.s32.totalorder (!%p7378_p13), %s5889_s13, 0 }
  0xdb   : > { %428 = sbr.rel (%p7378_p13) target bundleno = 6694 (0x1a26), region = 56 }
  0xe2   : > { %5757 = dma.done.wait (%p7379_p1), [#allocation4], 1024   ;;  %p7380_p11 = pmov %p7379_p1 }
  0xe3   : > { %s434_s22 = sand.u32 1, %s5889_s13   ;;  %s436_s19 = sand.u32 1, %s5786_s10  }
  0xe4   : > { %5759 = vsyncadd (%p7380_p11), [#allocation4], 4294966272  ;;  %s4397_s21 = sshll.u32 %s436_s19, 3  ;;  %s435_s17 = scalar_lea.sflag [#allocation7], %s434_s22 }
  0xe5   : > { %s6176_s25 = scalar_lea.vmem [#allocation6], %s4397_s21  ;;  %p7381_p6 = scmp.ne.s32.totalorder %s7357_s14, 0 }
  0xe7   : > { %5761 = dma.done.wait (%p7381_p6), %s435_s17, 3200  }
  0xe8   : > { %5763 = vsyncadd (%p7381_p6), %s435_s17, 4294964096  ;;  %s4950_s15 = smul.u32 192, %s436_s19  ;;  %s4398_s11 = sshll.u32 %s436_s19, 6 }
  0xe9   : > { %s453_s30 = scalar_lea.sflag [#allocation10], %s434_s22  ;;  %s6184_s16 = scalar_lea.vmem [#allocation9], %s4398_s11 }
  0xea   : > { %s6182_s27 = scalar_lea.vmem [#allocation8], %s4950_s15 }
  0xeb   : > { %5765 = dma.done.wait (%p7381_p6), %s453_s30, 5120  }
  0xec   : > { %5767 = vsyncadd (%p7381_p6), %s453_s30, 4294962176  ;;  %s4399_s8 = sshll.u32 %s436_s19, 8  ;;  %s471_s28 = scalar_lea.sflag [#allocation13], %s434_s22 }
  0xed   : > { %s6190_s18 = scalar_lea.vmem [#allocation11], %s4399_s8  ;;  %s6192_s23 = scalar_lea.vmem [#allocation12], %s4399_s8 }
  0xee   : > { %5769 = dma.done.wait (%p7381_p6), %s471_s28, 4096  }
  0xef   : > { %5771 = vsyncadd (%p7381_p6), %s471_s28, 4294963200  ;;  %p7382_p9 = pmov %p7379_p1 }
  0xf0   : > { %p7383_p5 = pmov %p7379_p1 }
  0xf1   : > { %5773 = dma.done.wait (%p7382_p9), [#allocation13], 2048  }
  0xf2   : > { %5775 = vsyncadd (%p7383_p5), [#allocation13], 4294965248  ;;  %p532_p12 = scmp.lt.s32.totalorder %s5889_s13, 1  ;;  %p7384_p0 = scmp.ne.s32.totalorder %s5889_s13, 0 }
  0xf3   : > { %v541_v0 = vld [vmem:[#allocation3] sm:$0xff] (!%p7384_p0)  ;;  %v542_v1 = vld [vmem:[#allocation3 + $0x8] sm:$0xff] (!%p7384_p0)  ;;  %v543_v2 = vld [vmem:[#allocation3 + $0x10] sm:$0xff] (!%p7384_p0) }
  0xf4   : > { %s533_s12 = scalar_select %p532_p12, %s5889_s13, 1 }
  0xf5   : > { %540 = sbr.rel (%p7384_p0) target bundleno = 252 (0xfc), region = 88  ;;  %549 = vst [vmem:[#allocation2] sm:$0xff] (!%p7384_p0), %v541_v0  ;;  %550 = vst [vmem:[#allocation2 + $0x8] sm:$0xff] (!%p7384_p0), %v542_v1  ;;  %v544_v3 = vld [vmem:[#allocation3 + $0x18] sm:$0xff] (!%p7384_p0)  ;;  %v545_v4 = vld [vmem:[#allocation3 + $0x20] sm:$0xff] (!%p7384_p0) }
  0xf6   : > { %s4402_s24 = sshll.u32 %s533_s12, 2  ;;  %551 = vst [vmem:[#allocation2 + $0x10] sm:$0xff] (!%p7384_p0), %v543_v2  ;;  %v546_v5 = vld [vmem:[#allocation3 + $0x28] sm:$0xff] (!%p7384_p0)  ;;  %552 = vst [vmem:[#allocation2 + $0x18] sm:$0xff] (!%p7384_p0), %v544_v3  ;;  %v547_v6 = vld [vmem:[#allocation3 + $0x30] sm:$0xff] (!%p7384_p0) }
  0xf7   : > { %s6207_s26 = scalar_lea.vmem %s7329_s5, %s4402_s24  ;;  %553 = vst [vmem:[#allocation2 + $0x20] sm:$0xff] (!%p7384_p0), %v545_v4  ;;  %554 = vst [vmem:[#allocation2 + $0x28] sm:$0xff] (!%p7384_p0), %v546_v5  ;;  %v548_v7 = vld [vmem:[#allocation3 + $0x38] sm:$0xff] (!%p7384_p0) }
  0xf8   : > { %555 = vst [vmem:[#allocation2 + $0x30] sm:$0xff] (!%p7384_p0), %v547_v6  ;;  %556 = vst [vmem:[#allocation2 + $0x38] sm:$0xff] (!%p7384_p0), %v548_v7 }
  0xfc PF: > { %v557_v8 = vld [vmem:[#allocation2] sm:$0xff]  ;;  %v558_v10 = vld [vmem:[#allocation2 + $0x8] sm:$0xff]  ;;  %v5116_v13 = vld [vmem:[%s6182_s27] ss:$12 sps:$4 sm:$0xff]   ;;  %v5811_v55 = vmov 0   ;;  %v655_v62 = vlaneseq  ;;  %vm1008_vm0 = vcmask 261120  }
  0xfd   : > { %v559_v9 = vld [vmem:[#allocation2 + $0x10] sm:$0xff]  ;;  %566 = vadd.xlane.f32.xlu0 %v557_v8  ;;  %v560_v11 = vld [vmem:[#allocation2 + $0x18] sm:$0xff]  ;;  %v5124_v39 = vld [vmem:[%s6182_s27 + $0x30] ss:$12 sps:$4 sm:$0xff]   ;;  %875 = vmatprep.mubr.bf16.mxu0 %v5811_v55  ;;  %s5813_s14 = smov 96   ;;  %s5814_s9 = smov 64  }
  0xfe   : > { %570 = vadd.xlane.f32.xlu1 %v559_v9  ;;  %v5114_v12 = vld [vmem:[%s6182_s27 + $0x4] ss:$12 sps:$4 sm:$0xff]   ;;  %v5117_v14 = vld [vmem:[%s6182_s27 + $0x1c] ss:$12 sps:$4 sm:$0xff]   ;;  %v5121_v37 = vld [vmem:[%s6182_s27 + $0x34] ss:$12 sps:$4 sm:$0xff]  }
  0xff   : > { %v5119_v15 = vld [vmem:[%s6182_s27 + $0x8] ss:$12 sps:$4 sm:$0xff]   ;;  %843 = vmatprep.subr.bf16.mxu0 %v5114_v12  ;;  %v6234_v33 = vld [vmem:[#allocation2 + $0x30] sm:$0xff]  ;;  %v6236_v34 = vld [vmem:[#allocation2 + $0x28] sm:$0xff]  ;;  %v6265_v5 = vshrl.u32 %v655_v62, 7  ;;  %s5815_s7 = smov 32  }
 0x100   : > { %844 = vmatpush1.bf16.msra.mxu0 %v5116_v13  ;;  %4740 = vmatprep.subr.bf16.mxu1 %v5119_v15  ;;  %v6231_v32 = vld [vmem:[#allocation2 + $0x20] sm:$0xff]  ;;  %v5120_v35 = vld [vmem:[%s6182_s27 + $0x18] ss:$12 sps:$4 sm:$0xff]   ;;  %v6241_v36 = vld [vmem:[#allocation2 + $0x38] sm:$0xff]  ;;  %vm1757_vm5 = vcmask 523264   ;;  %vm1762_vm6 = vcmask 785408  }
 0x101   : > { %568 = vadd.xlane.f32.xlu0 %v558_v10  ;;  %845 = vmatprep.subr.bf16.mxu0 %v5117_v14  ;;  %v5123_v38 = vld [vmem:[%s6182_s27 + $0x20] ss:$12 sps:$4 sm:$0xff]   ;;  %v5127_v41 = vld [vmem:[%s6182_s27 + $0x38] ss:$12 sps:$4 sm:$0xff]   ;;  %v5128_v42 = vld [vmem:[%s6182_s27 + $0x48] ss:$12 sps:$4 sm:$0xff]  }
 0x102   : > { %572 = vadd.xlane.f32.xlu1 %v560_v11  ;;  %4741 = vmatpush3.bf16.msra.mxu1 %v5119_v15  ;;  %v5125_v40 = vld [vmem:[%s6182_s27 + $0x4c] ss:$12 sps:$4 sm:$0xff]   ;;  %v5129_v43 = vld [vmem:[%s6182_s27 + $0x64] ss:$12 sps:$4 sm:$0xff]   ;;  %v5133_v46 = vld [vmem:[%s6182_s27 + $0x7c] ss:$12 sps:$4 sm:$0xff]  }
 0x103   : > { %4742 = vmatprep.subr.bf16.mxu1 %v5123_v38  ;;  %v5131_v44 = vld [vmem:[%s6182_s27 + $0x50] ss:$12 sps:$4 sm:$0xff]   ;;  %v5132_v45 = vld [vmem:[%s6182_s27 + $0x60] ss:$12 sps:$4 sm:$0xff]   ;;  %v5135_v47 = vld [vmem:[%s6182_s27 + $0x68] ss:$12 sps:$4 sm:$0xff]  }
 0x104   : > { %846 = vmatpush1.bf16.msra.mxu0 %v5120_v35  ;;  %v5136_v48 = vld [vmem:[%s6182_s27 + $0x78] ss:$12 sps:$4 sm:$0xff]   ;;  %v5137_v49 = vld [vmem:[%s6182_s27 + $0x94] ss:$12 sps:$4 sm:$0xff]   ;;  %v5140_v51 = vld [vmem:[%s6182_s27 + $0x90] ss:$12 sps:$4 sm:$0xff]  }
 0x105   : > { %847 = vmatprep.subr.bf16.mxu0 %v5121_v37  ;;  %v5139_v50 = vld [vmem:[%s6182_s27 + $0x80] ss:$12 sps:$4 sm:$0xff]   ;;  %v5143_v53 = vld [vmem:[%s6182_s27 + $0x98] ss:$12 sps:$4 sm:$0xff]   ;;  %v5144_v54 = vld [vmem:[%s6182_s27 + $0xa8] ss:$12 sps:$4 sm:$0xff]  }
 0x106   : > { %4743 = vmatpush3.bf16.msra.mxu1 %v5123_v38  ;;  %v5141_v52 = vld [vmem:[%s6182_s27 + $0xac] ss:$12 sps:$4 sm:$0xff]   ;;  %v5145_v56 = vld [vmem:[%s6182_s27 + $0xb0] ss:$12 sps:$4 sm:$0xff]   ;;  %v6271_v12 = vsub.s32 0, %v6265_v5  ;;  %p4532_p7 = scmp.ne.s32.totalorder %s5889_s13, 1 }
 0x107   : > { %4744 = vmatprep.subr.bf16.mxu1 %v5127_v41  ;;  %s7386_s22 = sld [smem:[#allocation27_spill]] (!%p4532_p7) }
 0x108   : > { %848 = vmatpush1.bf16.msra.mxu0 %v5124_v39 }
 0x109   : > { %849 = vmatprep.subr.bf16.mxu0 %v5125_v40 }
 0x10a   : > { %4745 = vmatpush3.bf16.msra.mxu1 %v5127_v41 }
 0x10b   : > { %4746 = vmatprep.subr.bf16.mxu1 %v5131_v44 }
 0x10c   : > { %850 = vmatpush1.bf16.msra.mxu0 %v5128_v42 }
 0x10d   : > { %851 = vmatprep.subr.bf16.mxu0 %v5129_v43 }
 0x10e   : > { %4747 = vmatpush3.bf16.msra.mxu1 %v5131_v44 }
 0x10f   : > { %4748 = vmatprep.subr.bf16.mxu1 %v5135_v47 }
 0x110   : > { %852 = vmatpush1.bf16.msra.mxu0 %v5132_v45 }
 0x111   : > { %853 = vmatprep.subr.bf16.mxu0 %v5133_v46 }
 0x112   : > { %4749 = vmatpush3.bf16.msra.mxu1 %v5135_v47 }
 0x113   : > { %4750 = vmatprep.subr.bf16.mxu1 %v5139_v50 }
 0x114   : > { %854 = vmatpush1.bf16.msra.mxu0 %v5136_v48 }
 0x115   : > { %855 = vmatprep.subr.bf16.mxu0 %v5137_v49 }
 0x116   : > { %4751 = vmatpush3.bf16.msra.mxu1 %v5139_v50 }
 0x117   : > { %4752 = vmatprep.subr.bf16.mxu1 %v5143_v53 }
 0x118   : > { %856 = vmatpush1.bf16.msra.mxu0 %v5140_v51 }
 0x119   : > { %857 = vmatprep.subr.bf16.mxu0 %v5141_v52 }
 0x11a   : > { %4753 = vmatpush3.bf16.msra.mxu1 %v5143_v53 }
 0x11b   : > { %4754 = vmatprep.subr.bf16.mxu1 %v5145_v56 }
 0x11c   : > { %858 = vmatpush1.bf16.msra.mxu0 %v5144_v54 }
 0x11e   : > { %4755 = vmatpush3.bf16.msra.mxu1 %v5145_v56 }
 0x18a   : > { %v567_v16 = vpop.xlane.xlu0 %566 }
 0x18b   : > { %v571_v17 = vpop.xlane.xlu1 %570  ;;  %v583_v18 = vmul.f32 0.0078125, %v567_v16  ;;  %v565_v16 = vld [vmem:[%s6176_s25] sm:$0xff] }
 0x18c   : > { %v585_v19 = vmul.f32 0.0078125, %v571_v17 }
 0x18d   : > { %v6215_v20 = vsub.f32 %v557_v8, %v583_v18 }
 0x18e   : > { %v6217_v21 = vsub.f32 %v559_v9, %v585_v19  ;;  %v569_v22 = vpop.xlane.xlu0 %568 }
 0x18f   : > { %v573_v23 = vpop.xlane.xlu1 %572  ;;  %v584_v24 = vmul.f32 0.0078125, %v569_v22  ;;  %v599_v25 = vmul.f32 %v6215_v20, %v6215_v20 }
 0x190   : > { %v586_v26 = vmul.f32 0.0078125, %v573_v23  ;;  %v601_v27 = vmul.f32 %v6217_v21, %v6217_v21 }
 0x191   : > { %607 = vadd.xlane.f32.xlu0 %v599_v25  ;;  %v6223_v28 = vsub.f32 %v558_v10, %v584_v24  ;;  %v6280_v24 = vrot.slane %v565_v16, %v6271_v12  ;;  %v6283_v25 = vsub.s32 1, %v6265_v5 }
 0x192   : > { %v6225_v29 = vsub.f32 %v560_v11, %v586_v26 }
 0x193   : > { %v600_v30 = vmul.f32 %v6223_v28, %v6223_v28 }
 0x194   : > { %v602_v31 = vmul.f32 %v6225_v29, %v6225_v29 }
 0x195   : > { %611 = vadd.xlane.f32.xlu0 %v601_v27  ;;  %609 = vadd.xlane.f32.xlu1 %v600_v30 }
 0x199   : > { %574 = vadd.xlane.f32.xlu0 %v6231_v32  ;;  %613 = vadd.xlane.f32.xlu1 %v602_v31 }
 0x19d   : > { %578 = vadd.xlane.f32.xlu0 %v6234_v33  ;;  %576 = vadd.xlane.f32.xlu1 %v6236_v34 }
 0x1a1   : > { %580 = vadd.xlane.f32.xlu1 %v6241_v36 }
 0x21e   : > { %v608_v57 = vpop.xlane.xlu0 %607 }
 0x21f   : > { %v623_v58 = vmul.f32 0.0078125, %v608_v57 }
 0x221   : > { %v631_v59 = vadd.f32 1e-05, %v623_v58 }
 0x222   : > { %v610_v60 = vpop.xlane.xlu1 %609  ;;  %v612_v61 = vpop.xlane.xlu0 %611 }
 0x223   : > { %5234 = vrsqrt.f32 %v631_v59  ;;  %v624_v63 = vmul.f32 0.0078125, %v610_v60  ;;  %v625_v0 = vmul.f32 0.0078125, %v612_v61 }
 0x225   : > { %v632_v1 = vadd.f32 1e-05, %v624_v63  ;;  %v633_v2 = vadd.f32 1e-05, %v625_v0 }
 0x226   : > { %v614_v3 = vpop.xlane.xlu1 %613  ;;  %v575_v4 = vpop.xlane.xlu0 %574 }
 0x227   : > { %5236 = vrsqrt.f32 %v632_v1  ;;  %v626_v6 = vmul.f32 0.0078125, %v614_v3  ;;  %v587_v7 = vmul.f32 0.0078125, %v575_v4 }
 0x228   : > { %5238 = vrsqrt.f32 %v633_v2 }
 0x229   : > { %v634_v8 = vadd.f32 1e-05, %v626_v6  ;;  %v6268_v9 = vsub.f32 %v6231_v32, %v587_v7 }
 0x22a   : > { %v577_v10 = vpop.xlane.xlu1 %576  ;;  %v579_v11 = vpop.xlane.xlu0 %578 }
 0x22b   : > { %5240 = vrsqrt.f32 %v634_v8  ;;  %v588_v13 = vmul.f32 0.0078125, %v577_v10  ;;  %v589_v14 = vmul.f32 0.0078125, %v579_v11  ;;  %v603_v15 = vmul.f32 %v6268_v9, %v6268_v9 }
 0x22d   : > { %v5235_v17 = vpop.eup %5234  ;;  %615 = vadd.xlane.f32.xlu0 %v603_v15  ;;  %v596_v18 = vsub.f32 %v6236_v34, %v588_v13  ;;  %v597_v19 = vsub.f32 %v6234_v33, %v589_v14 }
 0x22e   : > { %v581_v22 = vpop.xlane.xlu1 %580  ;;  %v647_v23 = vmul.f32 %v5235_v17, %v6215_v20  ;;  %v670_v20 = vrot.slane %v565_v16, %v6283_v25 }
 0x22f   : > { %v590_v26 = vmul.f32 0.0078125, %v581_v22  ;;  %v604_v27 = vmul.f32 %v596_v18, %v596_v18  ;;  %v605_v30 = vmul.f32 %v597_v19, %v597_v19 }
 0x230   : > { %v659_v35 = vmul.f32 %v6280_v24, %v647_v23 }
 0x231   : > { %v5237_v31 = vpop.eup %5236  ;;  %617 = vadd.xlane.f32.xlu1 %v604_v27  ;;  %619 = vadd.xlane.f32.xlu0 %v605_v30  ;;  %v598_v32 = vsub.f32 %v6241_v36, %v590_v26 }
 0x232   : > { %v5239_v34 = vpop.eup %5238  ;;  %v648_v33 = vmul.f32 %v5237_v31, %v6223_v28  ;;  %v671_v41 = vadd.f32 %v670_v20, %v659_v35 }
 0x233   : > { %v606_v37 = vmul.f32 %v598_v32, %v598_v32  ;;  %v649_v38 = vmul.f32 %v5239_v34, %v6217_v21 }
 0x234   : > { %v660_v39 = vmul.f32 %v6280_v24, %v648_v33 }
 0x235   : > { %v5241_v40 = vpop.eup %5240  ;;  %621 = vadd.xlane.f32.xlu1 %v606_v37  ;;  %v661_v36 = vmul.f32 %v6280_v24, %v649_v38 }
 0x236   : > { %v672_v42 = vadd.f32 %v670_v20, %v660_v39  ;;  %v650_v43 = vmul.f32 %v5241_v40, %v6225_v29 }
 0x237   : > { %v673_v45 = vadd.f32 %v670_v20, %v661_v36 }
 0x238   : > { %v679_v44 = vpack.c.bf16 %v672_v42, %v671_v41  ;;  %v662_v28 = vmul.f32 %v6280_v24, %v650_v43 }
 0x23a   : > { %876 = vmatmul.mubr.bf16.vlgmr.msra.gmra.mrb[0].mxu0 %v679_v44  ;;  %4756 = vmatprep.mubr.bf16.mxu1 %v679_v44  ;;  %v674_v46 = vadd.f32 %v670_v20, %v662_v28 }
 0x23b   : > { %885 = vmatprep.mubr.bf16.mxu0 %v5811_v55 }
 0x23c   : > { %v680_v21 = vpack.c.bf16 %v674_v46, %v673_v45 }
 0x23e   : > { %4757 = vmatmul.mubr.bf16.vlgmr.msra.gmra.mrb[0].mxu1 %v680_v21 }
 0x242   : > { %886 = vmatmul.mubr.bf16.gmra.mrb[4].mxu0 %v680_v21 }
 0x243   : > { %895 = vmatprep.mubr.bf16.mxu0 %v5811_v55 }
 0x2ba   : > { %v616_v47 = vpop.xlane.xlu0 %615 }
 0x2bb   : > { %v627_v48 = vmul.f32 0.0078125, %v616_v47 }
 0x2bd   : > { %v635_v49 = vadd.f32 1e-05, %v627_v48 }
 0x2be   : > { %v618_v29 = vpop.xlane.xlu1 %617  ;;  %v620_v50 = vpop.xlane.xlu0 %619 }
 0x2bf   : > { %5242 = vrsqrt.f32 %v635_v49  ;;  %v628_v51 = vmul.f32 0.0078125, %v618_v29  ;;  %v629_v52 = vmul.f32 0.0078125, %v620_v50 }
 0x2c1   : > { %v636_v53 = vadd.f32 1e-05, %v628_v51  ;;  %v637_v54 = vadd.f32 1e-05, %v629_v52 }
 0x2c2   : > { %v622_v56 = vpop.xlane.xlu1 %621 }
 0x2c3   : > { %5244 = vrsqrt.f32 %v636_v53  ;;  %v630_v57 = vmul.f32 0.0078125, %v622_v56  ;;  %v999_v56 = vand.u32 127, %v655_v62 }
 0x2c4   : > { %5246 = vrsqrt.f32 %v637_v54 }
 0x2c5   : > { %v638_v58 = vadd.f32 1e-05, %v630_v57  ;;  %v996_v57 = vadd.s32 16, %v6265_v5  ;;  %vm1000_vm1 = vcmp.gt.s32.totalorder %v999_v56, %v6265_v5 }
 0x2c7   : > { %5248 = vrsqrt.f32 %v638_v58  ;;  %v995_v58 = vadd.s32 8, %v6265_v5  ;;  %vm1002_vm2 = vcmp.gt.s32.totalorder %v999_v56, %v996_v57 }
 0x2c9   : > { %v5243_v59 = vpop.eup %5242  ;;  %vm1001_vm3 = vcmp.gt.s32.totalorder %v999_v56, %v995_v58 }
 0x2ca   : > { %v651_v60 = vmul.f32 %v5243_v59, %v6268_v9  ;;  %v997_v59 = vadd.s32 24, %v6265_v5 }
 0x2cc   : > { %v663_v1 = vmul.f32 %v6280_v24, %v651_v60  ;;  %v5812_v60 = vmov 0.0   ;;  %vm1003_vm4 = vcmp.gt.s32.totalorder %v999_v56, %v997_v59 }
 0x2cd   : > { %v5245_v61 = vpop.eup %5244 }
 0x2ce   : > { %v5247_v63 = vpop.eup %5246  ;;  %v652_v0 = vmul.f32 %v5245_v61, %v596_v18  ;;  %v675_v6 = vadd.f32 %v670_v20, %v663_v1  ;;  %v6347_v61 = vsel %vm1000_vm1, -1e+30, %v5812_v60 }
 0x2cf   : > { %v653_v2 = vmul.f32 %v5247_v63, %v597_v19 }
 0x2d0   : > { %v664_v3 = vmul.f32 %v6280_v24, %v652_v0  ;;  %v6349_v0 = vsel %vm1002_vm2, -1e+30, %v5812_v60 }
 0x2d1   : > { %v5249_v4 = vpop.eup %5248  ;;  %v665_v10 = vmul.f32 %v6280_v24, %v653_v2  ;;  %v6351_v2 = vsel %vm1001_vm3, -1e+30, %v5812_v60 }
 0x2d2   : > { %v676_v7 = vadd.f32 %v670_v20, %v664_v3  ;;  %v654_v8 = vmul.f32 %v5249_v4, %v598_v32  ;;  %v6354_v4 = vsel %vm1003_vm4, -1e+30, %v5812_v60 }
 0x2d3   : > { %v677_v9 = vadd.f32 %v670_v20, %v665_v10 }
 0x2d4   : > { %v681_v11 = vpack.c.bf16 %v676_v7, %v675_v6  ;;  %v666_v13 = vmul.f32 %v6280_v24, %v654_v8 }
 0x2d6   : > { %896 = vmatmul.mubr.bf16.gmra.mrb[8].mxu0 %v681_v11  ;;  %4760 = vmatprep.mubr.bf16.mxu1 %v681_v11  ;;  %v678_v14 = vadd.f32 %v670_v20, %v666_v13 }
 0x2d7   : > { %905 = vmatprep.mubr.bf16.mxu0 %v5811_v55 }
 0x2d8   : > { %v682_v15 = vpack.c.bf16 %v678_v14, %v677_v9 }
 0x2da   : > { %4761 = vmatmul.mubr.bf16.gmra.mrb[4].mxu1 %v682_v15 }
 0x2de   : > { %906 = vmatmul.mubr.bf16.gmra.mrb[12].mxu0 %v682_v15 }
 0x30d   : > { %v877_v16 = vpop.f32.mrb[0].mxu0 }
 0x30e   : > { %v879_v17 = vpop.f32.mrb[1].mxu0 }
 0x30f   : > { %v881_v18 = vpop.f32.mrb[2].mxu0 }
 0x310   : > { %v6302_v19 = vpack.c.bf16 %v881_v18, %v877_v16  ;;  %v883_v22 = vpop.f32.mrb[3].mxu0 }
 0x311   : > { %v6304_v23 = vpack.c.bf16 %v883_v22, %v879_v17  ;;  %v4758_v26 = vpop.f32.mrb[0].mxu1 }
 0x312   : > { %v950_v24 = vpop.f32.mrb[1].mxu1  ;;  %4768 = vmatprep.mubr.msk.bf16.mxu1 %vm1008_vm0, %v6302_v19 }
 0x313   : > { %v4759_v27 = vpop.f32.mrb[2].mxu1  ;;  %4932 = vmatprep.subr.msk.bf16.mxu1 %vm1008_vm0, %v6304_v23  ;;  %v1016_v30 = vsel %vm1008_vm0, %v6304_v23, 0 }
 0x314   : > { %v6312_v31 = vpack.c.bf16 %v4759_v27, %v4758_v26  ;;  %v953_v32 = vpop.f32.mrb[3].mxu1  ;;  %4765 = vmatpush3.bf16.xpose.msra.mxu1 %v1016_v30 }
 0x315   : > { %v6314_v34 = vpack.c.bf16 %v953_v32, %v950_v24  ;;  %v887_v33 = vpop.f32.mrb[4].mxu0 }
 0x316   : > { %v889_v35 = vpop.f32.mrb[5].mxu0 }
 0x317   : > { %v891_v20 = vpop.f32.mrb[6].mxu0 }
 0x318   : > { %v6316_v37 = vpack.c.bf16 %v891_v20, %v887_v33  ;;  %v893_v38 = vpop.f32.mrb[7].mxu0 }
 0x319   : > { %v6318_v39 = vpack.c.bf16 %v893_v38, %v889_v35 }
 0x31b   : > { %4933 = vmatprep.subr.msk.bf16.mxu1 %vm1008_vm0, %v6318_v39  ;;  %v1019_v40 = vsel %vm1008_vm0, %v6318_v39, 0 }
 0x31c   : > { %4767 = vmatpush3.bf16.xpose.msra.mxu1 %v1019_v40 }
 0x31d   : > { %4772 = vmatprep.subr.bf16.mxu1 %v6314_v34 }
 0x323   : > { %4769 = vmatmul.mubr.msk.bf16.vlgmr.msra.gmra.mrb[8].mxu1 %vm1008_vm0, %v6316_v37 }
 0x324   : > { %4773 = vmatpush3.bf16.msra.mxu1 %v6314_v34 }
 0x325   : > { %4774 = vmatprep.subr.bf16.mxu1 %v6312_v31 }
 0x328   : > { %4775 = vmatpush3.bf16.msra.mxu1 %v6312_v31 }
 0x3a9   : > { %v897_v41 = vpop.f32.mrb[8].mxu0 }
 0x3aa   : > { %v899_v42 = vpop.f32.mrb[9].mxu0 }
 0x3ab   : > { %v901_v43 = vpop.f32.mrb[10].mxu0 }
 0x3ac   : > { %v6330_v36 = vpack.c.bf16 %v901_v43, %v897_v41  ;;  %v903_v44 = vpop.f32.mrb[11].mxu0 }
 0x3ad   : > { %v6332_v28 = vpack.c.bf16 %v903_v44, %v899_v42  ;;  %v4762_v45 = vpop.f32.mrb[4].mxu1 }
 0x3ae   : > { %v966_v46 = vpop.f32.mrb[5].mxu1 }
 0x3af   : > { %v4763_v21 = vpop.f32.mrb[6].mxu1 }
 0x3b0   : > { %v6334_v47 = vpack.c.bf16 %v4763_v21, %v4762_v45  ;;  %v969_v48 = vpop.f32.mrb[7].mxu1 }
 0x3b1   : > { %v6336_v49 = vpack.c.bf16 %v969_v48, %v966_v46  ;;  %v907_v29 = vpop.f32.mrb[12].mxu0 }
 0x3b2   : > { %v909_v50 = vpop.f32.mrb[13].mxu0 }
 0x3b3   : > { %v911_v51 = vpop.f32.mrb[14].mxu0 }
 0x3b4   : > { %v6338_v52 = vpack.c.bf16 %v911_v51, %v907_v29  ;;  %v913_v53 = vpop.f32.mrb[15].mxu0 }
 0x3b5   : > { %v6340_v54 = vpack.c.bf16 %v913_v53, %v909_v50 }
 0x3f6   : > { %v4770_v63 = vpop.f32.mrb[8].mxu1 }
 0x3f7   : > { %v1055_v1 = vpop.f32.mrb[9].mxu1  ;;  %v1064_v7 = vadd.f32 %v4770_v63, %v6349_v0 }
 0x3f8   : > { %v1056_v62 = vadd.f32 %v1055_v1, %v6347_v61  ;;  %v4771_v3 = vpop.f32.mrb[10].mxu1 }
 0x3f9   : > { %v1058_v6 = vpop.f32.mrb[11].mxu1  ;;  %v1067_v11 = vadd.f32 %v4771_v3, %v6354_v4  ;;  %v1076_v9 = vsel %vm1008_vm0, %v1064_v7, -inf }
 0x3fa   : > { %v1059_v8 = vadd.f32 %v1058_v6, %v6351_v2  ;;  %v1070_v10 = vsel %vm1008_vm0, %v1056_v62, -inf }
 0x3fb   : > { %1071 = vmax.xlane.f32.xlu0 %v1070_v10  ;;  %v1079_v14 = vsel %vm1008_vm0, %v1067_v11, -inf }
 0x3fc   : > { %v1073_v13 = vsel %vm1008_vm0, %v1059_v8, -inf }
 0x3fd   : > { %1074 = vmax.xlane.f32.xlu1 %v1073_v13 }
 0x3ff   : > { %1077 = vmax.xlane.f32.xlu0 %v1076_v9 }
 0x401   : > { %1080 = vmax.xlane.f32.xlu1 %v1079_v14 }
 0x488   : > { %v1072_v15 = vpop.xlane.xlu0 %1071 }
 0x489   : > { %v1082_v16 = vsub.f32 %v1056_v62, %v1072_v15 }
 0x48a   : > { %v1075_v17 = vpop.xlane.xlu1 %1074 }
 0x48b   : > { %v1083_v22 = vsub.f32 %v1059_v8, %v1075_v17  ;;  %v1086_v24 = vmul.f32 1.442695, %v1082_v16 }
 0x48c   : > { %v1078_v18 = vpop.xlane.xlu0 %1077 }
 0x48d   : > { %v1084_v26 = vsub.f32 %v1064_v7, %v1078_v18  ;;  %v1088_v33 = vmul.f32 1.442695, %v1083_v22 }
 0x48e   : > { %v1081_v27 = vpop.xlane.xlu1 %1080 }
 0x48f   : > { %v1090_v30 = vmul.f32 1.442695, %v1084_v26  ;;  %v1085_v32 = vsub.f32 %v1067_v11, %v1081_v27 }
 0x491   : > { %5250 = vpow2.f32 %v1090_v30  ;;  %v1092_v35 = vmul.f32 1.442695, %v1085_v32 }
 0x492   : > { %5252 = vpow2.f32 %v1086_v24 }
 0x493   : > { %5254 = vpow2.f32 %v1092_v35 }
 0x494   : > { %5256 = vpow2.f32 %v1088_v33 }
 0x49b   : > { %v5251_v20 = vpop.eup %5250 }
 0x49c   : > { %v5253_v38 = vpop.eup %5252  ;;  %v1100_v40 = vsel %vm1008_vm0, %v5251_v20, 0.0 }
 0x49d   : > { %v5255_v41 = vpop.eup %5254  ;;  %1101 = vadd.xlane.f32.xlu0 %v1100_v40  ;;  %v1094_v44 = vsel %vm1008_vm0, %v5253_v38, 0.0 }
 0x49e   : > { %v1103_v42 = vsel %vm1008_vm0, %v5255_v41, 0.0  ;;  %v5257_v43 = vpop.eup %5256 }
 0x49f   : > { %1104 = vadd.xlane.f32.xlu1 %v1103_v42  ;;  %v1097_v45 = vsel %vm1008_vm0, %v5257_v43, 0.0 }
 0x4a1   : > { %1095 = vadd.xlane.f32.xlu0 %v1094_v44 }
 0x4a3   : > { %1098 = vadd.xlane.f32.xlu1 %v1097_v45 }
 0x4b4   : > { %1181 = vrot.lane.b32.xlu1 %v6318_v39, %s5813_s14 }
 0x4b7   : > { %1179 = vrot.lane.b32.xlu0 %v6304_v23, %s5813_s14 }
 0x4b8   : > { %1357 = vrot.lane.b32.xlu1 %v6304_v23, %s5814_s9 }
 0x4bb   : > { %1175 = vrot.lane.b32.xlu0 %v6316_v37, %s5813_s14 }
 0x4bc   : > { %1173 = vrot.lane.b32.xlu1 %v6302_v19, %s5813_s14 }
 0x4bf   : > { %1353 = vrot.lane.b32.xlu0 %v6302_v19, %s5814_s9 }
 0x4c0   : > { %1359 = vrot.lane.b32.xlu1 %v6318_v39, %s5814_s9 }
 0x4c4   : > { %1355 = vrot.lane.b32.xlu1 %v6316_v37, %s5814_s9 }
 0x52a   : > { %v1102_v46 = vpop.xlane.xlu0 %1101 }
 0x52c   : > { %v1105_v21 = vpop.xlane.xlu1 %1104 }
 0x52d   : > { %5258 = vrcp.f32 %v1105_v21 }
 0x52e   : > { %v1096_v48 = vpop.xlane.xlu0 %1095 }
 0x52f   : > { %5260 = vrcp.f32 %v1096_v48 }
 0x530   : > { %5262 = vrcp.f32 %v1102_v46  ;;  %v1099_v29 = vpop.xlane.xlu1 %1098 }
 0x531   : > { %5264 = vrcp.f32 %v1099_v29 }
 0x532   : > { %v1180_v50 = vpop.permute.xlu0 %1179 }
 0x533   : > { %4934 = vmatprep.subr.msk.bf16.mxu1 %vm1008_vm0, %v1180_v50  ;;  %v1190_v9 = vsel %vm1008_vm0, %v1180_v50, 0 }
 0x534   : > { %v1182_v51 = vpop.permute.xlu1 %1181 }
 0x535   : > { %v1193_v16 = vsel %vm1008_vm0, %v1182_v51, 0 }
 0x536   : > { %v1176_v53 = vpop.permute.xlu0 %1175 }
 0x537   : > { %v5259_v56 = vpop.eup %5258 }
 0x538   : > { %v1358_v57 = vpop.permute.xlu1 %1357  ;;  %v1113_v62 = vmul.f32 %v5259_v56, %v5255_v41 }
 0x539   : > { %v5261_v58 = vpop.eup %5260  ;;  %4936 = vmatprep.subr.msk.bf16.mxu0 %vm1008_vm0, %v1358_v57  ;;  %v1368_v59 = vsel %vm1008_vm0, %v1358_v57, 0 }
 0x53a   : > { %v5263_v60 = vpop.eup %5262  ;;  %4797 = vmatpush3.bf16.xpose.msra.mxu0 %v1368_v59  ;;  %v1354_v63 = vpop.permute.xlu0 %1353  ;;  %v1110_v6 = vmul.f32 %v5261_v58, %v5253_v38 }
 0x53b   : > { %v5265_v1 = vpop.eup %5264  ;;  %4800 = vmatprep.mubr.msk.bf16.mxu0 %vm1008_vm0, %v1354_v63  ;;  %v1112_v8 = vmul.f32 %v5263_v60, %v5251_v20 }
 0x53c   : > { %v1174_v3 = vpop.permute.xlu1 %1173  ;;  %v1111_v7 = vmul.f32 %v5265_v1, %v5257_v43 }
 0x53d   : > { %v1115_v11 = vpack.c.bf16 %v1113_v62, %v1112_v8 }
 0x53e   : > { %v1114_v10 = vpack.c.bf16 %v1111_v7, %v1110_v6 }
 0x540   : > { %v1360_v13 = vpop.permute.xlu1 %1359  ;;  %4776 = vmatprep.mubr.msk.bf16.mxu1 %vm1008_vm0, %v1114_v10 }
 0x541   : > { %4777 = vmatmul.mubr.msk.bf16.vlgmr.msra.gmra.mrb[12].mxu1 %vm1008_vm0, %v1115_v11  ;;  %4937 = vmatprep.subr.msk.bf16.mxu0 %vm1008_vm0, %v1360_v13  ;;  %v1371_v14 = vsel %vm1008_vm0, %v1360_v13, 0 }
 0x542   : > { %4781 = vmatpush3.bf16.xpose.msra.mxu1 %v1190_v9  ;;  %4784 = vmatprep.mubr.msk.bf16.mxu1 %vm1008_vm0, %v1174_v3 }
 0x543   : > { %4935 = vmatprep.subr.msk.bf16.mxu1 %vm1008_vm0, %v1182_v51  ;;  %4799 = vmatpush3.bf16.xpose.msra.mxu0 %v1371_v14 }
 0x544   : > { %v1356_v15 = vpop.permute.xlu1 %1355 }
 0x54a   : > { %4783 = vmatpush3.bf16.xpose.msra.mxu1 %v1193_v16  ;;  %4801 = vmatmul.mubr.msk.bf16.vlgmr.msra.gmra.mrb[16].mxu0 %vm1008_vm0, %v1356_v15 }
 0x551   : > { %4785 = vmatmul.mubr.msk.bf16.vlgmr.msra.gmra.mrb[16].mxu1 %vm1008_vm0, %v1176_v53 }
 0x614   : > { %v6397_v17 = vpop.f32.mrb[12].mxu1 }
 0x615   : > { %v6399_v18 = vpop.f32.mrb[13].mxu1 }
 0x616   : > { %v6401_v22 = vpop.f32.mrb[14].mxu1 }
 0x617   : > { %v6403_v26 = vpop.f32.mrb[15].mxu1 }
 0x61d   : > { %v4802_v24 = vpop.f32.mrb[16].mxu0 }
 0x61e   : > { %v1407_v27 = vpop.f32.mrb[17].mxu0  ;;  %v1416_v56 = vadd.f32 %v4802_v24, %v6349_v0 }
 0x61f   : > { %v4803_v30 = vpop.f32.mrb[18].mxu0  ;;  %v1408_v50 = vadd.f32 %v1407_v27, %v6347_v61 }
 0x620   : > { %v1410_v32 = vpop.f32.mrb[19].mxu0  ;;  %v1419_v48 = vadd.f32 %v4803_v30, %v6354_v4  ;;  %v1428_v58 = vsel %vm1008_vm0, %v1416_v56, -inf }
 0x621   : > { %v1411_v44 = vadd.f32 %v1410_v32, %v6351_v2  ;;  %v1422_v57 = vsel %vm1008_vm0, %v1408_v50, -inf }
 0x622   : > { %v1431_v53 = vsel %vm1008_vm0, %v1419_v48, -inf }
 0x623   : > { %v1425_v29 = vsel %vm1008_vm0, %v1411_v44, -inf }
 0x624   : > { %v4786_v33 = vpop.f32.mrb[16].mxu1 }
 0x625   : > { %v1229_v35 = vpop.f32.mrb[17].mxu1  ;;  %v1238_v41 = vadd.f32 %v4786_v33, %v6349_v0 }
 0x626   : > { %v1230_v20 = vadd.f32 %v1229_v35, %v6347_v61  ;;  %v4787_v38 = vpop.f32.mrb[18].mxu1 }
 0x627   : > { %v1232_v40 = vpop.f32.mrb[19].mxu1  ;;  %v6415_v46 = vadd.f32 %v4787_v38, %v6354_v4  ;;  %v1250_v21 = vsel %vm1008_vm0, %v1238_v41, -inf }
 0x628   : > { %v6408_v42 = vadd.f32 %v1232_v40, %v6351_v2  ;;  %v1244_v43 = vsel %vm1008_vm0, %v1230_v20, -inf }
 0x629   : > { %1245 = vmax.xlane.f32.xlu0 %v1244_v43  ;;  %v1253_v51 = vsel %vm1008_vm0, %v6415_v46, -inf }
 0x62a   : > { %v1247_v45 = vsel %vm1008_vm0, %v6408_v42, -inf }
 0x62b   : > { %1248 = vmax.xlane.f32.xlu1 %v1247_v45 }
 0x62d   : > { %1251 = vmax.xlane.f32.xlu0 %v1250_v21 }
 0x62f   : > { %1426 = vmax.xlane.f32.xlu1 %v1425_v29 }
 0x631   : > { %1254 = vmax.xlane.f32.xlu0 %v1253_v51 }
 0x633   : > { %1432 = vmax.xlane.f32.xlu1 %v1431_v53 }
 0x635   : > { %1423 = vmax.xlane.f32.xlu0 %v1422_v57 }
 0x639   : > { %1429 = vmax.xlane.f32.xlu0 %v1428_v58 }
 0x6b6   : > { %v1246_v59 = vpop.xlane.xlu0 %1245 }
 0x6b7   : > { %v1256_v24 = vsub.f32 %v1230_v20, %v1246_v59 }
 0x6b8   : > { %v1249_v60 = vpop.xlane.xlu1 %1248 }
 0x6b9   : > { %v1260_v35 = vmul.f32 1.442695, %v1256_v24  ;;  %v1257_v51 = vsub.f32 %v6408_v42, %v1249_v60 }
 0x6ba   : > { %v1252_v63 = vpop.xlane.xlu0 %1251 }
 0x6bb   : > { %v1258_v9 = vsub.f32 %v1238_v41, %v1252_v63 }
 0x6bc   : > { %v1427_v1 = vpop.xlane.xlu1 %1426 }
 0x6bd   : > { %v1435_v62 = vsub.f32 %v1411_v44, %v1427_v1  ;;  %v1264_v27 = vmul.f32 1.442695, %v1258_v9 }
 0x6be   : > { %v1255_v3 = vpop.xlane.xlu0 %1254 }
 0x6bf   : > { %v1440_v6 = vmul.f32 1.442695, %v1435_v62 }
 0x6c0   : > { %v1433_v7 = vpop.xlane.xlu1 %1432 }
 0x6c1   : > { %5266 = vpow2.f32 %v1440_v6  ;;  %v1437_v8 = vsub.f32 %v1419_v48, %v1433_v7 }
 0x6c2   : > { %v1424_v10 = vpop.xlane.xlu0 %1423 }
 0x6c3   : > { %v1444_v11 = vmul.f32 1.442695, %v1437_v8  ;;  %v1434_v13 = vsub.f32 %v1408_v50, %v1424_v10  ;;  %v1259_v50 = vsub.f32 %v6415_v46, %v1255_v3 }
 0x6c5   : > { %5268 = vpow2.f32 %v1444_v11  ;;  %v1438_v14 = vmul.f32 1.442695, %v1434_v13  ;;  %v1266_v53 = vmul.f32 1.442695, %v1259_v50 }
 0x6c6   : > { %v1430_v15 = vpop.xlane.xlu0 %1429 }
 0x6c7   : > { %5270 = vpow2.f32 %v1438_v14  ;;  %v1436_v16 = vsub.f32 %v1416_v56, %v1430_v15  ;;  %v1262_v56 = vmul.f32 1.442695, %v1257_v51 }
 0x6c9   : > { %v1442_v30 = vmul.f32 1.442695, %v1436_v16 }
 0x6cb   : > { %v6427_v32 = vpop.eup %5266  ;;  %5272 = vpow2.f32 %v1442_v30 }
 0x6cc   : > { %v1449_v33 = vsel %vm1008_vm0, %v6427_v32, 0.0  ;;  %5274 = vpow2.f32 %v1264_v27 }
 0x6cd   : > { %1450 = vadd.xlane.f32.xlu1 %v1449_v33  ;;  %5276 = vpow2.f32 %v1260_v35 }
 0x6ce   : > { %5278 = vpow2.f32 %v1266_v53 }
 0x6cf   : > { %v6431_v38 = vpop.eup %5268  ;;  %5280 = vpow2.f32 %v1262_v56 }
 0x6d0   : > { %v1455_v40 = vsel %vm1008_vm0, %v6431_v38, 0.0 }
 0x6d1   : > { %v6435_v41 = vpop.eup %5270  ;;  %1456 = vadd.xlane.f32.xlu1 %v1455_v40 }
 0x6d2   : > { %v1446_v20 = vsel %vm1008_vm0, %v6435_v41, 0.0 }
 0x6d3   : > { %1447 = vadd.xlane.f32.xlu0 %v1446_v20 }
 0x6d5   : > { %v6439_v43 = vpop.eup %5272 }
 0x6d6   : > { %v1452_v44 = vsel %vm1008_vm0, %v6439_v43, 0.0  ;;  %v5275_v45 = vpop.eup %5274 }
 0x6d7   : > { %1453 = vadd.xlane.f32.xlu0 %v1452_v44  ;;  %v1274_v21 = vsel %vm1008_vm0, %v5275_v45, 0.0  ;;  %v5277_v48 = vpop.eup %5276 }
 0x6d8   : > { %v1268_v29 = vsel %vm1008_vm0, %v5277_v48, 0.0  ;;  %v5279_v57 = vpop.eup %5278 }
 0x6d9   : > { %v1277_v58 = vsel %vm1008_vm0, %v5279_v57, 0.0  ;;  %v5281_v46 = vpop.eup %5280 }
 0x6da   : > { %v1271_v59 = vsel %vm1008_vm0, %v5281_v46, 0.0 }
 0x6db   : > { %1275 = vadd.xlane.f32.xlu0 %v1274_v21 }
 0x6df   : > { %1269 = vadd.xlane.f32.xlu0 %v1268_v29 }
 0x6e2   : > { %1294 = vrot.lane.b32.xlu1 %v6312_v31, %s5813_s14 }
 0x6e6   : > { %1468 = vrot.lane.b32.xlu1 %v6314_v34, %s5814_s9 }
 0x6f5   : > { %1292 = vrot.lane.b32.xlu0 %v6314_v34, %s5813_s14 }
 0x6f9   : > { %1533 = vrot.lane.b32.xlu0 %v6304_v23, %s5815_s7 }
 0x6fd   : > { %1529 = vrot.lane.b32.xlu0 %v6302_v19, %s5815_s7 }
 0x70a   : > { %1278 = vadd.xlane.f32.xlu1 %v1277_v58 }
 0x70e   : > { %1272 = vadd.xlane.f32.xlu1 %v1271_v59 }
 0x71f   : > { %1470 = vrot.lane.b32.xlu1 %v6312_v31, %s5814_s9 }
 0x723   : > { %1535 = vrot.lane.b32.xlu1 %v6318_v39, %s5815_s7 }
 0x727   : > { %1531 = vrot.lane.b32.xlu1 %v6316_v37, %s5815_s7 }
 0x75a   : > { %v1451_v19 = vpop.xlane.xlu1 %1450 }
 0x75b   : > { %5282 = vrcp.f32 %v1451_v19 }
 0x75e   : > { %v1457_v63 = vpop.xlane.xlu1 %1456 }
 0x760   : > { %v1448_v23 = vpop.xlane.xlu0 %1447 }
 0x761   : > { %5284 = vrcp.f32 %v1448_v23 }
 0x762   : > { %v1295_v62 = vpop.permute.xlu1 %1294 }
 0x764   : > { %v1454_v42 = vpop.xlane.xlu0 %1453 }
 0x765   : > { %v5283_v39 = vpop.eup %5282 }
 0x766   : > { %v1469_v6 = vpop.permute.xlu1 %1468  ;;  %v1463_v33 = vmul.f32 %v5283_v39, %v6427_v32 }
 0x768   : > { %v1276_v60 = vpop.xlane.xlu0 %1275 }
 0x76b   : > { %v5285_v8 = vpop.eup %5284 }
 0x76c   : > { %v1270_v1 = vpop.xlane.xlu0 %1269  ;;  %v1462_v24 = vmul.f32 %v5285_v8, %v6435_v41 }
 0x76e   : > { %v1466_v20 = vpack.c.bf16 %v1463_v33, %v1462_v24 }
 0x770   : > { %v1293_v3 = vpop.permute.xlu0 %1292 }
 0x771   : > { %4788 = vmatprep.subr.bf16.mxu1 %v1293_v3 }
 0x772   : > { %4789 = vmatpush3.bf16.msra.mxu1 %v1293_v3 }
 0x773   : > { %4790 = vmatprep.subr.bf16.mxu1 %v1295_v62 }
 0x774   : > { %v1534_v29 = vpop.permute.xlu0 %1533 }
 0x775   : > { %v1544_v50 = vsel %vm1008_vm0, %v1534_v29, 0 }
 0x776   : > { %4791 = vmatpush3.bf16.msra.mxu1 %v1295_v62 }
 0x777   : > { %4804 = vmatprep.subr.bf16.mxu1 %v1469_v6 }
 0x797   : > { %v1279_v7 = vpop.xlane.xlu1 %1278 }
 0x798   : > { %5286 = vrcp.f32 %v1279_v7 }
 0x799   : > { %5288 = vrcp.f32 %v1270_v1 }
 0x79a   : > { %5290 = vrcp.f32 %v1276_v60 }
 0x79b   : > { %v1273_v37 = vpop.xlane.xlu1 %1272 }
 0x79c   : > { %5292 = vrcp.f32 %v1273_v37 }
 0x79d   : > { %5294 = vrcp.f32 %v1454_v42 }
 0x79e   : > { %5296 = vrcp.f32 %v1457_v63 }
 0x79f   : > { %v1471_v21 = vpop.permute.xlu1 %1470 }
 0x7a2   : > { %v5287_v10 = vpop.eup %5286 }
 0x7a3   : > { %v5289_v11 = vpop.eup %5288  ;;  %v1287_v14 = vmul.f32 %v5287_v10, %v5279_v57  ;;  %v1536_v51 = vpop.permute.xlu1 %1535 }
 0x7a4   : > { %v5291_v13 = vpop.eup %5290  ;;  %v1284_v15 = vmul.f32 %v5289_v11, %v5277_v48 }
 0x7a5   : > { %v1286_v27 = vmul.f32 %v5291_v13, %v5275_v45  ;;  %v1530_v45 = vpop.permute.xlu0 %1529 }
 0x7a6   : > { %v5293_v9 = vpop.eup %5292 }
 0x7a7   : > { %v1285_v16 = vmul.f32 %v5293_v9, %v5281_v46  ;;  %v1289_v35 = vpack.c.bf16 %v1287_v14, %v1286_v27  ;;  %v5295_v40 = vpop.eup %5294 }
 0x7a8   : > { %v5297_v44 = vpop.eup %5296  ;;  %v1464_v48 = vmul.f32 %v5295_v40, %v6439_v43  ;;  %v1547_v43 = vsel %vm1008_vm0, %v1536_v51, 0 }
 0x7a9   : > { %v1288_v30 = vpack.c.bf16 %v1285_v16, %v1284_v15  ;;  %v1465_v41 = vmul.f32 %v5297_v44, %v6431_v38  ;;  %v1532_v38 = vpop.permute.xlu1 %1531 }
 0x7ab   : > { %4792 = vmatprep.mubr.msk.bf16.mxu1 %vm1008_vm0, %v1288_v30  ;;  %v1467_v32 = vpack.c.bf16 %v1465_v41, %v1464_v48 }
 0x7ac   : > { %4793 = vmatmul.mubr.msk.bf16.vlgmr.msra.gmra.mrb[20].mxu1 %vm1008_vm0, %v1289_v35 }
 0x7ad   : > { %4805 = vmatpush3.bf16.msra.mxu1 %v1469_v6  ;;  %4808 = vmatprep.mubr.msk.bf16.mxu1 %vm1008_vm0, %v1466_v20 }
 0x7ae   : > { %4806 = vmatprep.subr.bf16.mxu1 %v1471_v21 }
 0x7b1   : > { %4807 = vmatpush3.bf16.msra.mxu1 %v1471_v21 }
 0x7b2   : > { %4938 = vmatprep.subr.msk.bf16.mxu1 %vm1008_vm0, %v1534_v29 }
 0x7b4   : > { %4809 = vmatmul.mubr.msk.bf16.vlgmr.msra.gmra.mrb[24].mxu1 %vm1008_vm0, %v1467_v32 }
 0x7b5   : > { %4816 = vmatprep.mubr.msk.bf16.mxu1 %vm1008_vm0, %v1530_v45 }
 0x7ba   : > { %4813 = vmatpush3.bf16.xpose.msra.mxu1 %v1544_v50 }
 0x7bb   : > { %4939 = vmatprep.subr.msk.bf16.mxu1 %vm1008_vm0, %v1536_v51 }
 0x7c2   : > { %4815 = vmatpush3.bf16.xpose.msra.mxu1 %v1547_v43 }
 0x7c3   : > { %4836 = vmatprep.subr.bf16.mxu1 %v6336_v49 }
 0x7c9   : > { %4817 = vmatmul.mubr.msk.bf16.vlgmr.msra.gmra.mrb[28].mxu1 %vm1008_vm0, %v1532_v38 }
 0x7ca   : > { %4837 = vmatpush3.bf16.msra.mxu1 %v6336_v49 }
 0x7cb   : > { %4838 = vmatprep.subr.bf16.mxu1 %v6334_v47 }
 0x7ce   : > { %4839 = vmatpush3.bf16.msra.mxu1 %v6334_v47 }
 0x87f   : > { %v6483_v53 = vpop.f32.mrb[20].mxu1 }
 0x880   : > { %v6485_v56 = vpop.f32.mrb[21].mxu1 }
 0x881   : > { %v6487_v57 = vpop.f32.mrb[22].mxu1 }
 0x882   : > { %v5059_v58 = vpack.i.bf16 %v6487_v57, %v6483_v53  ;;  %v6491_v46 = vpop.f32.mrb[23].mxu1 }
 0x883   : > { %v5054_v59 = vpack.i.bf16 %v6491_v46, %v6485_v56  ;;  %v5146_v46 = vld [vmem:[%s6184_s16] sm:$0xff]  }
 0x887   : > { %v6495_v23 = vpop.f32.mrb[24].mxu1 }
 0x888   : > { %v6497_v19 = vpop.f32.mrb[25].mxu1 }
 0x889   : > { %v6499_v42 = vpop.f32.mrb[26].mxu1 }
 0x88a   : > { %v5069_v60 = vpack.i.bf16 %v6499_v42, %v6495_v23  ;;  %v6503_v63 = vpop.f32.mrb[27].mxu1 }
 0x88b   : > { %v5064_v1 = vpack.i.bf16 %v6503_v63, %v6497_v19 }
 0x89c   : > { %v4818_v62 = vpop.f32.mrb[28].mxu1 }
 0x89d   : > { %v1583_v3 = vpop.f32.mrb[29].mxu1  ;;  %v1592_v39 = vadd.f32 %v4818_v62, %v6349_v0 }
 0x89e   : > { %v1584_v6 = vadd.f32 %v1583_v3, %v6347_v61  ;;  %v4819_v7 = vpop.f32.mrb[30].mxu1 }
 0x89f   : > { %v1586_v37 = vpop.f32.mrb[31].mxu1  ;;  %v1595_v13 = vadd.f32 %v4819_v7, %v6354_v4  ;;  %v1604_v9 = vsel %vm1008_vm0, %v1592_v39, -inf }
 0x8a0   : > { %v1587_v8 = vadd.f32 %v1586_v37, %v6351_v2  ;;  %v1598_v10 = vsel %vm1008_vm0, %v1584_v6, -inf }
 0x8a1   : > { %1599 = vmax.xlane.f32.xlu0 %v1598_v10  ;;  %v1607_v14 = vsel %vm1008_vm0, %v1595_v13, -inf }
 0x8a2   : > { %v1601_v11 = vsel %vm1008_vm0, %v1587_v8, -inf }
 0x8a3   : > { %1602 = vmax.xlane.f32.xlu1 %v1601_v11 }
 0x8a5   : > { %1605 = vmax.xlane.f32.xlu0 %v1604_v9 }
 0x8a9   : > { %1608 = vmax.xlane.f32.xlu0 %v1607_v14 }
 0x92e   : > { %v1600_v15 = vpop.xlane.xlu0 %1599 }
 0x92f   : > { %v1610_v16 = vsub.f32 %v1584_v6, %v1600_v15 }
 0x930   : > { %v1603_v24 = vpop.xlane.xlu1 %1602 }
 0x931   : > { %v1614_v33 = vmul.f32 1.442695, %v1610_v16  ;;  %v1611_v35 = vsub.f32 %v1587_v8, %v1603_v24  ;;  %v1774_v24 = vsel %vm1008_vm0, %v6332_v28, 0 }
 0x932   : > { %v1606_v27 = vpop.xlane.xlu0 %1605 }
 0x933   : > { %v1612_v30 = vsub.f32 %v1592_v39, %v1606_v27  ;;  %v1616_v21 = vmul.f32 1.442695, %v1611_v35  ;;  %v1777_v27 = vsel %vm1008_vm0, %v6340_v54, 0 }
 0x935   : > { %v1618_v40 = vmul.f32 1.442695, %v1612_v30 }
 0x936   : > { %v1609_v20 = vpop.xlane.xlu0 %1608 }
 0x937   : > { %5298 = vpow2.f32 %v1618_v40  ;;  %v1613_v44 = vsub.f32 %v1595_v13, %v1609_v20 }
 0x938   : > { %5300 = vpow2.f32 %v1614_v33 }
 0x939   : > { %v1620_v48 = vmul.f32 1.442695, %v1613_v44 }
 0x93b   : > { %5302 = vpow2.f32 %v1620_v48 }
 0x93c   : > { %5304 = vpow2.f32 %v1616_v21 }
 0x941   : > { %v5299_v29 = vpop.eup %5298 }
 0x942   : > { %v1628_v41 = vsel %vm1008_vm0, %v5299_v29, 0.0  ;;  %v5301_v32 = vpop.eup %5300 }
 0x943   : > { %1629 = vadd.xlane.f32.xlu0 %v1628_v41  ;;  %v1622_v50 = vsel %vm1008_vm0, %v5301_v32, 0.0 }
 0x945   : > { %v5303_v45 = vpop.eup %5302 }
 0x946   : > { %v1631_v51 = vsel %vm1008_vm0, %v5303_v45, 0.0  ;;  %v5305_v43 = vpop.eup %5304 }
 0x947   : > { %1623 = vadd.xlane.f32.xlu0 %v1622_v50  ;;  %1632 = vadd.xlane.f32.xlu1 %v1631_v51  ;;  %v1625_v38 = vsel %vm1008_vm0, %v5305_v43, 0.0 }
 0x94b   : > { %1626 = vadd.xlane.f32.xlu1 %v1625_v38 }
 0x95c   : > { %1646 = vrot.lane.b32.xlu1 %v6312_v31, %s5815_s7 }
 0x95d   : > { %1644 = vrot.lane.b32.xlu0 %v6314_v34, %s5815_s7 }
 0x9d0   : > { %v1630_v62 = vpop.xlane.xlu0 %1629 }
 0x9d4   : > { %v1633_v3 = vpop.xlane.xlu1 %1632  ;;  %v1624_v6 = vpop.xlane.xlu0 %1623 }
 0x9d5   : > { %5306 = vrcp.f32 %v1633_v3 }
 0x9d6   : > { %5308 = vrcp.f32 %v1624_v6 }
 0x9d7   : > { %5310 = vrcp.f32 %v1630_v62 }
 0x9d8   : > { %v1627_v7 = vpop.xlane.xlu1 %1626  ;;  %v1645_v37 = vpop.permute.xlu0 %1644 }
 0x9d9   : > { %5312 = vrcp.f32 %v1627_v7  ;;  %4820 = vmatprep.subr.bf16.mxu0 %v1645_v37 }
 0x9da   : > { %4821 = vmatpush3.bf16.msra.mxu0 %v1645_v37 }
 0x9dc   : > { %v1647_v39 = vpop.permute.xlu1 %1646 }
 0x9dd   : > { %4822 = vmatprep.subr.bf16.mxu0 %v1647_v39 }
 0x9de   : > { %4823 = vmatpush3.bf16.msra.mxu0 %v1647_v39 }
 0x9df   : > { %4940 = vmatprep.subr.msk.bf16.mxu0 %vm1008_vm0, %v6332_v28  ;;  %v5307_v31 = vpop.eup %5306 }
 0x9e0   : > { %v5309_v8 = vpop.eup %5308  ;;  %v1641_v11 = vmul.f32 %v5307_v31, %v5303_v45 }
 0x9e1   : > { %v5311_v34 = vpop.eup %5310  ;;  %v1638_v13 = vmul.f32 %v5309_v8, %v5301_v32 }
 0x9e2   : > { %v1640_v14 = vmul.f32 %v5311_v34, %v5299_v29 }
 0x9e3   : > { %v5313_v10 = vpop.eup %5312 }
 0x9e4   : > { %v1639_v9 = vmul.f32 %v5313_v10, %v5305_v43  ;;  %v1643_v16 = vpack.c.bf16 %v1641_v11, %v1640_v14 }
 0x9e6   : > { %v1642_v15 = vpack.c.bf16 %v1639_v9, %v1638_v13 }
 0x9e8   : > { %4824 = vmatprep.mubr.msk.bf16.mxu0 %vm1008_vm0, %v1642_v15 }
 0x9e9   : > { %4825 = vmatmul.mubr.msk.bf16.vlgmr.msra.gmra.mrb[20].mxu0 %vm1008_vm0, %v1643_v16 }
 0x9ea   : > { %4829 = vmatpush3.bf16.xpose.msra.mxu0 %v1774_v24  ;;  %4832 = vmatprep.mubr.msk.bf16.mxu0 %vm1008_vm0, %v6330_v36 }
 0x9eb   : > { %4941 = vmatprep.subr.msk.bf16.mxu0 %vm1008_vm0, %v6340_v54 }
 0x9f2   : > { %4831 = vmatpush3.bf16.xpose.msra.mxu0 %v1777_v27 }
 0x9f9   : > { %4833 = vmatmul.mubr.msk.bf16.vlgmr.msra.gmra.mrb[24].mxu0 %vm1008_vm0, %v6338_v52 }
 0xabc   : > { %v6537_v30 = vpop.f32.mrb[20].mxu0 }
 0xabd   : > { %v6539_v33 = vpop.f32.mrb[21].mxu0 }
 0xabe   : > { %v6541_v35 = vpop.f32.mrb[22].mxu0 }
 0xabf   : > { %v5079_v40 = vpack.i.bf16 %v6541_v35, %v6537_v30  ;;  %v6545_v20 = vpop.f32.mrb[23].mxu0 }
 0xac0   : > { %v5074_v44 = vpack.i.bf16 %v6545_v20, %v6539_v33 }
 0xacc   : > { %v4834_v21 = vpop.f32.mrb[24].mxu0 }
 0xacd   : > { %v1813_v48 = vpop.f32.mrb[25].mxu0  ;;  %v1822_v43 = vadd.f32 %v4834_v21, %v6349_v0 }
 0xace   : > { %v1814_v29 = vadd.f32 %v1813_v48, %v6347_v61  ;;  %v4835_v41 = vpop.f32.mrb[26].mxu0 }
 0xacf   : > { %v1816_v32 = vpop.f32.mrb[27].mxu0  ;;  %v1825_v45 = vadd.f32 %v4835_v41, %v6354_v4  ;;  %v1834_v3 = vsel %vm1008_vm0, %v1822_v43, -inf }
 0xad0   : > { %v1817_v50 = vadd.f32 %v1816_v32, %v6351_v2  ;;  %v1828_v51 = vsel %vm1008_vm0, %v1814_v29, -inf }
 0xad1   : > { %1829 = vmax.xlane.f32.xlu1 %v1828_v51  ;;  %v1837_v62 = vsel %vm1008_vm0, %v1825_v45, -inf }
 0xad2   : > { %v1831_v38 = vsel %vm1008_vm0, %v1817_v50, -inf }
 0xad3   : > { %1832 = vmax.xlane.f32.xlu0 %v1831_v38 }
 0xad5   : > { %1838 = vmax.xlane.f32.xlu1 %v1837_v62 }
 0xad7   : > { %1835 = vmax.xlane.f32.xlu0 %v1834_v3 }
 0xb5e   : > { %v1830_v6 = vpop.xlane.xlu1 %1829 }
 0xb5f   : > { %v1840_v31 = vsub.f32 %v1814_v29, %v1830_v6 }
 0xb60   : > { %v1833_v7 = vpop.xlane.xlu0 %1832 }
 0xb61   : > { %v1841_v37 = vsub.f32 %v1817_v50, %v1833_v7  ;;  %v1844_v9 = vmul.f32 1.442695, %v1840_v31 }
 0xb62   : > { %v1839_v39 = vpop.xlane.xlu1 %1838 }
 0xb63   : > { %v1846_v8 = vmul.f32 1.442695, %v1841_v37  ;;  %v1843_v34 = vsub.f32 %v1825_v45, %v1839_v39 }
 0xb64   : > { %v1836_v10 = vpop.xlane.xlu0 %1835 }
 0xb65   : > { %5314 = vpow2.f32 %v1846_v8  ;;  %v1850_v11 = vmul.f32 1.442695, %v1843_v34  ;;  %v1842_v13 = vsub.f32 %v1822_v43, %v1836_v10 }
 0xb67   : > { %5316 = vpow2.f32 %v1850_v11  ;;  %v1848_v14 = vmul.f32 1.442695, %v1842_v13 }
 0xb69   : > { %5318 = vpow2.f32 %v1848_v14 }
 0xb6a   : > { %5320 = vpow2.f32 %v1844_v9 }
 0xb6f   : > { %v5315_v15 = vpop.eup %5314 }
 0xb70   : > { %v1855_v16 = vsel %vm1008_vm0, %v5315_v15, 0.0 }
 0xb71   : > { %v5317_v24 = vpop.eup %5316  ;;  %1856 = vadd.xlane.f32.xlu1 %v1855_v16 }
 0xb72   : > { %v1861_v48 = vsel %vm1008_vm0, %v5317_v24, 0.0 }
 0xb73   : > { %v5319_v27 = vpop.eup %5318 }
 0xb74   : > { %v1858_v21 = vsel %vm1008_vm0, %v5319_v27, 0.0  ;;  %v5321_v29 = vpop.eup %5320 }
 0xb75   : > { %1859 = vadd.xlane.f32.xlu0 %v1858_v21  ;;  %1862 = vadd.xlane.f32.xlu1 %v1861_v48  ;;  %v1852_v41 = vsel %vm1008_vm0, %v5321_v29, 0.0 }
 0xb79   : > { %1853 = vadd.xlane.f32.xlu0 %v1852_v41 }
 0xb86   : > { %1939 = vrot.lane.b32.xlu1 %v6340_v54, %s5813_s14 }
 0xb8a   : > { %1931 = vrot.lane.b32.xlu1 %v6330_v36, %s5813_s14 }
 0xb8e   : > { %1933 = vrot.lane.b32.xlu1 %v6338_v52, %s5813_s14 }
 0xb8f   : > { %1937 = vrot.lane.b32.xlu0 %v6332_v28, %s5813_s14 }
 0xbfe   : > { %v1857_v32 = vpop.xlane.xlu1 %1856 }
 0xc02   : > { %v1860_v45 = vpop.xlane.xlu0 %1859  ;;  %v1863_v50 = vpop.xlane.xlu1 %1862 }
 0xc03   : > { %5322 = vrcp.f32 %v1860_v45 }
 0xc04   : > { %5324 = vrcp.f32 %v1863_v50 }
 0xc05   : > { %5326 = vrcp.f32 %v1857_v32 }
 0xc06   : > { %v1854_v51 = vpop.xlane.xlu0 %1853  ;;  %v1940_v39 = vpop.permute.xlu1 %1939 }
 0xc07   : > { %5328 = vrcp.f32 %v1854_v51  ;;  %v1951_v9 = vsel %vm1008_vm0, %v1940_v39, 0 }
 0xc0a   : > { %v1938_v43 = vpop.permute.xlu0 %1937  ;;  %v1932_v13 = vpop.permute.xlu1 %1931 }
 0xc0b   : > { %4942 = vmatprep.subr.msk.bf16.mxu1 %vm1008_vm0, %v1938_v43  ;;  %v1948_v11 = vsel %vm1008_vm0, %v1938_v43, 0 }
 0xc0d   : > { %v5323_v38 = vpop.eup %5322 }
 0xc0e   : > { %v5325_v62 = vpop.eup %5324  ;;  %v1870_v7 = vmul.f32 %v5323_v38, %v5319_v27  ;;  %v1934_v14 = vpop.permute.xlu1 %1933 }
 0xc0f   : > { %v5327_v3 = vpop.eup %5326  ;;  %v1871_v37 = vmul.f32 %v5325_v62, %v5317_v24 }
 0xc10   : > { %v1869_v8 = vmul.f32 %v5327_v3, %v5315_v15 }
 0xc11   : > { %v5329_v6 = vpop.eup %5328  ;;  %v1873_v10 = vpack.c.bf16 %v1871_v37, %v1870_v7 }
 0xc12   : > { %v1868_v31 = vmul.f32 %v5329_v6, %v5321_v29 }
 0xc14   : > { %v1872_v34 = vpack.c.bf16 %v1869_v8, %v1868_v31 }
 0xc16   : > { %4840 = vmatprep.mubr.msk.bf16.mxu1 %vm1008_vm0, %v1872_v34 }
 0xc17   : > { %4841 = vmatmul.mubr.msk.bf16.vlgmr.msra.gmra.mrb[32].mxu1 %vm1008_vm0, %v1873_v10 }
 0xc18   : > { %4845 = vmatpush3.bf16.xpose.msra.mxu1 %v1948_v11  ;;  %4848 = vmatprep.mubr.msk.bf16.mxu1 %vm1008_vm0, %v1932_v13 }
 0xc19   : > { %4943 = vmatprep.subr.msk.bf16.mxu1 %vm1008_vm0, %v1940_v39 }
 0xc20   : > { %4847 = vmatpush3.bf16.xpose.msra.mxu1 %v1951_v9 }
 0xc27   : > { %4849 = vmatmul.mubr.msk.bf16.vlgmr.msra.gmra.mrb[36].mxu1 %vm1008_vm0, %v1934_v14 }
 0xcea   : > { %v6577_v15 = vpop.f32.mrb[32].mxu1 }
 0xceb   : > { %v6579_v16 = vpop.f32.mrb[33].mxu1 }
 0xcec   : > { %v6581_v24 = vpop.f32.mrb[34].mxu1 }
 0xced   : > { %v6583_v27 = vpop.f32.mrb[35].mxu1 }
 0xcfa   : > { %v4850_v21 = vpop.f32.mrb[36].mxu1 }
 0xcfb   : > { %v1987_v48 = vpop.f32.mrb[37].mxu1  ;;  %v1996_v45 = vadd.f32 %v4850_v21, %v6349_v0 }
 0xcfc   : > { %v1988_v29 = vadd.f32 %v1987_v48, %v6347_v61  ;;  %v4851_v41 = vpop.f32.mrb[38].mxu1 }
 0xcfd   : > { %v1990_v32 = vpop.f32.mrb[39].mxu1  ;;  %v1999_v38 = vadd.f32 %v4851_v41, %v6354_v4  ;;  %v2008_v62 = vsel %vm1008_vm0, %v1996_v45, -inf }
 0xcfe   : > { %v1991_v50 = vadd.f32 %v1990_v32, %v6351_v2  ;;  %v2002_v51 = vsel %vm1008_vm0, %v1988_v29, -inf }
 0xcff   : > { %2003 = vmax.xlane.f32.xlu0 %v2002_v51  ;;  %v2011_v3 = vsel %vm1008_vm0, %v1999_v38, -inf }
 0xd00   : > { %v2005_v43 = vsel %vm1008_vm0, %v1991_v50, -inf }
 0xd01   : > { %2006 = vmax.xlane.f32.xlu1 %v2005_v43 }
 0xd03   : > { %2009 = vmax.xlane.f32.xlu0 %v2008_v62 }
 0xd07   : > { %2012 = vmax.xlane.f32.xlu0 %v2011_v3 }
 0xd12   : > { %2052 = vrot.lane.b32.xlu1 %v6334_v47, %s5813_s14 }
 0xd8c   : > { %v2004_v6 = vpop.xlane.xlu0 %2003 }
 0xd8d   : > { %v2014_v7 = vsub.f32 %v1988_v29, %v2004_v6 }
 0xd8e   : > { %v2007_v37 = vpop.xlane.xlu1 %2006 }
 0xd8f   : > { %v2018_v8 = vmul.f32 1.442695, %v2014_v7  ;;  %v2015_v34 = vsub.f32 %v1991_v50, %v2007_v37 }
 0xd90   : > { %v2010_v39 = vpop.xlane.xlu0 %2009 }
 0xd91   : > { %v2016_v31 = vsub.f32 %v1996_v45, %v2010_v39  ;;  %v2020_v9 = vmul.f32 1.442695, %v2015_v34 }
 0xd92   : > { %v2053_v43 = vpop.permute.xlu1 %2052 }
 0xd93   : > { %v2022_v10 = vmul.f32 1.442695, %v2016_v31 }
 0xd94   : > { %v2013_v11 = vpop.xlane.xlu0 %2012 }
 0xd95   : > { %5330 = vpow2.f32 %v2022_v10  ;;  %v2017_v13 = vsub.f32 %v1999_v38, %v2013_v11 }
 0xd96   : > { %5332 = vpow2.f32 %v2018_v8 }
 0xd97   : > { %v2024_v14 = vmul.f32 1.442695, %v2017_v13 }
 0xd99   : > { %5334 = vpow2.f32 %v2024_v14 }
 0xd9a   : > { %5336 = vpow2.f32 %v2020_v9 }
 0xd9f   : > { %v5331_v21 = vpop.eup %5330 }
 0xda0   : > { %v2032_v48 = vsel %vm1008_vm0, %v5331_v21, 0.0  ;;  %v5333_v41 = vpop.eup %5332 }
 0xda1   : > { %2033 = vadd.xlane.f32.xlu0 %v2032_v48  ;;  %v2026_v32 = vsel %vm1008_vm0, %v5333_v41, 0.0 }
 0xda3   : > { %v5335_v29 = vpop.eup %5334 }
 0xda4   : > { %v2035_v45 = vsel %vm1008_vm0, %v5335_v29, 0.0  ;;  %v5337_v50 = vpop.eup %5336 }
 0xda5   : > { %2027 = vadd.xlane.f32.xlu0 %v2026_v32  ;;  %2036 = vadd.xlane.f32.xlu1 %v2035_v45  ;;  %v2029_v51 = vsel %vm1008_vm0, %v5337_v50, 0.0 }
 0xda9   : > { %2030 = vadd.xlane.f32.xlu1 %v2029_v51 }
 0xdba   : > { %2115 = vrot.lane.b32.xlu1 %v6332_v28, %s5814_s9 }
 0xdbb   : > { %2050 = vrot.lane.b32.xlu0 %v6336_v49, %s5813_s14 }
 0xdbe   : > { %2117 = vrot.lane.b32.xlu1 %v6340_v54, %s5814_s9 }
 0xdbf   : > { %2111 = vrot.lane.b32.xlu0 %v6330_v36, %s5814_s9 }
 0xdc2   : > { %2113 = vrot.lane.b32.xlu1 %v6338_v52, %s5814_s9 }
 0xe2e   : > { %v2034_v38 = vpop.xlane.xlu0 %2033 }
 0xe32   : > { %v2037_v62 = vpop.xlane.xlu1 %2036  ;;  %v2028_v3 = vpop.xlane.xlu0 %2027 }
 0xe33   : > { %5338 = vrcp.f32 %v2037_v62 }
 0xe34   : > { %5340 = vrcp.f32 %v2028_v3 }
 0xe35   : > { %5342 = vrcp.f32 %v2034_v38 }
 0xe36   : > { %v2031_v6 = vpop.xlane.xlu1 %2030  ;;  %v2051_v7 = vpop.permute.xlu0 %2050 }
 0xe37   : > { %5344 = vrcp.f32 %v2031_v6  ;;  %4852 = vmatprep.subr.bf16.mxu0 %v2051_v7 }
 0xe38   : > { %4853 = vmatpush3.bf16.msra.mxu0 %v2051_v7 }
 0xe39   : > { %4854 = vmatprep.subr.bf16.mxu0 %v2053_v43 }
 0xe3a   : > { %v2116_v37 = vpop.permute.xlu1 %2115  ;;  %v2112_v45 = vpop.permute.xlu0 %2111 }
 0xe3b   : > { %v2126_v32 = vsel %vm1008_vm0, %v2116_v37, 0 }
 0xe3c   : > { %4855 = vmatpush3.bf16.msra.mxu0 %v2053_v43 }
 0xe3d   : > { %4944 = vmatprep.subr.msk.bf16.mxu0 %vm1008_vm0, %v2116_v37  ;;  %v5339_v39 = vpop.eup %5338 }
 0xe3e   : > { %v5341_v31 = vpop.eup %5340  ;;  %v2045_v10 = vmul.f32 %v5339_v39, %v5335_v29  ;;  %v2118_v51 = vpop.permute.xlu1 %2117 }
 0xe3f   : > { %v5343_v8 = vpop.eup %5342  ;;  %v2042_v11 = vmul.f32 %v5341_v31, %v5333_v41  ;;  %v2129_v29 = vsel %vm1008_vm0, %v2118_v51, 0 }
 0xe40   : > { %v2044_v9 = vmul.f32 %v5343_v8, %v5331_v21 }
 0xe41   : > { %v5345_v34 = vpop.eup %5344 }
 0xe42   : > { %v2043_v13 = vmul.f32 %v5345_v34, %v5337_v50  ;;  %v2047_v48 = vpack.c.bf16 %v2045_v10, %v2044_v9  ;;  %v2114_v41 = vpop.permute.xlu1 %2113 }
 0xe44   : > { %v2046_v14 = vpack.c.bf16 %v2043_v13, %v2042_v11 }
 0xe46   : > { %4856 = vmatprep.mubr.msk.bf16.mxu0 %vm1008_vm0, %v2046_v14 }
 0xe47   : > { %4857 = vmatmul.mubr.msk.bf16.vlgmr.msra.gmra.mrb[28].mxu0 %vm1008_vm0, %v2047_v48 }
 0xe48   : > { %4861 = vmatpush3.bf16.xpose.msra.mxu0 %v2126_v32  ;;  %4864 = vmatprep.mubr.msk.bf16.mxu0 %vm1008_vm0, %v2112_v45 }
 0xe49   : > { %4945 = vmatprep.subr.msk.bf16.mxu0 %vm1008_vm0, %v2118_v51 }
 0xe50   : > { %4863 = vmatpush3.bf16.xpose.msra.mxu0 %v2129_v29 }
 0xe57   : > { %4865 = vmatmul.mubr.msk.bf16.vlgmr.msra.gmra.mrb[32].mxu0 %vm1008_vm0, %v2114_v41 }
 0xf1a   : > { %v6617_v21 = vpop.f32.mrb[28].mxu0 }
 0xf1b   : > { %v6619_v50 = vpop.f32.mrb[29].mxu0 }
 0xf1c   : > { %v6621_v43 = vpop.f32.mrb[30].mxu0 }
 0xf1d   : > { %v6625_v62 = vpop.f32.mrb[31].mxu0 }
 0xf1e   : > { %v5084_v3 = vpack.i.bf16 %v6625_v62, %v6619_v50 }
 0xf2a   : > { %v4866_v6 = vpop.f32.mrb[32].mxu0 }
 0xf2b   : > { %v2165_v7 = vpop.f32.mrb[33].mxu0  ;;  %v2174_v8 = vadd.f32 %v4866_v6, %v6349_v0 }
 0xf2c   : > { %v2166_v37 = vadd.f32 %v2165_v7, %v6347_v61  ;;  %v4867_v39 = vpop.f32.mrb[34].mxu0 }
 0xf2d   : > { %v2168_v31 = vpop.f32.mrb[35].mxu0  ;;  %v2177_v13 = vadd.f32 %v4867_v39, %v6354_v4  ;;  %v2186_v9 = vsel %vm1008_vm0, %v2174_v8, -inf }
 0xf2e   : > { %v2169_v34 = vadd.f32 %v2168_v31, %v6351_v2  ;;  %v2180_v10 = vsel %vm1008_vm0, %v2166_v37, -inf }
 0xf2f   : > { %2181 = vmax.xlane.f32.xlu0 %v2180_v10  ;;  %v2189_v14 = vsel %vm1008_vm0, %v2177_v13, -inf }
 0xf30   : > { %v2183_v11 = vsel %vm1008_vm0, %v2169_v34, -inf }
 0xf31   : > { %2184 = vmax.xlane.f32.xlu1 %v2183_v11 }
 0xf33   : > { %2187 = vmax.xlane.f32.xlu0 %v2186_v9 }
 0xf37   : > { %2190 = vmax.xlane.f32.xlu0 %v2189_v14 }
 0xf42   : > { %2228 = vrot.lane.b32.xlu1 %v6334_v47, %s5814_s9 }
 0xfbc   : > { %v2182_v48 = vpop.xlane.xlu0 %2181 }
 0xfbd   : > { %v2192_v32 = vsub.f32 %v2166_v37, %v2182_v48 }
 0xfbe   : > { %v2185_v45 = vpop.xlane.xlu1 %2184 }
 0xfbf   : > { %v2196_v41 = vmul.f32 1.442695, %v2192_v32  ;;  %v2193_v6 = vsub.f32 %v2169_v34, %v2185_v45 }
 0xfc0   : > { %v2188_v51 = vpop.xlane.xlu0 %2187 }
 0xfc1   : > { %v2194_v29 = vsub.f32 %v2174_v8, %v2188_v51  ;;  %v2198_v10 = vmul.f32 1.442695, %v2193_v6 }
 0xfc2   : > { %v2229_v32 = vpop.permute.xlu1 %2228 }
 0xfc3   : > { %v2200_v7 = vmul.f32 1.442695, %v2194_v29 }
 0xfc4   : > { %v2191_v31 = vpop.xlane.xlu0 %2190 }
 0xfc5   : > { %5346 = vpow2.f32 %v2200_v7  ;;  %v2195_v39 = vsub.f32 %v2177_v13, %v2191_v31 }
 0xfc6   : > { %5348 = vpow2.f32 %v2196_v41 }
 0xfc7   : > { %v2202_v11 = vmul.f32 1.442695, %v2195_v39 }
 0xfc9   : > { %5350 = vpow2.f32 %v2202_v11 }
 0xfca   : > { %5352 = vpow2.f32 %v2198_v10 }
 0xfcf   : > { %v5347_v9 = vpop.eup %5346 }
 0xfd0   : > { %v2210_v14 = vsel %vm1008_vm0, %v5347_v9, 0.0  ;;  %v5349_v38 = vpop.eup %5348 }
 0xfd1   : > { %2211 = vadd.xlane.f32.xlu0 %v2210_v14  ;;  %v2204_v48 = vsel %vm1008_vm0, %v5349_v38, 0.0 }
 0xfd3   : > { %v5351_v37 = vpop.eup %5350 }
 0xfd4   : > { %v2213_v8 = vsel %vm1008_vm0, %v5351_v37, 0.0  ;;  %v5353_v34 = vpop.eup %5352 }
 0xfd5   : > { %2205 = vadd.xlane.f32.xlu0 %v2204_v48  ;;  %2214 = vadd.xlane.f32.xlu1 %v2213_v8  ;;  %v2207_v13 = vsel %vm1008_vm0, %v5353_v34, 0.0 }
 0xfd9   : > { %2208 = vadd.xlane.f32.xlu1 %v2207_v13 }
 0xfea   : > { %2291 = vrot.lane.b32.xlu1 %v6332_v28, %s5815_s7 }
 0xfeb   : > { %2226 = vrot.lane.b32.xlu0 %v6336_v49, %s5814_s9 }
 0xfee   : > { %2293 = vrot.lane.b32.xlu1 %v6340_v54, %s5815_s7 }
 0xfef   : > { %2287 = vrot.lane.b32.xlu0 %v6330_v36, %s5815_s7 }
 0xff2   : > { %2289 = vrot.lane.b32.xlu1 %v6338_v52, %s5815_s7 }
0x105e   : > { %v2212_v45 = vpop.xlane.xlu0 %2211 }
0x1062   : > { %v2215_v51 = vpop.xlane.xlu1 %2214  ;;  %v2206_v29 = vpop.xlane.xlu0 %2205 }
0x1063   : > { %5354 = vrcp.f32 %v2215_v51 }
0x1064   : > { %5356 = vrcp.f32 %v2206_v29 }
0x1065   : > { %5358 = vrcp.f32 %v2212_v45 }
0x1066   : > { %v2209_v28 = vpop.xlane.xlu1 %2208  ;;  %v2227_v41 = vpop.permute.xlu0 %2226 }
0x1067   : > { %5360 = vrcp.f32 %v2209_v28  ;;  %4868 = vmatprep.subr.bf16.mxu1 %v2227_v41 }
0x1068   : > { %4869 = vmatpush3.bf16.msra.mxu1 %v2227_v41 }
0x1069   : > { %4870 = vmatprep.subr.bf16.mxu1 %v2229_v32 }
0x106a   : > { %v2292_v54 = vpop.permute.xlu1 %2291  ;;  %v2288_v13 = vpop.permute.xlu0 %2287 }
0x106b   : > { %v2302_v8 = vsel %vm1008_vm0, %v2292_v54, 0 }
0x106c   : > { %4871 = vmatpush3.bf16.msra.mxu1 %v2229_v32 }
0x106d   : > { %4946 = vmatprep.subr.msk.bf16.mxu1 %vm1008_vm0, %v2292_v54  ;;  %v5355_v36 = vpop.eup %5354 }
0x106e   : > { %v5357_v6 = vpop.eup %5356  ;;  %v2223_v31 = vmul.f32 %v5355_v36, %v5351_v37  ;;  %v2294_v32 = vpop.permute.xlu1 %2293 }
0x106f   : > { %v5359_v52 = vpop.eup %5358  ;;  %v2220_v39 = vmul.f32 %v5357_v6, %v5349_v38  ;;  %v2305_v37 = vsel %vm1008_vm0, %v2294_v32, 0 }
0x1070   : > { %v2222_v11 = vmul.f32 %v5359_v52, %v5347_v9 }
0x1071   : > { %v5361_v7 = vpop.eup %5360 }
0x1072   : > { %v2221_v10 = vmul.f32 %v5361_v7, %v5353_v34  ;;  %v2225_v48 = vpack.c.bf16 %v2223_v31, %v2222_v11  ;;  %v2290_v38 = vpop.permute.xlu1 %2289 }
0x1074   : > { %v2224_v14 = vpack.c.bf16 %v2221_v10, %v2220_v39 }
0x1076   : > { %4872 = vmatprep.mubr.msk.bf16.mxu1 %vm1008_vm0, %v2224_v14 }
0x1077   : > { %4873 = vmatmul.mubr.msk.bf16.vlgmr.msra.gmra.mrb[40].mxu1 %vm1008_vm0, %v2225_v48 }
0x1078   : > { %4877 = vmatpush3.bf16.xpose.msra.mxu1 %v2302_v8  ;;  %4880 = vmatprep.mubr.msk.bf16.mxu1 %vm1008_vm0, %v2288_v13 }
0x1079   : > { %4947 = vmatprep.subr.msk.bf16.mxu1 %vm1008_vm0, %v2294_v32 }
0x1080   : > { %4879 = vmatpush3.bf16.xpose.msra.mxu1 %v2305_v37 }
0x1087   : > { %4881 = vmatmul.mubr.msk.bf16.vlgmr.msra.gmra.mrb[44].mxu1 %vm1008_vm0, %v2290_v38 }
0x1088   : > { %3030 = vmatprep.mubr.bf16.mxu1 %v5811_v55 }
0x114a   : > { %v4874_v9 = vpop.f32.mrb[40].mxu1 }
0x114b   : > { %v2272_v34 = vpop.f32.mrb[41].mxu1 }
0x114c   : > { %v4875_v45 = vpop.f32.mrb[42].mxu1 }
0x114d   : > { %v5099_v51 = vpack.i.bf16 %v4875_v45, %v4874_v9  ;;  %v2275_v29 = vpop.f32.mrb[43].mxu1 }
0x114e   : > { %v5094_v28 = vpack.i.bf16 %v2275_v29, %v2272_v34 }
0x115a   : > { %v4882_v41 = vpop.f32.mrb[44].mxu1 }
0x115b   : > { %v2341_v54 = vpop.f32.mrb[45].mxu1  ;;  %v2350_v7 = vadd.f32 %v4882_v41, %v6349_v0 }
0x115c   : > { %v2342_v36 = vadd.f32 %v2341_v54, %v6347_v61  ;;  %v4883_v6 = vpop.f32.mrb[46].mxu1 }
0x115d   : > { %v2344_v52 = vpop.f32.mrb[47].mxu1  ;;  %v2353_v11 = vadd.f32 %v4883_v6, %v6354_v4  ;;  %v2362_v14 = vsel %vm1008_vm0, %v2350_v7, -inf }
0x115e   : > { %v2345_v31 = vadd.f32 %v2344_v52, %v6351_v2  ;;  %v2356_v39 = vsel %vm1008_vm0, %v2342_v36, -inf }
0x115f   : > { %2357 = vmax.xlane.f32.xlu0 %v2356_v39  ;;  %v2365_v48 = vsel %vm1008_vm0, %v2353_v11, -inf }
0x1160   : > { %v2359_v10 = vsel %vm1008_vm0, %v2345_v31, -inf }
0x1161   : > { %2360 = vmax.xlane.f32.xlu1 %v2359_v10 }
0x1163   : > { %2363 = vmax.xlane.f32.xlu0 %v2362_v14 }
0x1167   : > { %2366 = vmax.xlane.f32.xlu0 %v2365_v48 }
0x11ec   : > { %v2358_v61 = vpop.xlane.xlu0 %2357 }
0x11ed   : > { %v2368_v8 = vsub.f32 %v2342_v36, %v2358_v61 }
0x11ee   : > { %v2361_v13 = vpop.xlane.xlu1 %2360 }
0x11ef   : > { %v2372_v2 = vmul.f32 1.442695, %v2368_v8  ;;  %v2369_v37 = vsub.f32 %v2345_v31, %v2361_v13 }
0x11f0   : > { %v2364_v0 = vpop.xlane.xlu0 %2363 }
0x11f1   : > { %v2370_v32 = vsub.f32 %v2350_v7, %v2364_v0  ;;  %v2374_v45 = vmul.f32 1.442695, %v2369_v37  ;;  %v5147_v0 = vld [vmem:[%s6184_s16 + $0x8] sm:$0xff]  }
0x11f3   : > { %v2376_v38 = vmul.f32 1.442695, %v2370_v32 }
0x11f4   : > { %v2367_v9 = vpop.xlane.xlu0 %2366 }
0x11f5   : > { %5362 = vpow2.f32 %v2376_v38  ;;  %v2371_v34 = vsub.f32 %v2353_v11, %v2367_v9 }
0x11f6   : > { %5364 = vpow2.f32 %v2372_v2 }
0x11f7   : > { %v2378_v4 = vmul.f32 1.442695, %v2371_v34 }
0x11f9   : > { %5366 = vpow2.f32 %v2378_v4 }
0x11fa   : > { %5368 = vpow2.f32 %v2374_v45 }
0x11ff   : > { %v6670_v29 = vpop.eup %5362 }
0x1200   : > { %v2386_v41 = vsel %vm1008_vm0, %v6670_v29, 0.0  ;;  %v5365_v54 = vpop.eup %5364 }
0x1201   : > { %2387 = vadd.xlane.f32.xlu0 %v2386_v41  ;;  %v2380_v6 = vsel %vm1008_vm0, %v5365_v54, 0.0 }
0x1203   : > { %v5367_v36 = vpop.eup %5366 }
0x1204   : > { %v2389_v52 = vsel %vm1008_vm0, %v5367_v36, 0.0  ;;  %v5369_v7 = vpop.eup %5368 }
0x1205   : > { %2381 = vadd.xlane.f32.xlu0 %v2380_v6  ;;  %2390 = vadd.xlane.f32.xlu1 %v2389_v52  ;;  %v2383_v31 = vsel %vm1008_vm0, %v5369_v7, 0.0  ;;  %v5148_v52 = vld [vmem:[%s6184_s16 + $0x10] sm:$0xff]  }
0x1209   : > { %2384 = vadd.xlane.f32.xlu1 %v2383_v31 }
0x121a   : > { %2404 = vrot.lane.b32.xlu1 %v6334_v47, %s5815_s7  ;;  %v7385_v47 = vpack.i.bf16 %v6621_v43, %v6617_v21 }
0x121b   : > { %2402 = vrot.lane.b32.xlu0 %v6336_v49, %s5815_s7 }
0x121e   : > { %5055 = vrot.lane.b32.xlu1 %v5054_v59, %s5815_s7 }
0x121f   : > { %5065 = vrot.lane.b32.xlu0 %v5064_v1, %s5814_s9 }
0x1222   : > { %5060 = vrot.lane.b32.xlu1 %v5059_v58, %s5815_s7 }
0x1223   : > { %5075 = vrot.lane.b32.xlu0 %v5074_v44, %s5813_s14 }
0x1226   : > { %5070 = vrot.lane.b32.xlu1 %v5069_v60, %s5814_s9 }
0x1227   : > { %5085 = vrot.lane.b32.xlu0 %v5084_v3, %s5815_s7 }
0x122a   : > { %5080 = vrot.lane.b32.xlu1 %v5079_v40, %s5813_s14 }
0x122b   : > { %5095 = vrot.lane.b32.xlu0 %v5094_v28, %s5814_s9 }
0x122e   : > { %5090 = vrot.lane.b32.xlu1 %v7385_v47, %s5815_s7 }
0x1232   : > { %5100 = vrot.lane.b32.xlu1 %v5099_v51, %s5814_s9 }
0x128e   : > { %v2388_v49 = vpop.xlane.xlu0 %2387 }
0x1292   : > { %v2391_v53 = vpop.xlane.xlu1 %2390  ;;  %v2382_v56 = vpop.xlane.xlu0 %2381 }
0x1293   : > { %5370 = vrcp.f32 %v2391_v53 }
0x1294   : > { %5372 = vrcp.f32 %v2382_v56 }
0x1295   : > { %5374 = vrcp.f32 %v2388_v49 }
0x1296   : > { %v2385_v57 = vpop.xlane.xlu1 %2384  ;;  %v2403_v58 = vpop.permute.xlu0 %2402 }
0x1297   : > { %5376 = vrcp.f32 %v2385_v57  ;;  %4884 = vmatprep.subr.bf16.mxu0 %v2403_v58 }
0x1298   : > { %4885 = vmatpush3.bf16.msra.mxu0 %v2403_v58  ;;  %v5149_v58 = vld [vmem:[%s6184_s16 + $0x18] sm:$0xff]  }
0x129a   : > { %v2405_v59 = vpop.permute.xlu1 %2404  ;;  %v5066_v23 = vpop.permute.xlu0 %5065 }
0x129b   : > { %4886 = vmatprep.subr.bf16.mxu0 %v2405_v59  ;;  %v5068_v40 = vunpack.i.h.bf16 %v5066_v23  ;;  %v5067_v20 = vunpack.i.l.bf16 %v5066_v23 }
0x129c   : > { %4887 = vmatpush3.bf16.msra.mxu0 %v2405_v59 }
0x129d   : > { %v5371_v19 = vpop.eup %5370  ;;  %4892 = vmatprep.subr.bf16.mxu0 %v5146_v46 }
0x129e   : > { %v5056_v42 = vpop.permute.xlu1 %5055  ;;  %v5076_v60 = vpop.permute.xlu0 %5075  ;;  %v2399_v35 = vmul.f32 %v5371_v19, %v5367_v36 }
0x129f   : > { %v5373_v63 = vpop.eup %5372  ;;  %v5058_v1 = vunpack.i.h.bf16 %v5056_v42  ;;  %v5057_v30 = vunpack.i.l.bf16 %v5056_v42  ;;  %v5078_v43 = vunpack.i.h.bf16 %v5076_v60  ;;  %v5077_v62 = vunpack.i.l.bf16 %v5076_v60 }
0x12a0   : > { %v5375_v33 = vpop.eup %5374  ;;  %v2396_v28 = vmul.f32 %v5373_v63, %v5365_v54 }
0x12a1   : > { %v5377_v44 = vpop.eup %5376  ;;  %v1754_v21 = vsel %vm1008_vm0, %v6403_v26, %v5058_v1  ;;  %v1753_v50 = vsel %vm1008_vm0, %v6399_v18, %v5057_v30  ;;  %v2398_v14 = vmul.f32 %v5375_v33, %v6670_v29 }
0x12a2   : > { %v5061_v3 = vpop.permute.xlu1 %5060  ;;  %v5086_v51 = vpop.permute.xlu0 %5085  ;;  %v2397_v39 = vmul.f32 %v5377_v44, %v5369_v7  ;;  %v1758_v10 = vsel %vm1757_vm5, %v1753_v50, %v5067_v20  ;;  %v1759_v11 = vsel %vm1757_vm5, %v1754_v21, %v5068_v40  ;;  %v5152_v40 = vld [vmem:[%s6184_s16 + $0x30] sm:$0xff]   ;;  %v5153_v20 = vld [vmem:[%s6184_s16 + $0x38] sm:$0xff]  }
0x12a3   : > { %v5088_v48 = vunpack.i.h.bf16 %v5086_v51  ;;  %v5087_v61 = vunpack.i.l.bf16 %v5086_v51  ;;  %v1763_v26 = vsel %vm1762_vm6, %v1758_v10, %v5077_v62  ;;  %v1764_v18 = vsel %vm1762_vm6, %v1759_v11, %v5078_v43 }
0x12a4   : > { %v2400_v8 = vpack.c.bf16 %v2397_v39, %v2396_v28  ;;  %v2401_v13 = vpack.c.bf16 %v2399_v35, %v2398_v14  ;;  %v2523_v37 = vpack.c.bf16 %v1764_v18, %v1763_v26  ;;  %v5063_v38 = vunpack.i.h.bf16 %v5061_v3  ;;  %v5151_v35 = vld [vmem:[%s6184_s16 + $0x28] sm:$0xff]   ;;  %v5460_v18 = vld [vmem:[#allocation2 + $0x8] sm:$0xff] }
0x12a5   : > { %v5062_v9 = vunpack.i.l.bf16 %v5061_v3  ;;  %v2512_v4 = vsel %vm1008_vm0, %v6583_v27, %v5088_v48  ;;  %v2511_v29 = vsel %vm1008_vm0, %v6579_v16, %v5087_v61  ;;  %v2545_v62 = vsub.s32 2, %v6265_v5  ;;  %v6762_v3 = vld [vmem:[%s6176_s25] sm:$0xff] }
0x12a6   : > { %v5071_v32 = vpop.permute.xlu1 %5070  ;;  %4888 = vmatprep.mubr.msk.bf16.mxu0 %vm1008_vm0, %v2400_v8  ;;  %v5096_v2 = vpop.permute.xlu0 %5095  ;;  %v1756_v27 = vsel %vm1008_vm0, %v6401_v22, %v5063_v38  ;;  %v5459_v61 = vld [vmem:[#allocation2] sm:$0xff] }
0x12a7   : > { %v5098_v34 = vunpack.i.h.bf16 %v5096_v2  ;;  %v5097_v45 = vunpack.i.l.bf16 %v5096_v2  ;;  %4889 = vmatmul.mubr.msk.bf16.vlgmr.msra.gmra.mrb[36].mxu0 %vm1008_vm0, %v2401_v13  ;;  %v5073_v41 = vunpack.i.h.bf16 %v5071_v32  ;;  %v5072_v54 = vunpack.i.l.bf16 %v5071_v32 }
0x12a8   : > { %4893 = vmatpush3.bf16.msra.mxu0 %v5146_v46  ;;  %4908 = vmatprep.mubr.bf16.mxu0 %v2523_v37  ;;  %v1755_v16 = vsel %vm1008_vm0, %v6397_v17, %v5062_v9  ;;  %v5150_v17 = vld [vmem:[%s6184_s16 + $0x20] sm:$0xff]   ;;  %v2546_v51 = vrot.slane %v6762_v3, %v2545_v62  ;;  %v5462_v37 = vld [vmem:[#allocation2 + $0x18] sm:$0xff] }
0x12a9   : > { %v6733_v36 = vsel %vm1757_vm5, %v2511_v29, %v5097_v45  ;;  %v6736_v6 = vsel %vm1757_vm5, %v2512_v4, %v5098_v34  ;;  %4894 = vmatprep.subr.bf16.mxu0 %v5147_v0  ;;  %v1760_v49 = vsel %vm1757_vm5, %v1755_v16, %v5072_v54  ;;  %v1761_v53 = vsel %vm1757_vm5, %v1756_v27, %v5073_v41 }
0x12aa   : > { %v5081_v7 = vpop.permute.xlu1 %5080 }
0x12ab   : > { %v5083_v31 = vunpack.i.h.bf16 %v5081_v7  ;;  %v5082_v47 = vunpack.i.l.bf16 %v5081_v7 }
0x12ac   : > { %4895 = vmatpush3.bf16.msra.mxu0 %v5147_v0  ;;  %v5461_v0 = vld [vmem:[#allocation2 + $0x10] sm:$0xff] }
0x12ad   : > { %v1765_v56 = vsel %vm1762_vm6, %v1760_v49, %v5082_v47  ;;  %v1766_v57 = vsel %vm1762_vm6, %v1761_v53, %v5083_v31  ;;  %4896 = vmatprep.subr.bf16.mxu0 %v5148_v52 }
0x12ae   : > { %v2524_v46 = vpack.c.bf16 %v1766_v57, %v1765_v56  ;;  %v5091_v22 = vpop.permute.xlu1 %5090 }
0x12af   : > { %v5093_v59 = vunpack.i.h.bf16 %v5091_v22  ;;  %v5092_v23 = vunpack.i.l.bf16 %v5091_v22 }
0x12b0   : > { %4897 = vmatpush3.bf16.msra.mxu0 %v5148_v52 }
0x12b1   : > { %4898 = vmatprep.subr.bf16.mxu0 %v5149_v58  ;;  %v2514_v63 = vsel %vm1008_vm0, %v6581_v24, %v5093_v59  ;;  %v2513_v1 = vsel %vm1008_vm0, %v6577_v15, %v5092_v23 }
0x12b2   : > { %v5101_v19 = vpop.permute.xlu1 %5100 }
0x12b3   : > { %v5103_v42 = vunpack.i.h.bf16 %v5101_v19  ;;  %v5102_v60 = vunpack.i.l.bf16 %v5101_v19 }
0x12b4   : > { %4899 = vmatpush3.bf16.msra.mxu0 %v5149_v58 }
0x12b5   : > { %v2517_v30 = vsel %vm1757_vm5, %v2513_v1, %v5102_v60  ;;  %v2518_v33 = vsel %vm1757_vm5, %v2514_v63, %v5103_v42  ;;  %4900 = vmatprep.subr.bf16.mxu0 %v5150_v17  ;;  %v5464_v60 = vld [vmem:[#allocation2 + $0x28] sm:$0xff] }
0x12b8   : > { %4901 = vmatpush3.bf16.msra.mxu0 %v5150_v17 }
0x12b9   : > { %4902 = vmatprep.subr.bf16.mxu0 %v5151_v35 }
0x12bc   : > { %4903 = vmatpush3.bf16.msra.mxu0 %v5151_v35  ;;  %v5465_v35 = vld [vmem:[#allocation2 + $0x30] sm:$0xff] }
0x12bd   : > { %4904 = vmatprep.subr.bf16.mxu0 %v5152_v40 }
0x12c0   : > { %4905 = vmatpush3.bf16.msra.mxu0 %v5152_v40 }
0x12c1   : > { %4906 = vmatprep.subr.bf16.mxu0 %v5153_v20 }
0x12c4   : > { %4907 = vmatpush3.bf16.msra.mxu0 %v5153_v20 }
0x12c7   : > { %4909 = vmatmul.mubr.bf16.vlgmr.msra.gmra.mrb[40].mxu0 %v2524_v46 }
0x137a   : > { %v4890_v24 = vpop.f32.mrb[36].mxu0 }
0x137b   : > { %v2448_v15 = vpop.f32.mrb[37].mxu0 }
0x137c   : > { %v4891_v44 = vpop.f32.mrb[38].mxu0 }
0x137d   : > { %v5109_v21 = vpack.i.bf16 %v4891_v44, %v4890_v24  ;;  %v2451_v50 = vpop.f32.mrb[39].mxu0 }
0x137e   : > { %v5104_v43 = vpack.i.bf16 %v2451_v50, %v2448_v15  ;;  %v5466_v15 = vld [vmem:[#allocation2 + $0x38] sm:$0xff] }
0x137f   : > { %5110 = vrot.lane.b32.xlu1 %v5109_v21, %s5813_s14 }
0x1380   : > { %5105 = vrot.lane.b32.xlu0 %v5104_v43, %s5813_s14 }
0x139a   : > { %v4910_v28 = vpop.f32.mrb[40].mxu0 }
0x139b   : > { %v2629_v39 = vpop.f32.mrb[41].mxu0  ;;  %v2638_v48 = vadd.f32 %v4910_v28, %v2546_v51 }
0x139c   : > { %v2630_v10 = vadd.f32 %v2629_v39, %v2546_v51  ;;  %v4911_v11 = vpop.f32.mrb[42].mxu0 }
0x139d   : > { %v2632_v14 = vpop.f32.mrb[43].mxu0  ;;  %v6772_v32 = vadd.f32 %v5461_v0, %v2638_v48  ;;  %v2641_v2 = vadd.f32 %v4911_v11, %v2546_v51  ;;  %v5159_v11 = vld [vmem:[%s6190_s18 + $0xc] ss:$16 sps:$4 sm:$0xff]   ;;  %v5157_v48 = vld [vmem:[%s6190_s18 + $0x8] ss:$16 sps:$4 sm:$0xff]  }
0x139e   : > { %v6767_v8 = vadd.f32 %v5459_v61, %v2630_v10  ;;  %v2633_v26 = vadd.f32 %v2632_v14, %v2546_v51  ;;  %v5156_v10 = vld [vmem:[%s6190_s18 + $0x4] ss:$16 sps:$4 sm:$0xff]   ;;  %v5154_v14 = vld [vmem:[%s6190_s18] ss:$16 sps:$4 sm:$0xff]   ;;  %3071 = vmatprep.subr.bf16.mxu0 %v5159_v11  ;;  %v5163_v0 = vld [vmem:[%s6190_s18 + $0x28] ss:$16 sps:$4 sm:$0xff]  }
0x139f   : > { %v6776_v38 = vadd.f32 %v5462_v37, %v2641_v2  ;;  %2998 = vmatprep.subr.bf16.mxu1 %v5156_v10  ;;  %3072 = vmatpush1.bf16.msra.mxu0 %v5157_v48  ;;  %v5162_v61 = vld [vmem:[%s6190_s18 + $0x24] ss:$16 sps:$4 sm:$0xff]   ;;  %v5171_v37 = vld [vmem:[%s6190_s18 + $0x4c] ss:$16 sps:$4 sm:$0xff]  }
0x13a0   : > { %2668 = vadd.xlane.f32.xlu0 %v6767_v8  ;;  %v6770_v13 = vadd.f32 %v5460_v18, %v2633_v26  ;;  %2999 = vmatpush1.bf16.msra.mxu1 %v5154_v14  ;;  %v5165_v26 = vld [vmem:[%s6190_s18 + $0x2c] ss:$16 sps:$4 sm:$0xff]   ;;  %v5160_v18 = vld [vmem:[%s6190_s18 + $0x20] ss:$16 sps:$4 sm:$0xff]   ;;  %v5168_v2 = vld [vmem:[%s6190_s18 + $0x44] ss:$16 sps:$4 sm:$0xff]  }
0x13a1   : > { %3000 = vmatprep.subr.bf16.mxu1 %v5162_v61  ;;  %3073 = vmatprep.subr.bf16.mxu0 %v5165_v26 }
0x13a3   : > { %2670 = vadd.xlane.f32.xlu1 %v6770_v13  ;;  %3074 = vmatpush1.bf16.msra.mxu0 %v5163_v0 }
0x13a4   : > { %2672 = vadd.xlane.f32.xlu0 %v6772_v32  ;;  %3001 = vmatpush1.bf16.msra.mxu1 %v5160_v18 }
0x13a5   : > { %3002 = vmatprep.subr.bf16.mxu1 %v5168_v2  ;;  %3075 = vmatprep.subr.bf16.mxu0 %v5171_v37 }
0x13a8   : > { %2674 = vadd.xlane.f32.xlu0 %v6776_v38 }
0x13f1   : > { %v5111_v9 = vpop.permute.xlu1 %5110 }
0x13f2   : > { %v5113_v34 = vunpack.i.h.bf16 %v5111_v9  ;;  %v5112_v45 = vunpack.i.l.bf16 %v5111_v9  ;;  %v5106_v4 = vpop.permute.xlu0 %5105  ;;  %v5166_v9 = vld [vmem:[%s6190_s18 + $0x40] ss:$16 sps:$4 sm:$0xff]  }
0x13f3   : > { %v5108_v29 = vunpack.i.h.bf16 %v5106_v4  ;;  %v5107_v41 = vunpack.i.l.bf16 %v5106_v4  ;;  %3003 = vmatpush1.bf16.msra.mxu1 %v5166_v9  ;;  %v5177_v4 = vld [vmem:[%s6190_s18 + $0x6c] ss:$16 sps:$4 sm:$0xff]  }
0x13f4   : > { %v2521_v54 = vsel %vm1762_vm6, %v2517_v30, %v5112_v45  ;;  %v2522_v52 = vsel %vm1762_vm6, %v2518_v33, %v5113_v34  ;;  %v5169_v34 = vld [vmem:[%s6190_s18 + $0x48] ss:$16 sps:$4 sm:$0xff]   ;;  %v5174_v45 = vld [vmem:[%s6190_s18 + $0x64] ss:$16 sps:$4 sm:$0xff]  }
0x13f5   : > { %v2519_v7 = vsel %vm1762_vm6, %v6733_v36, %v5107_v41  ;;  %v2520_v27 = vsel %vm1762_vm6, %v6736_v6, %v5108_v29  ;;  %v2526_v16 = vpack.c.bf16 %v2522_v52, %v2521_v54  ;;  %v5463_v36 = vld [vmem:[#allocation2 + $0x20] sm:$0xff]  ;;  %3076 = vmatpush1.bf16.msra.mxu0 %v5169_v34  ;;  %v5175_v41 = vld [vmem:[%s6190_s18 + $0x68] ss:$16 sps:$4 sm:$0xff]   ;;  %3004 = vmatprep.subr.bf16.mxu1 %v5174_v45  ;;  %v5183_v52 = vld [vmem:[%s6190_s18 + $0x8c] ss:$16 sps:$4 sm:$0xff]  }
0x13f6   : > { %v2525_v31 = vpack.c.bf16 %v2520_v27, %v2519_v7  ;;  %v5172_v29 = vld [vmem:[%s6190_s18 + $0x60] ss:$16 sps:$4 sm:$0xff]   ;;  %3077 = vmatprep.subr.bf16.mxu0 %v5177_v4  ;;  %v5180_v54 = vld [vmem:[%s6190_s18 + $0x84] ss:$16 sps:$4 sm:$0xff]   ;;  %v5181_v27 = vld [vmem:[%s6190_s18 + $0x88] ss:$16 sps:$4 sm:$0xff]  }
0x13f7   : > { %3005 = vmatpush1.bf16.msra.mxu1 %v5172_v29  ;;  %v5178_v7 = vld [vmem:[%s6190_s18 + $0x80] ss:$16 sps:$4 sm:$0xff]   ;;  %v2758_v29 = vsub.s32 3, %v6265_v5 }
0x13f8   : > { %4912 = vmatprep.mubr.bf16.mxu0 %v2525_v31  ;;  %3006 = vmatprep.subr.bf16.mxu1 %v5180_v54  ;;  %v5189_v31 = vld [vmem:[%s6190_s18 + $0xac] ss:$16 sps:$4 sm:$0xff]   ;;  %v2770_v54 = vsub.s32 4, %v6265_v5 }
0x13f9   : > { %4913 = vmatmul.mubr.bf16.gmra.mrb[44].mxu0 %v2526_v16  ;;  %v5186_v16 = vld [vmem:[%s6190_s18 + $0xa4] ss:$16 sps:$4 sm:$0xff]  }
0x13fa   : > { %3103 = vmatprep.mubr.bf16.mxu0 %v5811_v55  ;;  %3078 = vmatpush1.bf16.msra.mxu0 %v5175_v41  ;;  %v6874_v41 = vrot.slane %v6762_v3, %v2758_v29 }
0x13fb   : > { %3079 = vmatprep.subr.bf16.mxu0 %v5183_v52  ;;  %3007 = vmatpush1.bf16.msra.mxu1 %v5178_v7 }
0x13fc   : > { %3008 = vmatprep.subr.bf16.mxu1 %v5186_v16 }
0x13fe   : > { %3080 = vmatpush1.bf16.msra.mxu0 %v5181_v27 }
0x13ff   : > { %3081 = vmatprep.subr.bf16.mxu0 %v5189_v31 }
0x142d   : > { %v2669_v47 = vpop.xlane.xlu0 %2668 }
0x142e   : > { %v2684_v59 = vmul.f32 0.0078125, %v2669_v47  ;;  %v5184_v47 = vld [vmem:[%s6190_s18 + $0xa0] ss:$16 sps:$4 sm:$0xff]  }
0x142f   : > { %3009 = vmatpush1.bf16.msra.mxu1 %v5184_v47  ;;  %v6881_v47 = vrot.slane %v6762_v3, %v2770_v54  ;;  %v5227_v54 = vld [vmem:[%s6192_s23 + $0xf0] sm:$0xff]  }
0x1430   : > { %v2671_v46 = vpop.xlane.xlu1 %2670  ;;  %v6792_v30 = vsub.f32 %v6767_v8, %v2684_v59  ;;  %v5196_v59 = vld [vmem:[%s6190_s18 + $0xe0] ss:$16 sps:$4 sm:$0xff]  }
0x1431   : > { %v2673_v53 = vpop.xlane.xlu0 %2672  ;;  %v2685_v19 = vmul.f32 0.0078125, %v2671_v46  ;;  %v5198_v46 = vld [vmem:[%s6190_s18 + $0xe4] ss:$16 sps:$4 sm:$0xff]  }
0x1432   : > { %v2686_v33 = vmul.f32 0.0078125, %v2673_v53  ;;  %v2700_v50 = vmul.f32 %v6792_v30, %v6792_v30  ;;  %v5190_v53 = vld [vmem:[%s6190_s18 + $0xc0] ss:$16 sps:$4 sm:$0xff]  }
0x1433   : > { %v6798_v20 = vsub.f32 %v6770_v13, %v2685_v19 }
0x1434   : > { %v6804_v21 = vsub.f32 %v6772_v32, %v2686_v33 }
0x1435   : > { %v2675_v1 = vpop.xlane.xlu0 %2674 }
0x1436   : > { %v2687_v24 = vmul.f32 0.0078125, %v2675_v1  ;;  %v2702_v28 = vmul.f32 %v6804_v21, %v6804_v21 }
0x1438   : > { %v6810_v43 = vsub.f32 %v6776_v38, %v2687_v24 }
0x143a   : > { %v2703_v39 = vmul.f32 %v6810_v43, %v6810_v43 }
0x14cc   : > { %v4914_v49 = vpop.f32.mrb[44].mxu0 }
0x14cd   : > { %v2645_v56 = vpop.f32.mrb[45].mxu0  ;;  %v2654_v23 = vadd.f32 %v4914_v49, %v2546_v51  ;;  %v5187_v49 = vld [vmem:[%s6190_s18 + $0xa8] ss:$16 sps:$4 sm:$0xff]  }
0x14ce   : > { %v2646_v57 = vadd.f32 %v2645_v56, %v2546_v51  ;;  %v4915_v58 = vpop.f32.mrb[46].mxu0  ;;  %3082 = vmatpush1.bf16.msra.mxu0 %v5187_v49  ;;  %v5192_v56 = vld [vmem:[%s6190_s18 + $0xc4] ss:$16 sps:$4 sm:$0xff]  }
0x14cf   : > { %v2648_v22 = vpop.f32.mrb[47].mxu0  ;;  %v2657_v42 = vadd.f32 %v4915_v58, %v2546_v51  ;;  %v6794_v40 = vadd.f32 %v5465_v35, %v2654_v23  ;;  %v5195_v58 = vld [vmem:[%s6190_s18 + $0xcc] ss:$16 sps:$4 sm:$0xff]   ;;  %3010 = vmatprep.subr.bf16.mxu1 %v5192_v56  ;;  %v5199_v23 = vld [vmem:[%s6190_s18 + $0xe8] ss:$16 sps:$4 sm:$0xff]  }
0x14d0   : > { %v6786_v17 = vadd.f32 %v5463_v36, %v2646_v57  ;;  %v2649_v6 = vadd.f32 %v2648_v22, %v2546_v51  ;;  %v2701_v51 = vmul.f32 %v6798_v20, %v6798_v20  ;;  %v5193_v57 = vld [vmem:[%s6190_s18 + $0xc8] ss:$16 sps:$4 sm:$0xff]   ;;  %v5201_v22 = vld [vmem:[%s6190_s18 + $0xec] ss:$16 sps:$4 sm:$0xff]   ;;  %3083 = vmatprep.subr.bf16.mxu0 %v5195_v58  ;;  %3011 = vmatpush1.bf16.msra.mxu1 %v5190_v53 }
0x14d1   : > { %v6800_v44 = vadd.f32 %v5466_v15, %v2657_v42  ;;  %3012 = vmatprep.subr.bf16.mxu1 %v5198_v46 }
0x14d2   : > { %v6788_v63 = vadd.f32 %v5464_v60, %v2649_v6  ;;  %2676 = vadd.xlane.f32.xlu0 %v6786_v17  ;;  %3084 = vmatpush1.bf16.msra.mxu0 %v5193_v57 }
0x14d3   : > { %3085 = vmatprep.subr.bf16.mxu0 %v5201_v22 }
0x14d4   : > { %2678 = vadd.xlane.f32.xlu1 %v6788_v63  ;;  %3013 = vmatpush1.bf16.msra.mxu1 %v5196_v59 }
0x14d6   : > { %2680 = vadd.xlane.f32.xlu0 %v6794_v40  ;;  %3086 = vmatpush1.bf16.msra.mxu0 %v5199_v23  ;;  %v5202_v23 = vld [vmem:[%s6192_s23 + $0x40] sm:$0xff]  }
0x14d7   : > { %4660 = vmatprep.subr.bf16.mxu1 %v5202_v23 }
0x14d8   : > { %2682 = vadd.xlane.f32.xlu1 %v6800_v44 }
0x14da   : > { %2708 = vadd.xlane.f32.xlu0 %v2700_v50 }
0x14dc   : > { %2710 = vadd.xlane.f32.xlu1 %v2701_v51 }
0x14de   : > { %2712 = vadd.xlane.f32.xlu0 %v2702_v28 }
0x14e0   : > { %2714 = vadd.xlane.f32.xlu1 %v2703_v39 }
0x155f   : > { %v2677_v36 = vpop.xlane.xlu0 %2676 }
0x1560   : > { %v2688_v6 = vmul.f32 0.0078125, %v2677_v36  ;;  %v5203_v36 = vld [vmem:[%s6192_s23 + $0xc0] sm:$0xff]  }
0x1561   : > { %v2679_v19 = vpop.xlane.xlu1 %2678  ;;  %4700 = vmatprep.subr.bf16.mxu0 %v5203_v36 }
0x1562   : > { %v6851_v42 = vsub.f32 %v6786_v17, %v2688_v6  ;;  %v2689_v60 = vmul.f32 0.0078125, %v2679_v19  ;;  %v5204_v6 = vld [vmem:[%s6192_s23] sm:$0xff]  }
0x1563   : > { %v2681_v1 = vpop.xlane.xlu0 %2680  ;;  %v5205_v19 = vld [vmem:[%s6192_s23 + $0x80] sm:$0xff]  }
0x1564   : > { %v6854_v33 = vsub.f32 %v6788_v63, %v2689_v60  ;;  %v2690_v35 = vmul.f32 0.0078125, %v2681_v1  ;;  %v2704_v24 = vmul.f32 %v6851_v42, %v6851_v42  ;;  %v5206_v60 = vld [vmem:[%s6192_s23 + $0x48] sm:$0xff]  }
0x1565   : > { %v2683_v15 = vpop.xlane.xlu1 %2682  ;;  %v5207_v1 = vld [vmem:[%s6192_s23 + $0xc8] sm:$0xff]  }
0x1566   : > { %v6859_v50 = vsub.f32 %v6794_v40, %v2690_v35  ;;  %v2691_v51 = vmul.f32 0.0078125, %v2683_v15  ;;  %2716 = vadd.xlane.f32.xlu0 %v2704_v24  ;;  %v2705_v28 = vmul.f32 %v6854_v33, %v6854_v33  ;;  %v5208_v35 = vld [vmem:[%s6192_s23 + $0x8] sm:$0xff]   ;;  %v5210_v15 = vld [vmem:[%s6192_s23 + $0x50] sm:$0xff]  }
0x1567   : > { %v2709_v39 = vpop.xlane.xlu0 %2708  ;;  %v5209_v24 = vld [vmem:[%s6192_s23 + $0x88] sm:$0xff]  }
0x1568   : > { %v6864_v10 = vsub.f32 %v6800_v44, %v2691_v51  ;;  %v2724_v11 = vmul.f32 0.0078125, %v2709_v39  ;;  %2718 = vadd.xlane.f32.xlu1 %v2705_v28  ;;  %v2706_v14 = vmul.f32 %v6859_v50, %v6859_v50  ;;  %v5211_v51 = vld [vmem:[%s6192_s23 + $0xd0] sm:$0xff]  }
0x1569   : > { %v2711_v48 = vpop.xlane.xlu1 %2710  ;;  %v5212_v28 = vld [vmem:[%s6192_s23 + $0x10] sm:$0xff]  }
0x156a   : > { %v2732_v61 = vadd.f32 1e-05, %v2724_v11  ;;  %v2725_v26 = vmul.f32 0.0078125, %v2711_v48  ;;  %2720 = vadd.xlane.f32.xlu0 %v2706_v14  ;;  %v2707_v18 = vmul.f32 %v6864_v10, %v6864_v10  ;;  %v5213_v39 = vld [vmem:[%s6192_s23 + $0x90] sm:$0xff]   ;;  %v5214_v11 = vld [vmem:[%s6192_s23 + $0x58] sm:$0xff]  }
0x156b   : > { %v2713_v0 = vpop.xlane.xlu0 %2712  ;;  %v5215_v14 = vld [vmem:[%s6192_s23 + $0xd8] sm:$0xff]  }
0x156c   : > { %5378 = vrsqrt.f32 %v2732_v61  ;;  %v2733_v2 = vadd.f32 1e-05, %v2725_v26  ;;  %v2726_v37 = vmul.f32 0.0078125, %v2713_v0  ;;  %2722 = vadd.xlane.f32.xlu1 %v2707_v18  ;;  %v5216_v48 = vld [vmem:[%s6192_s23 + $0x18] sm:$0xff]   ;;  %v5218_v26 = vld [vmem:[%s6192_s23 + $0x60] sm:$0xff]  }
0x156d   : > { %v2715_v9 = vpop.xlane.xlu1 %2714  ;;  %v5217_v61 = vld [vmem:[%s6192_s23 + $0x98] sm:$0xff]   ;;  %v5219_v18 = vld [vmem:[%s6192_s23 + $0xe0] sm:$0xff]  }
0x156e   : > { %5380 = vrsqrt.f32 %v2733_v2  ;;  %v2734_v34 = vadd.f32 1e-05, %v2726_v37  ;;  %v2727_v45 = vmul.f32 0.0078125, %v2715_v9  ;;  %v5220_v0 = vld [vmem:[%s6192_s23 + $0x20] sm:$0xff]   ;;  %v5222_v37 = vld [vmem:[%s6192_s23 + $0x68] sm:$0xff]  }
0x156f   : > { %v5221_v2 = vld [vmem:[%s6192_s23 + $0xa0] sm:$0xff]   ;;  %v5223_v9 = vld [vmem:[%s6192_s23 + $0xe8] sm:$0xff]  }
0x1570   : > { %5382 = vrsqrt.f32 %v2734_v34  ;;  %v2735_v4 = vadd.f32 1e-05, %v2727_v45  ;;  %v5224_v34 = vld [vmem:[%s6192_s23 + $0x28] sm:$0xff]  }
0x1571   : > { %v5225_v45 = vld [vmem:[%s6192_s23 + $0xa8] sm:$0xff]  }
0x1572   : > { %5384 = vrsqrt.f32 %v2735_v4  ;;  %v5226_v4 = vld [vmem:[%s6192_s23 + $0x70] sm:$0xff]  }
0x1576   : > { %v5379_v52 = vpop.eup %5378 }
0x1577   : > { %v2748_v7 = vmul.f32 %v5379_v52, %v6792_v30  ;;  %v5228_v52 = vld [vmem:[%s6192_s23 + $0x30] sm:$0xff]  }
0x1578   : > { %v5381_v27 = vpop.eup %5380 }
0x1579   : > { %v2749_v16 = vmul.f32 %v5381_v27, %v6798_v20  ;;  %v2760_v31 = vmul.f32 %v6874_v41, %v2748_v7  ;;  %v5229_v7 = vld [vmem:[%s6192_s23 + $0xb0] sm:$0xff]   ;;  %v5230_v27 = vld [vmem:[%s6192_s23 + $0x78] sm:$0xff]  }
0x157a   : > { %v5383_v49 = vpop.eup %5382 }
0x157b   : > { %v2761_v53 = vmul.f32 %v6874_v41, %v2749_v16  ;;  %v2772_v57 = vadd.f32 %v6881_v47, %v2760_v31  ;;  %v2750_v46 = vmul.f32 %v5383_v49, %v6804_v21  ;;  %v5231_v16 = vld [vmem:[%s6192_s23 + $0xf8] sm:$0xff]  }
0x157c   : > { %v5385_v56 = vpop.eup %5384 }
0x157d   : > { %v2773_v58 = vadd.f32 %v6881_v47, %v2761_v53  ;;  %v2751_v30 = vmul.f32 %v5385_v56, %v6810_v43  ;;  %v2762_v3 = vmul.f32 %v6874_v41, %v2750_v46  ;;  %v5232_v56 = vld [vmem:[%s6192_s23 + $0x38] sm:$0xff]  }
0x157f   : > { %v2780_v20 = vpack.c.bf16 %v2773_v58, %v2772_v57  ;;  %v2763_v22 = vmul.f32 %v6874_v41, %v2751_v30  ;;  %v2774_v43 = vadd.f32 %v6881_v47, %v2762_v3  ;;  %v5233_v57 = vld [vmem:[%s6192_s23 + $0xb8] sm:$0xff]  }
0x1581   : > { %3031 = vmatmul.mubr.bf16.vlgmr.msra.gmra.mrb[48].mxu1 %v2780_v20  ;;  %3104 = vmatmul.mubr.bf16.vlgmr.msra.gmra.mrb[48].mxu0 %v2780_v20  ;;  %v2775_v21 = vadd.f32 %v6881_v47, %v2763_v22 }
0x1582   : > { %3040 = vmatprep.mubr.bf16.mxu1 %v5811_v55  ;;  %3113 = vmatprep.mubr.bf16.mxu0 %v5811_v55 }
0x1583   : > { %v2781_v59 = vpack.c.bf16 %v2775_v21, %v2774_v43  ;;  %4661 = vmatpush3.bf16.msra.mxu1 %v5204_v6  ;;  %4701 = vmatpush3.bf16.msra.mxu0 %v5205_v19 }
0x1584   : > { %4662 = vmatprep.subr.bf16.mxu1 %v5206_v60  ;;  %4702 = vmatprep.subr.bf16.mxu0 %v5207_v1 }
0x1587   : > { %4663 = vmatpush3.bf16.msra.mxu1 %v5208_v35  ;;  %4703 = vmatpush3.bf16.msra.mxu0 %v5209_v24 }
0x1588   : > { %4664 = vmatprep.subr.bf16.mxu1 %v5210_v15  ;;  %4704 = vmatprep.subr.bf16.mxu0 %v5211_v51 }
0x1589   : > { %3041 = vmatmul.mubr.bf16.gmra.mrb[52].mxu1 %v2781_v59  ;;  %3114 = vmatmul.mubr.bf16.gmra.mrb[52].mxu0 %v2781_v59 }
0x158a   : > { %3050 = vmatprep.mubr.bf16.mxu1 %v5811_v55  ;;  %3123 = vmatprep.mubr.bf16.mxu0 %v5811_v55 }
0x158b   : > { %4665 = vmatpush3.bf16.msra.mxu1 %v5212_v28  ;;  %4705 = vmatpush3.bf16.msra.mxu0 %v5213_v39 }
0x158c   : > { %4666 = vmatprep.subr.bf16.mxu1 %v5214_v11  ;;  %4706 = vmatprep.subr.bf16.mxu0 %v5215_v14 }
0x158f   : > { %4667 = vmatpush3.bf16.msra.mxu1 %v5216_v48  ;;  %4707 = vmatpush3.bf16.msra.mxu0 %v5217_v61 }
0x1590   : > { %4668 = vmatprep.subr.bf16.mxu1 %v5218_v26  ;;  %4708 = vmatprep.subr.bf16.mxu0 %v5219_v18 }
0x1593   : > { %4669 = vmatpush3.bf16.msra.mxu1 %v5220_v0  ;;  %4709 = vmatpush3.bf16.msra.mxu0 %v5221_v2 }
0x1594   : > { %4670 = vmatprep.subr.bf16.mxu1 %v5222_v37  ;;  %4710 = vmatprep.subr.bf16.mxu0 %v5223_v9 }
0x1597   : > { %4671 = vmatpush3.bf16.msra.mxu1 %v5224_v34  ;;  %4711 = vmatpush3.bf16.msra.mxu0 %v5225_v45 }
0x1598   : > { %4672 = vmatprep.subr.bf16.mxu1 %v5226_v4  ;;  %4712 = vmatprep.subr.bf16.mxu0 %v5227_v54 }
0x159b   : > { %4673 = vmatpush3.bf16.msra.mxu1 %v5228_v52  ;;  %4713 = vmatpush3.bf16.msra.mxu0 %v5229_v7 }
0x159c   : > { %4674 = vmatprep.subr.bf16.mxu1 %v5230_v27  ;;  %4714 = vmatprep.subr.bf16.mxu0 %v5231_v16 }
0x159f   : > { %4675 = vmatpush3.bf16.msra.mxu1 %v5232_v56  ;;  %4715 = vmatpush3.bf16.msra.mxu0 %v5233_v57 }
0x15f3   : > { %v2717_v31 = vpop.xlane.xlu0 %2716 }
0x15f4   : > { %v2728_v49 = vmul.f32 0.0078125, %v2717_v31 }
0x15f5   : > { %v2719_v53 = vpop.xlane.xlu1 %2718 }
0x15f6   : > { %v2736_v58 = vadd.f32 1e-05, %v2728_v49  ;;  %v2729_v46 = vmul.f32 0.0078125, %v2719_v53 }
0x15f7   : > { %v2721_v30 = vpop.xlane.xlu0 %2720 }
0x15f8   : > { %5386 = vrsqrt.f32 %v2736_v58  ;;  %v2737_v20 = vadd.f32 1e-05, %v2729_v46  ;;  %v2730_v22 = vmul.f32 0.0078125, %v2721_v30 }
0x15f9   : > { %v2723_v3 = vpop.xlane.xlu1 %2722 }
0x15fa   : > { %5388 = vrsqrt.f32 %v2737_v20  ;;  %v2738_v21 = vadd.f32 1e-05, %v2730_v22  ;;  %v2731_v43 = vmul.f32 0.0078125, %v2723_v3 }
0x15fc   : > { %5390 = vrsqrt.f32 %v2738_v21  ;;  %v2739_v59 = vadd.f32 1e-05, %v2731_v43 }
0x15fe   : > { %5392 = vrsqrt.f32 %v2739_v59 }
0x1602   : > { %v5387_v23 = vpop.eup %5386 }
0x1603   : > { %v2752_v36 = vmul.f32 %v5387_v23, %v6851_v42 }
0x1604   : > { %v5389_v6 = vpop.eup %5388 }
0x1605   : > { %v2753_v19 = vmul.f32 %v5389_v6, %v6854_v33  ;;  %v2764_v60 = vmul.f32 %v6874_v41, %v2752_v36 }
0x1606   : > { %v5391_v1 = vpop.eup %5390 }
0x1607   : > { %v2765_v35 = vmul.f32 %v6874_v41, %v2753_v19  ;;  %v2776_v15 = vadd.f32 %v6881_v47, %v2764_v60  ;;  %v2754_v28 = vmul.f32 %v5391_v1, %v6859_v50  ;;  %v2816_v50 = vld [vmem:[%s6207_s26] sm:$0xf] }
0x1608   : > { %v5393_v24 = vpop.eup %5392  ;;  %v6948_v26 = vrot.slane %v2816_v50, %v2545_v62  ;;  %v6951_v0 = vrot.slane %v2816_v50, %v6283_v25  ;;  %v6957_v9 = vrot.slane %v2816_v50, %v2758_v29 }
0x1609   : > { %v2777_v51 = vadd.f32 %v6881_v47, %v2765_v35  ;;  %v2755_v39 = vmul.f32 %v5393_v24, %v6864_v10  ;;  %v2766_v33 = vmul.f32 %v6874_v41, %v2754_v28  ;;  %v6944_v10 = vrot.slane %v2816_v50, %v6271_v12 }
0x160b   : > { %v2782_v11 = vpack.c.bf16 %v2777_v51, %v2776_v15  ;;  %v2767_v42 = vmul.f32 %v6874_v41, %v2755_v39  ;;  %v2778_v48 = vadd.f32 %v6881_v47, %v2766_v33 }
0x160d   : > { %3051 = vmatmul.mubr.bf16.gmra.mrb[56].mxu1 %v2782_v11  ;;  %3124 = vmatmul.mubr.bf16.gmra.mrb[56].mxu0 %v2782_v11  ;;  %v2779_v14 = vadd.f32 %v6881_v47, %v2767_v42 }
0x160e   : > { %3060 = vmatprep.mubr.bf16.mxu1 %v5811_v55  ;;  %3133 = vmatprep.mubr.bf16.mxu0 %v5811_v55 }
0x160f   : > { %v2783_v61 = vpack.c.bf16 %v2779_v14, %v2778_v48 }
0x1615   : > { %3061 = vmatmul.mubr.bf16.gmra.mrb[60].mxu1 %v2783_v61  ;;  %3134 = vmatmul.mubr.bf16.gmra.mrb[60].mxu0 %v2783_v61 }
0x1654   : > { %v3032_v41 = vpop.f32.mrb[48].mxu1  ;;  %v3105_v18 = vpop.f32.mrb[48].mxu0 }
0x1655   : > { %v3033_v55 = vadd.f32 %v3032_v41, %v6944_v10  ;;  %v3106_v47 = vadd.f32 %v3105_v18, %v6948_v26  ;;  %v3034_v2 = vpop.f32.mrb[49].mxu1  ;;  %v3107_v37 = vpop.f32.mrb[49].mxu0 }
0x1656   : > { %v3036_v34 = vpop.f32.mrb[50].mxu1  ;;  %v3109_v45 = vpop.f32.mrb[50].mxu0  ;;  %v6960_v54 = vadd.f32 %v3034_v2, %v6951_v0  ;;  %v6970_v29 = vadd.f32 %v3107_v37, %v6957_v9 }
0x1657   : > { %v3176_v4 = vmul.f32 0.044715, %v3033_v55  ;;  %v3178_v62 = vmul.f32 0.044715, %v3106_v47  ;;  %v3037_v52 = vadd.f32 %v3036_v34, %v6944_v10  ;;  %v6964_v7 = vadd.f32 %v3109_v45, %v6948_v26  ;;  %v3038_v27 = vpop.f32.mrb[51].mxu1  ;;  %v3111_v16 = vpop.f32.mrb[51].mxu0 }
0x1658   : > { %v6967_v53 = vadd.f32 %v3038_v27, %v6951_v0  ;;  %v6973_v57 = vadd.f32 %v3111_v16, %v6957_v9  ;;  %v6975_v58 = vmul.f32 0.5, %v3033_v55  ;;  %v3177_v22 = vmul.f32 0.044715, %v6960_v54 }
0x1659   : > { %v3208_v31 = vmul.f32 %v3176_v4, %v3033_v55  ;;  %v3210_v49 = vmul.f32 %v3178_v62, %v3106_v47  ;;  %v3180_v56 = vmul.f32 0.044715, %v3037_v52  ;;  %v3182_v20 = vmul.f32 0.044715, %v6964_v7 }
0x165a   : > { %v3181_v21 = vmul.f32 0.044715, %v6967_v53  ;;  %v6980_v36 = vmul.f32 0.5, %v3106_v47  ;;  %v3179_v35 = vmul.f32 0.044715, %v6970_v29  ;;  %v3209_v61 = vmul.f32 %v3177_v22, %v6960_v54 }
0x165b   : > { %v3240_v46 = vmul.f32 %v3208_v31, %v3033_v55  ;;  %v3242_v30 = vmul.f32 %v3210_v49, %v3106_v47  ;;  %v3212_v3 = vmul.f32 %v3180_v56, %v3037_v52  ;;  %v3214_v19 = vmul.f32 %v3182_v20, %v6964_v7 }
0x165c   : > { %v3042_v43 = vpop.f32.mrb[52].mxu1  ;;  %v3115_v59 = vpop.f32.mrb[52].mxu0  ;;  %v3183_v15 = vmul.f32 0.044715, %v6973_v57  ;;  %v3213_v41 = vmul.f32 %v3181_v21, %v6967_v53  ;;  %v3211_v37 = vmul.f32 %v3179_v35, %v6970_v29  ;;  %v3241_v31 = vmul.f32 %v3209_v61, %v6960_v54 }
0x165d   : > { %v3272_v23 = vadd.f32 %v3240_v46, %v3033_v55  ;;  %v3274_v6 = vadd.f32 %v3242_v30, %v3106_v47  ;;  %v3044_v60 = vpop.f32.mrb[53].mxu1  ;;  %v3117_v1 = vpop.f32.mrb[53].mxu0  ;;  %v3244_v24 = vmul.f32 %v3212_v3, %v3037_v52  ;;  %v6986_v51 = vadd.f32 %v3042_v43, %v6944_v10 }
0x165e   : > { %v3046_v28 = vpop.f32.mrb[54].mxu1  ;;  %v3119_v39 = vpop.f32.mrb[54].mxu0  ;;  %v3246_v33 = vmul.f32 %v3214_v19, %v6964_v7  ;;  %v6992_v18 = vadd.f32 %v3115_v59, %v6948_v26  ;;  %v6997_v2 = vadd.f32 %v3044_v60, %v6951_v0  ;;  %v3215_v45 = vmul.f32 %v3183_v15, %v6973_v57 }
0x165f   : > { %v3304_v11 = vmul.f32 0.7978846, %v3272_v23  ;;  %v3306_v42 = vmul.f32 0.7978846, %v3274_v6  ;;  %v3048_v14 = vpop.f32.mrb[55].mxu1  ;;  %v3121_v48 = vpop.f32.mrb[55].mxu0  ;;  %v3276_v50 = vadd.f32 %v3244_v24, %v3037_v52  ;;  %v7003_v27 = vadd.f32 %v3117_v1, %v6957_v9 }
0x1660   : > { %v3278_v55 = vadd.f32 %v3246_v33, %v6964_v7  ;;  %v3184_v47 = vmul.f32 0.044715, %v6986_v51  ;;  %v3185_v62 = vmul.f32 0.044715, %v6997_v2  ;;  %v7006_v16 = vadd.f32 %v3046_v28, %v6944_v10 }
0x1661   : > { %5394 = vtanh.f32 %v3304_v11  ;;  %v3308_v34 = vmul.f32 0.7978846, %v3276_v50  ;;  %v3245_v49 = vmul.f32 %v3213_v41, %v6967_v53  ;;  %v7011_v56 = vadd.f32 %v3119_v39, %v6948_v26 }
0x1662   : > { %5396 = vtanh.f32 %v3306_v42  ;;  %v3310_v4 = vmul.f32 0.7978846, %v3278_v55  ;;  %v3216_v46 = vmul.f32 %v3184_v47, %v6986_v51  ;;  %v3186_v30 = vmul.f32 0.044715, %v6992_v18 }
0x1663   : > { %5398 = vtanh.f32 %v3308_v34  ;;  %v3187_v20 = vmul.f32 0.044715, %v7003_v27  ;;  %v3148_v22 = vmul.f32 0.5, %v3037_v52  ;;  %v3217_v3 = vmul.f32 %v3185_v62, %v6997_v2 }
0x1664   : > { %5400 = vtanh.f32 %v3310_v4  ;;  %v7018_v21 = vadd.f32 %v3048_v14, %v6951_v0  ;;  %v7021_v43 = vadd.f32 %v3121_v48, %v6957_v9  ;;  %v3243_v59 = vmul.f32 %v3211_v37, %v6970_v29 }
0x1665   : > { %v3247_v23 = vmul.f32 %v3215_v45, %v6973_v57  ;;  %v3188_v6 = vmul.f32 0.044715, %v7006_v16  ;;  %v3190_v19 = vmul.f32 0.044715, %v7011_v56  ;;  %v3219_v60 = vmul.f32 %v3187_v20, %v7003_v27 }
0x1666   : > { %v3189_v52 = vmul.f32 0.044715, %v7018_v21  ;;  %v3191_v1 = vmul.f32 0.044715, %v7021_v43  ;;  %v3273_v35 = vadd.f32 %v3241_v31, %v6960_v54  ;;  %v3150_v24 = vmul.f32 0.5, %v6964_v7 }
0x1667   : > { %v3248_v15 = vmul.f32 %v3216_v46, %v6986_v51  ;;  %v3218_v28 = vmul.f32 %v3186_v30, %v6992_v18  ;;  %v3277_v39 = vadd.f32 %v3245_v49, %v6967_v53  ;;  %v3249_v11 = vmul.f32 %v3217_v3, %v6997_v2 }
0x1668   : > { %v3221_v42 = vmul.f32 %v3189_v52, %v7018_v21  ;;  %v3223_v33 = vmul.f32 %v3191_v1, %v7021_v43  ;;  %v3305_v14 = vmul.f32 0.7978846, %v3273_v35  ;;  %v3220_v61 = vmul.f32 %v3188_v6, %v7006_v16 }
0x1669   : > { %v3309_v50 = vmul.f32 0.7978846, %v3277_v39  ;;  %v3275_v41 = vadd.f32 %v3243_v59, %v6970_v29  ;;  %v3279_v7 = vadd.f32 %v3247_v23, %v6973_v57  ;;  %v3251_v47 = vmul.f32 %v3219_v60, %v7003_v27 }
0x166a   : > { %v3222_v37 = vmul.f32 %v3190_v19, %v7011_v56  ;;  %v3253_v34 = vmul.f32 %v3221_v42, %v7018_v21  ;;  %5402 = vtanh.f32 %v3305_v14  ;;  %v3250_v49 = vmul.f32 %v3218_v28, %v6992_v18 }
0x166b   : > { %v5395_v48 = vpop.eup %5394  ;;  %5404 = vtanh.f32 %v3309_v50  ;;  %v3307_v45 = vmul.f32 0.7978846, %v3275_v41  ;;  %v3311_v4 = vmul.f32 0.7978846, %v3279_v7  ;;  %v3255_v46 = vmul.f32 %v3223_v33, %v7021_v43 }
0x166c   : > { %v5397_v55 = vpop.eup %5396  ;;  %v3368_v62 = vadd.f32 1.0, %v5395_v48  ;;  %v3281_v20 = vadd.f32 %v3249_v11, %v6997_v2  ;;  %v3252_v59 = vmul.f32 %v3220_v61, %v7006_v16  ;;  %v3285_v6 = vadd.f32 %v3253_v34, %v7018_v21 }
0x166d   : > { %v5399_v31 = vpop.eup %5398  ;;  %v3370_v30 = vadd.f32 1.0, %v5397_v55  ;;  %5406 = vtanh.f32 %v3307_v45  ;;  %v3254_v19 = vmul.f32 %v3222_v37, %v7011_v56  ;;  %v3283_v39 = vadd.f32 %v3251_v47, %v7003_v27 }
0x166e   : > { %v5401_v3 = vpop.eup %5400  ;;  %v3372_v23 = vadd.f32 1.0, %v5399_v31  ;;  %5408 = vtanh.f32 %v3311_v4  ;;  %v3313_v52 = vmul.f32 0.7978846, %v3281_v20  ;;  %v3400_v1 = vmul.f32 %v3368_v62, %v6975_v58 }
0x166f   : > { %v3374_v60 = vadd.f32 1.0, %v5401_v3  ;;  %v3317_v28 = vmul.f32 0.7978846, %v3285_v6  ;;  %v3402_v11 = vmul.f32 %v3370_v30, %v6980_v36  ;;  %v3287_v33 = vadd.f32 %v3255_v46, %v7021_v43 }
0x1670   : > { %v3404_v35 = vmul.f32 %v3372_v23, %v3148_v22  ;;  %5410 = vtanh.f32 %v3313_v52  ;;  %v3315_v48 = vmul.f32 0.7978846, %v3283_v39  ;;  %v3280_v41 = vadd.f32 %v3248_v15, %v6986_v51 }
0x1671   : > { %v3406_v42 = vmul.f32 %v3374_v60, %v3150_v24  ;;  %5412 = vtanh.f32 %v3317_v28  ;;  %v3319_v50 = vmul.f32 0.7978846, %v3287_v33  ;;  %v3284_v7 = vadd.f32 %v3252_v59, %v7006_v16 }
0x1672   : > { %v3432_v14 = vpack.c.bf16 %v3404_v35, %v3400_v1  ;;  %5414 = vtanh.f32 %v3315_v48  ;;  %v3282_v58 = vadd.f32 %v3250_v49, %v6992_v18  ;;  %v3312_v55 = vmul.f32 0.7978846, %v3280_v41 }
0x1673   : > { %v3434_v61 = vpack.c.bf16 %v3406_v42, %v3402_v11  ;;  %5416 = vtanh.f32 %v3319_v50  ;;  %v3316_v36 = vmul.f32 0.7978846, %v3284_v7  ;;  %v3286_v24 = vadd.f32 %v3254_v19, %v7011_v56 }
0x1674   : > { %v5403_v22 = vpop.eup %5402  ;;  %v3145_v37 = vmul.f32 0.5, %v6960_v54  ;;  %v3314_v45 = vmul.f32 0.7978846, %v3282_v58  ;;  %v3149_v4 = vmul.f32 0.5, %v6967_v53  ;;  %5418 = vtanh.f32 %v3312_v55 }
0x1675   : > { %v5405_v47 = vpop.eup %5404  ;;  %v3369_v34 = vadd.f32 1.0, %v5403_v22  ;;  %v3318_v15 = vmul.f32 0.7978846, %v3286_v24  ;;  %5420 = vtanh.f32 %v3316_v36  ;;  %v3147_v3 = vmul.f32 0.5, %v6970_v29 }
0x1676   : > { %v3373_v62 = vadd.f32 1.0, %v5405_v47  ;;  %5422 = vtanh.f32 %v3314_v45  ;;  %v3151_v59 = vmul.f32 0.5, %v6973_v57  ;;  %v3153_v1 = vmul.f32 0.5, %v6997_v2 }
0x1677   : > { %v5407_v31 = vpop.eup %5406  ;;  %v3401_v49 = vmul.f32 %v3369_v34, %v3145_v37  ;;  %5424 = vtanh.f32 %v3318_v15  ;;  %v3157_v35 = vmul.f32 0.5, %v7018_v21  ;;  %v3155_v48 = vmul.f32 0.5, %v7003_v27 }
0x1678   : > { %v5409_v46 = vpop.eup %5408  ;;  %v3405_v30 = vmul.f32 %v3373_v62, %v3149_v4  ;;  %v3371_v20 = vadd.f32 1.0, %v5407_v31  ;;  %v3159_v50 = vmul.f32 0.5, %v7021_v43  ;;  %v3156_v24 = vmul.f32 0.5, %v7006_v16 }
0x1679   : > { %v3375_v23 = vadd.f32 1.0, %v5409_v46  ;;  %v3154_v27 = vmul.f32 0.5, %v6992_v18 }
0x167a   : > { %v5411_v54 = vpop.eup %5410  ;;  %v3433_v6 = vpack.c.bf16 %v3405_v30, %v3401_v49  ;;  %v3403_v53 = vmul.f32 %v3371_v20, %v3147_v3 }
0x167b   : > { %v5413_v19 = vpop.eup %5412  ;;  %v3407_v60 = vmul.f32 %v3375_v23, %v3151_v59  ;;  %v3377_v52 = vadd.f32 1.0, %v5411_v54 }
0x167c   : > { %3740 = vmatprep.mubr.bf16.mxu1 %v3433_v6  ;;  %v3381_v28 = vadd.f32 1.0, %v5413_v19  ;;  %v5415_v39 = vpop.eup %5414 }
0x167d   : > { %v3435_v11 = vpack.c.bf16 %v3407_v60, %v3403_v53  ;;  %3741 = vmatmul.mubr.bf16.vlgmr.msra.gmra.mrb[64].mxu1 %v3432_v14  ;;  %v5417_v29 = vpop.eup %5416  ;;  %v3409_v42 = vmul.f32 %v3377_v52, %v3153_v1  ;;  %v3379_v33 = vadd.f32 1.0, %v5415_v39  ;;  %v3152_v14 = vmul.f32 0.5, %v6986_v51 }
0x167e   : > { %v3413_v57 = vmul.f32 %v3381_v28, %v3157_v35  ;;  %v3383_v41 = vadd.f32 1.0, %v5417_v29  ;;  %v5419_v7 = vpop.eup %5418 }
0x167f   : > { %3805 = vmatprep.mubr.bf16.mxu0 %v3435_v11  ;;  %v5421_v2 = vpop.eup %5420  ;;  %v3411_v22 = vmul.f32 %v3379_v33, %v3155_v48  ;;  %v3376_v55 = vadd.f32 1.0, %v5419_v7 }
0x1680   : > { %3806 = vmatmul.mubr.bf16.vlgmr.msra.gmra.mrb[64].mxu0 %v3434_v61  ;;  %v3437_v58 = vpack.c.bf16 %v3413_v57, %v3409_v42  ;;  %v3415_v21 = vmul.f32 %v3383_v41, %v3159_v50  ;;  %v5423_v36 = vpop.eup %5422  ;;  %v3380_v47 = vadd.f32 1.0, %v5421_v2  ;;  %v3158_v61 = vmul.f32 0.5, %v7011_v56 }
0x1681   : > { %v5425_v37 = vpop.eup %5424  ;;  %v3378_v43 = vadd.f32 1.0, %v5423_v36  ;;  %v3408_v45 = vmul.f32 %v3376_v55, %v3152_v14 }
0x1682   : > { %3748 = vmatprep.mubr.bf16.mxu1 %v3437_v58  ;;  %v3439_v34 = vpack.c.bf16 %v3415_v21, %v3411_v22  ;;  %v3412_v4 = vmul.f32 %v3380_v47, %v3156_v24  ;;  %v3382_v62 = vadd.f32 1.0, %v5425_v37 }
0x1683   : > { %v3410_v31 = vmul.f32 %v3378_v43, %v3154_v27 }
0x1684   : > { %3813 = vmatprep.mubr.bf16.mxu0 %v3439_v34  ;;  %v3436_v15 = vpack.c.bf16 %v3412_v4, %v3408_v45  ;;  %v3414_v46 = vmul.f32 %v3382_v62, %v3158_v61 }
0x1686   : > { %3749 = vmatmul.mubr.bf16.gmra.mrb[68].mxu1 %v3436_v15  ;;  %v3438_v49 = vpack.c.bf16 %v3414_v46, %v3410_v31 }
0x1688   : > { %3814 = vmatmul.mubr.bf16.gmra.mrb[68].mxu0 %v3438_v49 }
0x16e0   : > { %v3052_v51 = vpop.f32.mrb[56].mxu1  ;;  %v3125_v16 = vpop.f32.mrb[56].mxu0 }
0x16e1   : > { %v7071_v30 = vadd.f32 %v3052_v51, %v6944_v10  ;;  %v3054_v20 = vpop.f32.mrb[57].mxu1  ;;  %v3127_v18 = vpop.f32.mrb[57].mxu0  ;;  %v7074_v3 = vadd.f32 %v3125_v16, %v6948_v26 }
0x16e2   : > { %v7077_v56 = vadd.f32 %v3054_v20, %v6951_v0  ;;  %v3056_v59 = vpop.f32.mrb[58].mxu1  ;;  %v3129_v23 = vpop.f32.mrb[58].mxu0  ;;  %v7080_v54 = vadd.f32 %v3127_v18, %v6957_v9 }
0x16e3   : > { %v3058_v6 = vpop.f32.mrb[59].mxu1  ;;  %v3131_v19 = vpop.f32.mrb[59].mxu0  ;;  %v3192_v53 = vmul.f32 0.044715, %v7071_v30  ;;  %v7084_v60 = vadd.f32 %v3056_v59, %v6944_v10  ;;  %v7094_v28 = vadd.f32 %v3129_v23, %v6948_v26  ;;  %v3194_v39 = vmul.f32 0.044715, %v7074_v3 }
0x16e4   : > { %v7087_v52 = vadd.f32 %v3058_v6, %v6951_v0  ;;  %v7090_v1 = vadd.f32 %v3131_v19, %v6957_v9  ;;  %v3193_v35 = vmul.f32 0.044715, %v7077_v56  ;;  %v3195_v29 = vmul.f32 0.044715, %v7080_v54 }
0x16e5   : > { %v3224_v57 = vmul.f32 %v3192_v53, %v7071_v30  ;;  %v3196_v33 = vmul.f32 0.044715, %v7084_v60  ;;  %v3198_v7 = vmul.f32 0.044715, %v7094_v28  ;;  %v3226_v55 = vmul.f32 %v3194_v39, %v7074_v3 }
0x16e6   : > { %v3197_v11 = vmul.f32 0.044715, %v7087_v52  ;;  %v3199_v42 = vmul.f32 0.044715, %v7090_v1  ;;  %v3225_v41 = vmul.f32 %v3193_v35, %v7077_v56  ;;  %v3227_v34 = vmul.f32 %v3195_v29, %v7080_v54 }
0x16e7   : > { %v3228_v62 = vmul.f32 %v3196_v33, %v7084_v60  ;;  %v3256_v19 = vmul.f32 %v3224_v57, %v7071_v30  ;;  %v3258_v53 = vmul.f32 %v3226_v55, %v7074_v3 }
0x16e8   : > { %v3062_v48 = vpop.f32.mrb[60].mxu1  ;;  %v3135_v50 = vpop.f32.mrb[60].mxu0  ;;  %v3229_v36 = vmul.f32 %v3197_v11, %v7087_v52  ;;  %v3231_v27 = vmul.f32 %v3199_v42, %v7090_v1  ;;  %v3257_v49 = vmul.f32 %v3225_v41, %v7077_v56  ;;  %v3259_v59 = vmul.f32 %v3227_v34, %v7080_v54 }
0x16e9   : > { %v7105_v58 = vadd.f32 %v3062_v48, %v6944_v10  ;;  %v7108_v2 = vadd.f32 %v3135_v50, %v6948_v26  ;;  %v3064_v22 = vpop.f32.mrb[61].mxu1  ;;  %v3137_v21 = vpop.f32.mrb[61].mxu0  ;;  %v3260_v11 = vmul.f32 %v3228_v62, %v7084_v60 }
0x16ea   : > { %v7113_v14 = vadd.f32 %v3064_v22, %v6951_v0  ;;  %v7116_v24 = vadd.f32 %v3137_v21, %v6957_v9  ;;  %v3066_v47 = vpop.f32.mrb[62].mxu1  ;;  %v3139_v37 = vpop.f32.mrb[62].mxu0  ;;  %v3261_v16 = vmul.f32 %v3229_v36, %v7087_v52  ;;  %v3289_v57 = vadd.f32 %v3257_v49, %v7077_v56 }
0x16eb   : > { %v7121_v43 = vadd.f32 %v3066_v47, %v6944_v10  ;;  %v7124_v45 = vadd.f32 %v3139_v37, %v6948_v26  ;;  %v3068_v4 = vpop.f32.mrb[63].mxu1  ;;  %v3141_v61 = vpop.f32.mrb[63].mxu0  ;;  %v3230_v10 = vmul.f32 %v3198_v7, %v7094_v28  ;;  %v3200_v51 = vmul.f32 0.044715, %v7105_v58 }
0x16ec   : > { %v3201_v15 = vmul.f32 0.044715, %v7113_v14  ;;  %v7129_v31 = vadd.f32 %v3068_v4, %v6951_v0  ;;  %v7132_v46 = vadd.f32 %v3141_v61, %v6957_v9  ;;  %v3202_v26 = vmul.f32 0.044715, %v7108_v2 }
0x16ed   : > { %v3203_v20 = vmul.f32 0.044715, %v7116_v24  ;;  %v3263_v9 = vmul.f32 %v3231_v27, %v7090_v1  ;;  %v3204_v23 = vmul.f32 0.044715, %v7121_v43  ;;  %v3206_v6 = vmul.f32 0.044715, %v7124_v45 }
0x16ee   : > { %v3205_v18 = vmul.f32 0.044715, %v7129_v31  ;;  %v3207_v0 = vmul.f32 0.044715, %v7132_v46  ;;  %v3233_v35 = vmul.f32 %v3201_v15, %v7113_v14  ;;  %v3262_v29 = vmul.f32 %v3230_v10, %v7094_v28 }
0x16ef   : > { %v3232_v42 = vmul.f32 %v3200_v51, %v7105_v58  ;;  %v3234_v33 = vmul.f32 %v3202_v26, %v7108_v2  ;;  %v3235_v48 = vmul.f32 %v3203_v20, %v7116_v24  ;;  %v3293_v41 = vadd.f32 %v3261_v16, %v7087_v52 }
0x16f0   : > { %v3237_v39 = vmul.f32 %v3205_v18, %v7129_v31  ;;  %v3239_v50 = vmul.f32 %v3207_v0, %v7132_v46  ;;  %v3236_v7 = vmul.f32 %v3204_v23, %v7121_v43  ;;  %v3238_v22 = vmul.f32 %v3206_v6, %v7124_v45 }
0x16f1   : > { %v3291_v21 = vadd.f32 %v3259_v59, %v7080_v54  ;;  %v3295_v55 = vadd.f32 %v3263_v9, %v7090_v1  ;;  %v3265_v36 = vmul.f32 %v3233_v35, %v7113_v14  ;;  %v3321_v37 = vmul.f32 0.7978846, %v3289_v57 }
0x16f2   : > { %v3269_v47 = vmul.f32 %v3237_v39, %v7129_v31  ;;  %v3325_v34 = vmul.f32 0.7978846, %v3293_v41  ;;  %v3288_v61 = vadd.f32 %v3256_v19, %v7071_v30  ;;  %v3292_v62 = vadd.f32 %v3260_v11, %v7084_v60 }
0x16f3   : > { %v3323_v27 = vmul.f32 0.7978846, %v3291_v21  ;;  %v3327_v4 = vmul.f32 0.7978846, %v3295_v55  ;;  %v3267_v15 = vmul.f32 %v3235_v48, %v7116_v24  ;;  %v3271_v49 = vmul.f32 %v3239_v50, %v7132_v46 }
0x16f4   : > { %5426 = vtanh.f32 %v3321_v37  ;;  %v3290_v10 = vadd.f32 %v3258_v53, %v7074_v3  ;;  %v3320_v51 = vmul.f32 0.7978846, %v3288_v61  ;;  %v3324_v26 = vmul.f32 0.7978846, %v3292_v62 }
0x16f5   : > { %5428 = vtanh.f32 %v3325_v34  ;;  %v3294_v16 = vadd.f32 %v3262_v29, %v7094_v28  ;;  %v3264_v20 = vmul.f32 %v3232_v42, %v7105_v58  ;;  %v3268_v18 = vmul.f32 %v3236_v7, %v7121_v43 }
0x16f6   : > { %5430 = vtanh.f32 %v3323_v27  ;;  %v3322_v0 = vmul.f32 0.7978846, %v3290_v10  ;;  %v3297_v9 = vadd.f32 %v3265_v36, %v7113_v14  ;;  %v3301_v23 = vadd.f32 %v3269_v47, %v7129_v31 }
0x16f7   : > { %5432 = vtanh.f32 %v3327_v4  ;;  %v3326_v59 = vmul.f32 0.7978846, %v3294_v16  ;;  %v3266_v6 = vmul.f32 %v3234_v33, %v7108_v2  ;;  %v3270_v19 = vmul.f32 %v3238_v22, %v7124_v45 }
0x16f8   : > { %5434 = vtanh.f32 %v3320_v51  ;;  %v3299_v53 = vadd.f32 %v3267_v15, %v7116_v24  ;;  %v3329_v35 = vmul.f32 0.7978846, %v3297_v9  ;;  %v3333_v39 = vmul.f32 0.7978846, %v3301_v23 }
0x16f9   : > { %5436 = vtanh.f32 %v3324_v26  ;;  %v3303_v11 = vadd.f32 %v3271_v49, %v7132_v46  ;;  %v3296_v48 = vadd.f32 %v3264_v20, %v7105_v58  ;;  %v3300_v50 = vadd.f32 %v3268_v18, %v7121_v43 }
0x16fa   : > { %5438 = vtanh.f32 %v3322_v0  ;;  %v3331_v29 = vmul.f32 0.7978846, %v3299_v53  ;;  %v3298_v33 = vadd.f32 %v3266_v6, %v7108_v2  ;;  %v3302_v7 = vadd.f32 %v3270_v19, %v7124_v45 }
0x16fb   : > { %5440 = vtanh.f32 %v3326_v59  ;;  %v3335_v42 = vmul.f32 0.7978846, %v3303_v11  ;;  %v3328_v57 = vmul.f32 0.7978846, %v3296_v48  ;;  %v3332_v41 = vmul.f32 0.7978846, %v3300_v50 }
0x16fc   : > { %5442 = vtanh.f32 %v3329_v35  ;;  %v3330_v21 = vmul.f32 0.7978846, %v3298_v33  ;;  %v3334_v47 = vmul.f32 0.7978846, %v3302_v7  ;;  %v3161_v34 = vmul.f32 0.5, %v7077_v56 }
0x16fd   : > { %5444 = vtanh.f32 %v3333_v39  ;;  %v3165_v27 = vmul.f32 0.5, %v7087_v52  ;;  %v3163_v62 = vmul.f32 0.5, %v7080_v54  ;;  %v3167_v15 = vmul.f32 0.5, %v7090_v1 }
0x16fe   : > { %v5427_v22 = vpop.eup %5426  ;;  %5446 = vtanh.f32 %v3331_v29  ;;  %v3160_v18 = vmul.f32 0.5, %v7071_v30  ;;  %v3164_v56 = vmul.f32 0.5, %v7084_v60  ;;  %v3162_v6 = vmul.f32 0.5, %v7074_v3 }
0x16ff   : > { %v5429_v55 = vpop.eup %5428  ;;  %v3385_v36 = vadd.f32 1.0, %v5427_v22  ;;  %5448 = vtanh.f32 %v3335_v42  ;;  %v3166_v19 = vmul.f32 0.5, %v7094_v28  ;;  %v3169_v42 = vmul.f32 0.5, %v7113_v14 }
0x1700   : > { %v5431_v37 = vpop.eup %5430  ;;  %v3389_v4 = vadd.f32 1.0, %v5429_v55  ;;  %5450 = vtanh.f32 %v3328_v57  ;;  %v3173_v48 = vmul.f32 0.5, %v7129_v31  ;;  %v3171_v22 = vmul.f32 0.5, %v7116_v24 }
0x1701   : > { %v5433_v61 = vpop.eup %5432  ;;  %v3387_v49 = vadd.f32 1.0, %v5431_v37  ;;  %5452 = vtanh.f32 %v3332_v41  ;;  %v3417_v51 = vmul.f32 %v3385_v36, %v3161_v34 }
0x1702   : > { %v5435_v10 = vpop.eup %5434  ;;  %v3421_v26 = vmul.f32 %v3389_v4, %v3165_v27  ;;  %v3391_v16 = vadd.f32 1.0, %v5433_v61  ;;  %5454 = vtanh.f32 %v3330_v21  ;;  %v3175_v21 = vmul.f32 0.5, %v7132_v46 }
0x1703   : > { %v5437_v20 = vpop.eup %5436  ;;  %v3384_v52 = vadd.f32 1.0, %v5435_v10  ;;  %5456 = vtanh.f32 %v3334_v47  ;;  %v3419_v9 = vmul.f32 %v3387_v49, %v3163_v62  ;;  %v3168_v27 = vmul.f32 0.5, %v7105_v58 }
0x1704   : > { %v5439_v0 = vpop.eup %5438  ;;  %v3441_v59 = vpack.c.bf16 %v3421_v26, %v3417_v51  ;;  %v3423_v54 = vmul.f32 %v3391_v16, %v3167_v15  ;;  %v3388_v23 = vadd.f32 1.0, %v5437_v20  ;;  %v3172_v4 = vmul.f32 0.5, %v7121_v43 }
0x1705   : > { %v5441_v1 = vpop.eup %5440  ;;  %v3386_v53 = vadd.f32 1.0, %v5439_v0  ;;  %v3416_v11 = vmul.f32 %v3384_v52, %v3160_v18  ;;  %v3170_v51 = vmul.f32 0.5, %v7108_v2  ;;  %v3174_v26 = vmul.f32 0.5, %v7124_v45  ;;  %v5467_v2 = vld [vmem:[%s6176_s25] sm:$0xff] }
0x1706   : > { %v5443_v35 = vpop.eup %5442  ;;  %3756 = vmatprep.mubr.bf16.mxu1 %v3441_v59  ;;  %v3443_v39 = vpack.c.bf16 %v3423_v54, %v3419_v9  ;;  %v3420_v30 = vmul.f32 %v3388_v23, %v3164_v56  ;;  %v3390_v29 = vadd.f32 1.0, %v5441_v1  ;;  %v3514_v9 = vsub.s32 5, %v6265_v5 }
0x1707   : > { %v5445_v60 = vpop.eup %5444  ;;  %v3393_v50 = vadd.f32 1.0, %v5443_v35  ;;  %v3418_v41 = vmul.f32 %v3386_v53, %v3162_v6 }
0x1708   : > { %v5447_v33 = vpop.eup %5446  ;;  %3821 = vmatprep.mubr.bf16.mxu0 %v3443_v39  ;;  %v3440_v57 = vpack.c.bf16 %v3420_v30, %v3416_v11  ;;  %v3422_v3 = vmul.f32 %v3390_v29, %v3166_v19  ;;  %v3397_v7 = vadd.f32 1.0, %v5445_v60  ;;  %v7200_v23 = vrot.slane %v5467_v2, %v3514_v9 }
0x1709   : > { %v5449_v28 = vpop.eup %5448  ;;  %v3395_v55 = vadd.f32 1.0, %v5447_v33  ;;  %v3425_v37 = vmul.f32 %v3393_v50, %v3169_v42 }
0x170a   : > { %v5451_v36 = vpop.eup %5450  ;;  %3757 = vmatmul.mubr.bf16.gmra.mrb[72].mxu1 %v3440_v57  ;;  %v3442_v47 = vpack.c.bf16 %v3422_v3, %v3418_v41  ;;  %v3429_v14 = vmul.f32 %v3397_v7, %v3173_v48  ;;  %v3399_v34 = vadd.f32 1.0, %v5449_v28 }
0x170b   : > { %v5453_v31 = vpop.eup %5452  ;;  %v3392_v61 = vadd.f32 1.0, %v5451_v36  ;;  %v3427_v49 = vmul.f32 %v3395_v55, %v3171_v22 }
0x170c   : > { %v5455_v62 = vpop.eup %5454  ;;  %3822 = vmatmul.mubr.bf16.gmra.mrb[72].mxu0 %v3442_v47  ;;  %v3445_v15 = vpack.c.bf16 %v3429_v14, %v3425_v37  ;;  %v3431_v24 = vmul.f32 %v3399_v34, %v3175_v21  ;;  %v3396_v10 = vadd.f32 1.0, %v5453_v31 }
0x170d   : > { %v5457_v46 = vpop.eup %5456  ;;  %v3394_v16 = vadd.f32 1.0, %v5455_v62  ;;  %v3424_v18 = vmul.f32 %v3392_v61, %v3168_v27 }
0x170e   : > { %3764 = vmatprep.mubr.bf16.mxu1 %v3445_v15  ;;  %v3447_v20 = vpack.c.bf16 %v3431_v24, %v3427_v49  ;;  %v3428_v58 = vmul.f32 %v3396_v10, %v3172_v4  ;;  %v3398_v56 = vadd.f32 1.0, %v5457_v46 }
0x170f   : > { %v3426_v52 = vmul.f32 %v3394_v16, %v3170_v51 }
0x1710   : > { %3829 = vmatprep.mubr.bf16.mxu0 %v3447_v20  ;;  %v3444_v43 = vpack.c.bf16 %v3428_v58, %v3424_v18  ;;  %v3430_v0 = vmul.f32 %v3398_v56, %v3174_v26 }
0x1712   : > { %3765 = vmatmul.mubr.bf16.gmra.mrb[76].mxu1 %v3444_v43  ;;  %v3446_v59 = vpack.c.bf16 %v3430_v0, %v3426_v52 }
0x1714   : > { %3830 = vmatmul.mubr.bf16.gmra.mrb[76].mxu0 %v3446_v59 }
0x1750   : > { %v4676_v54 = vpop.f32.mrb[64].mxu1 }
0x1751   : > { %v4677_v45 = vpop.f32.mrb[65].mxu1 }
0x1752   : > { %v4678_v1 = vadd.f32 %v4677_v45, %v4676_v54  ;;  %v4679_v6 = vpop.f32.mrb[66].mxu1 }
0x1753   : > { %v4716_v19 = vpop.f32.mrb[64].mxu0  ;;  %v4680_v53 = vpop.f32.mrb[67].mxu1 }
0x1754   : > { %v3743_v35 = vadd.f32 %v4678_v1, %v7200_v23  ;;  %v4717_v39 = vpop.f32.mrb[65].mxu0  ;;  %v4681_v11 = vadd.f32 %v4680_v53, %v4679_v6 }
0x1755   : > { %v4718_v30 = vadd.f32 %v4717_v39, %v4716_v19  ;;  %v4719_v29 = vpop.f32.mrb[66].mxu0 }
0x1756   : > { %v3746_v60 = vadd.f32 %v4681_v11, %v7200_v23  ;;  %v4720_v42 = vpop.f32.mrb[67].mxu0 }
0x1757   : > { %v3808_v48 = vadd.f32 %v4718_v30, %v3743_v35  ;;  %v4721_v5 = vadd.f32 %v4720_v42, %v4719_v29 }
0x1759   : > { %v7205_v50 = vadd.f32 %v3808_v48, %v6767_v8  ;;  %v3811_v33 = vadd.f32 %v4721_v5, %v3746_v60  ;;  %v4682_v41 = vpop.f32.mrb[68].mxu1 }
0x175a   : > { %v4683_v3 = vpop.f32.mrb[69].mxu1 }
0x175b   : > { %3846 = vst [vmem:[#allocation2] sm:$0xff] %v7205_v50  ;;  %v7209_v57 = vadd.f32 %v3811_v33, %v6770_v13  ;;  %v4722_v7 = vpop.f32.mrb[68].mxu0  ;;  %v4684_v28 = vadd.f32 %v4683_v3, %v4682_v41  ;;  %v4685_v22 = vpop.f32.mrb[70].mxu1  ;;  %3859 = vadd.xlane.f32.xlu0 (!%p4532_p7), %v7205_v50 }
0x175c   : > { %v4723_v21 = vpop.f32.mrb[69].mxu0  ;;  %v4686_v55 = vpop.f32.mrb[71].mxu1 }
0x175d   : > { %3847 = vst [vmem:[#allocation2 + $0x8] sm:$0xff] %v7209_v57  ;;  %v3751_v36 = vadd.f32 %v4684_v28, %v7200_v23  ;;  %v4724_v47 = vadd.f32 %v4723_v21, %v4722_v7  ;;  %v4725_v8 = vpop.f32.mrb[70].mxu0  ;;  %v4687_v37 = vadd.f32 %v4686_v55, %v4685_v22 }
0x175e   : > { %v4726_v14 = vpop.f32.mrb[71].mxu0 }
0x175f   : > { %v3816_v34 = vadd.f32 %v4724_v47, %v3751_v36  ;;  %v3754_v31 = vadd.f32 %v4687_v37, %v7200_v23  ;;  %v4727_v13 = vadd.f32 %v4726_v14, %v4725_v8  ;;  %3861 = vadd.xlane.f32.xlu0 (!%p4532_p7), %v7209_v57 }
0x1761   : > { %v7215_v27 = vadd.f32 %v3816_v34, %v6772_v32  ;;  %v3819_v4 = vadd.f32 %v4727_v13, %v3754_v31 }
0x1763   : > { %3848 = vst [vmem:[#allocation2 + $0x10] sm:$0xff] %v7215_v27  ;;  %v7219_v61 = vadd.f32 %v3819_v4, %v6776_v38  ;;  %3863 = vadd.xlane.f32.xlu0 (!%p4532_p7), %v7215_v27 }
0x1765   : > { %3849 = vst [vmem:[#allocation2 + $0x18] sm:$0xff] %v7219_v61 }
0x17dd   : > { %v4688_v62 = vpop.f32.mrb[72].mxu1 }
0x17de   : > { %v4689_v15 = vpop.f32.mrb[73].mxu1 }
0x17df   : > { %v4728_v49 = vpop.f32.mrb[72].mxu0  ;;  %v4690_v24 = vadd.f32 %v4689_v15, %v4688_v62  ;;  %v4691_v10 = vpop.f32.mrb[74].mxu1 }
0x17e0   : > { %v4729_v46 = vpop.f32.mrb[73].mxu0  ;;  %v4692_v51 = vpop.f32.mrb[75].mxu1 }
0x17e1   : > { %v3759_v26 = vadd.f32 %v4690_v24, %v7200_v23  ;;  %v4730_v16 = vadd.f32 %v4729_v46, %v4728_v49  ;;  %v4731_v32 = vpop.f32.mrb[74].mxu0  ;;  %v4693_v20 = vadd.f32 %v4692_v51, %v4691_v10 }
0x17e2   : > { %v4732_v18 = vpop.f32.mrb[75].mxu0 }
0x17e3   : > { %v3824_v58 = vadd.f32 %v4730_v16, %v3759_v26  ;;  %v3762_v56 = vadd.f32 %v4693_v20, %v7200_v23  ;;  %v4733_v38 = vadd.f32 %v4732_v18, %v4731_v32  ;;  %v5471_v26 = vld [vmem:[#allocation14 + $0x14] ss:$8 sps:$4 sm:$0xff] (!%p4532_p7)   ;;  %v5473_v32 = vld [vmem:[#allocation14 + $0x10] ss:$8 sps:$4 sm:$0xff] (!%p4532_p7)   ;;  %v5474_v20 = vld [vmem:[#allocation14 + $0x24] ss:$8 sps:$4 sm:$0xff] (!%p4532_p7)  }
0x17e4   : > { %v5476_v18 = vld [vmem:[#allocation14 + $0x20] ss:$8 sps:$4 sm:$0xff] (!%p4532_p7)  }
0x17e5   : > { %v3842_v43 = vadd.f32 %v3824_v58, %v6786_v17  ;;  %v3827_v52 = vadd.f32 %v4733_v38, %v3762_v56  ;;  %v4694_v0 = vpop.f32.mrb[76].mxu1  ;;  %v5477_v58 = vld [vmem:[#allocation14 + $0x34] ss:$8 sps:$4 sm:$0xff] (!%p4532_p7)   ;;  %v5479_v56 = vld [vmem:[#allocation14 + $0x30] ss:$8 sps:$4 sm:$0xff] (!%p4532_p7)  }
0x17e6   : > { %v4695_v59 = vpop.f32.mrb[77].mxu1  ;;  %v5480_v38 = vld [vmem:[#allocation14 + $0x44] ss:$8 sps:$4 sm:$0xff] (!%p4532_p7)  }
0x17e7   : > { %3850 = vst [vmem:[#allocation2 + $0x20] sm:$0xff] %v3842_v43  ;;  %v3843_v9 = vadd.f32 %v3827_v52, %v6788_v63  ;;  %v4734_v54 = vpop.f32.mrb[76].mxu0  ;;  %v4696_v2 = vadd.f32 %v4695_v59, %v4694_v0  ;;  %v4697_v45 = vpop.f32.mrb[78].mxu1  ;;  %3867 = vadd.xlane.f32.xlu1 (!%p4532_p7), %v3842_v43  ;;  %v5483_v52 = vld [vmem:[#allocation14 + $0x54] ss:$8 sps:$4 sm:$0xff] (!%p4532_p7)  }
0x17e8   : > { %v4735_v1 = vpop.f32.mrb[77].mxu0  ;;  %v4698_v6 = vpop.f32.mrb[79].mxu1  ;;  %v5485_v0 = vld [vmem:[#allocation14 + $0x50] ss:$8 sps:$4 sm:$0xff] (!%p4532_p7)   ;;  %v5486_v59 = vld [vmem:[#allocation14 + $0x64] ss:$8 sps:$4 sm:$0xff] (!%p4532_p7)  }
0x17e9   : > { %3851 = vst [vmem:[#allocation2 + $0x28] sm:$0xff] %v3843_v9  ;;  %v3767_v19 = vadd.f32 %v4696_v2, %v7200_v23  ;;  %v4736_v53 = vadd.f32 %v4735_v1, %v4734_v54  ;;  %v4737_v35 = vpop.f32.mrb[78].mxu0  ;;  %v4699_v39 = vadd.f32 %v4698_v6, %v4697_v45  ;;  %v5489_v54 = vld [vmem:[#allocation14 + $0x74] ss:$8 sps:$4 sm:$0xff] (!%p4532_p7)   ;;  %v5491_v2 = vld [vmem:[#allocation14 + $0x70] ss:$8 sps:$4 sm:$0xff] (!%p4532_p7)  }
0x17ea   : > { %v4738_v11 = vpop.f32.mrb[79].mxu0  ;;  %v5816_v45 = vmov (!%p4532_p7), 0  }
0x17eb   : > { %v3832_v30 = vadd.f32 %v4736_v53, %v3767_v19  ;;  %v3770_v17 = vadd.f32 %v4699_v39, %v7200_v23  ;;  %v4739_v29 = vadd.f32 %v4738_v11, %v4737_v35  ;;  %3857 = sbr.rel (%p4532_p7) target bundleno = 6662 (0x1a06), region = 92  ;;  %3869 = vadd.xlane.f32.xlu1 (!%p4532_p7), %v3843_v9  ;;  %v5470_v23 = vld [vmem:[#allocation14] ss:$8 sps:$4 sm:$0xff] (!%p4532_p7)   ;;  %4103 = vmatprep.mubr.bf16.mxu0 (!%p4532_p7), %v5816_v45 }
0x17ec   : > { %4123 = vmatprep.mubr.bf16.mxu1 (!%p4532_p7), %v5816_v45 }
0x17ed   : > { %v3844_v60 = vadd.f32 %v3832_v30, %v6794_v40  ;;  %v3835_v42 = vadd.f32 %v4739_v29, %v3770_v17  ;;  %v5468_v40 = vld [vmem:[#allocation14 + $0x4] ss:$8 sps:$4 sm:$0xff] (!%p4532_p7)  }
0x17ee   : > { %4071 = vmatprep.subr.bf16.mxu0 (!%p4532_p7), %v5468_v40  ;;  %4916 = vmatprep.subr.bf16.mxu1 (!%p4532_p7), %v5468_v40 }
0x17ef   : > { %3852 = vst [vmem:[#allocation2 + $0x30] sm:$0xff] %v3844_v60  ;;  %v3845_v63 = vadd.f32 %v3835_v42, %v6800_v44  ;;  %3865 = vadd.xlane.f32.xlu1 (!%p4532_p7), %v7219_v61  ;;  %3871 = vadd.xlane.f32.xlu0 (!%p4532_p7), %v3844_v60  ;;  %v3860_v44 = vpop.xlane.xlu0 (!%p4532_p7), %3859 }
0x17f0   : > { %4072 = vmatpush1.bf16.msra.mxu0 (!%p4532_p7), %v5470_v23  ;;  %4924 = vmatpush1.bf16.msra.mxu1 (!%p4532_p7), %v5470_v23  ;;  %v3875_v5 = vmul.f32 (!%p4532_p7), 0.0078125, %v3860_v44 }
0x17f1   : > { %3853 = vst [vmem:[#allocation2 + $0x38] sm:$0xff] %v3845_v63  ;;  %4073 = vmatprep.subr.bf16.mxu0 (!%p4532_p7), %v5471_v26  ;;  %4917 = vmatprep.subr.bf16.mxu1 (!%p4532_p7), %v5471_v26 }
0x17f2   : > { %v7236_v41 = vsub.f32 %v7205_v50, %v3875_v5 }
0x17f3   : > { %3873 = vadd.xlane.f32.xlu1 %v3845_v63  ;;  %v3862_v7 = vpop.xlane.xlu0 %3861 }
0x17f4   : > { %v3876_v22 = vmul.f32 0.0078125, %v3862_v7  ;;  %v3891_v21 = vmul.f32 %v7236_v41, %v7236_v41  ;;  %4074 = vmatpush1.bf16.msra.mxu0 %v5473_v32  ;;  %4925 = vmatpush1.bf16.msra.mxu1 %v5473_v32  ;;  %v3858_v7 = vld [vmem:[%s7386_s22] sm:$0xff] }
0x17f5   : > { %4075 = vmatprep.subr.bf16.mxu0 %v5474_v20  ;;  %4918 = vmatprep.subr.bf16.mxu1 %v5474_v20 }
0x17f6   : > { %v7243_v36 = vsub.f32 %v7209_v57, %v3876_v22  ;;  %3899 = vadd.xlane.f32.xlu0 %v3891_v21 }
0x17f7   : > { %v3864_v50 = vpop.xlane.xlu0 %3863 }
0x17f8   : > { %v3877_v14 = vmul.f32 0.0078125, %v3864_v50  ;;  %v3892_v34 = vmul.f32 %v7243_v36, %v7243_v36  ;;  %4076 = vmatpush1.bf16.msra.mxu0 %v5476_v18  ;;  %4926 = vmatpush1.bf16.msra.mxu1 %v5476_v18  ;;  %v3950_v50 = vrot.slane %v3858_v7, %v6271_v12 }
0x17f9   : > { %4077 = vmatprep.subr.bf16.mxu0 %v5477_v58  ;;  %4919 = vmatprep.subr.bf16.mxu1 %v5477_v58 }
0x17fa   : > { %v7252_v13 = vsub.f32 %v7215_v27, %v3877_v14  ;;  %3901 = vadd.xlane.f32.xlu1 %v3892_v34 }
0x17fc   : > { %v3893_v24 = vmul.f32 %v7252_v13, %v7252_v13  ;;  %4078 = vmatpush1.bf16.msra.mxu0 %v5479_v56  ;;  %4927 = vmatpush1.bf16.msra.mxu1 %v5479_v56 }
0x17fd   : > { %4079 = vmatprep.subr.bf16.mxu0 %v5480_v38  ;;  %4920 = vmatprep.subr.bf16.mxu1 %v5480_v38 }
0x1874   : > { %v3868_v48 = vpop.xlane.xlu1 %3867 }
0x1875   : > { %v3879_v33 = vmul.f32 0.0078125, %v3868_v48 }
0x1877   : > { %v7238_v3 = vsub.f32 %v3842_v43, %v3879_v33  ;;  %v5482_v43 = vld [vmem:[#allocation14 + $0x40] ss:$8 sps:$4 sm:$0xff]  }
0x1878   : > { %v3870_v28 = vpop.xlane.xlu1 %3869  ;;  %4080 = vmatpush1.bf16.msra.mxu0 %v5482_v43  ;;  %4928 = vmatpush1.bf16.msra.mxu1 %v5482_v43 }
0x1879   : > { %v3880_v55 = vmul.f32 0.0078125, %v3870_v28  ;;  %v3895_v8 = vmul.f32 %v7238_v3, %v7238_v3  ;;  %4081 = vmatprep.subr.bf16.mxu0 %v5483_v52  ;;  %4921 = vmatprep.subr.bf16.mxu1 %v5483_v52 }
0x187b   : > { %v7245_v47 = vsub.f32 %v3843_v9, %v3880_v55  ;;  %3907 = vadd.xlane.f32.xlu0 %v3895_v8  ;;  %v5488_v9 = vld [vmem:[#allocation14 + $0x60] ss:$8 sps:$4 sm:$0xff]  }
0x187c   : > { %v3866_v37 = vpop.xlane.xlu1 %3865  ;;  %v3872_v62 = vpop.xlane.xlu0 %3871  ;;  %4082 = vmatpush1.bf16.msra.mxu0 %v5485_v0  ;;  %4929 = vmatpush1.bf16.msra.mxu1 %v5485_v0 }
0x187d   : > { %v3878_v31 = vmul.f32 0.0078125, %v3866_v37  ;;  %v3896_v4 = vmul.f32 %v7245_v47, %v7245_v47  ;;  %v3881_v49 = vmul.f32 0.0078125, %v3872_v62  ;;  %4083 = vmatprep.subr.bf16.mxu0 %v5486_v59  ;;  %4922 = vmatprep.subr.bf16.mxu1 %v5486_v59 }
0x187f   : > { %v7255_v57 = vsub.f32 %v7219_v61, %v3878_v31  ;;  %v7261_v46 = vsub.f32 %v3844_v60, %v3881_v49  ;;  %3909 = vadd.xlane.f32.xlu1 %v3896_v4  ;;  %3903 = vadd.xlane.f32.xlu0 %v3893_v24 }
0x1880   : > { %v3874_v15 = vpop.xlane.xlu1 %3873  ;;  %4084 = vmatpush1.bf16.msra.mxu0 %v5488_v9  ;;  %4930 = vmatpush1.bf16.msra.mxu1 %v5488_v9 }
0x1881   : > { %v3882_v10 = vmul.f32 0.0078125, %v3874_v15  ;;  %v3894_v61 = vmul.f32 %v7255_v57, %v7255_v57  ;;  %v3897_v51 = vmul.f32 %v7261_v46, %v7261_v46  ;;  %4085 = vmatprep.subr.bf16.mxu0 %v5489_v54  ;;  %4923 = vmatprep.subr.bf16.mxu1 %v5489_v54  ;;  %v3962_v15 = vrot.slane %v3858_v7, %v6283_v25 }
0x1883   : > { %v7263_v27 = vsub.f32 %v3845_v63, %v3882_v10  ;;  %3905 = vadd.xlane.f32.xlu1 %v3894_v61  ;;  %3911 = vadd.xlane.f32.xlu0 %v3897_v51  ;;  %v3900_v1 = vpop.xlane.xlu0 %3899 }
0x1884   : > { %4086 = vmatpush1.bf16.msra.mxu0 %v5491_v2  ;;  %4931 = vmatpush1.bf16.msra.mxu1 %v5491_v2  ;;  %v3915_v6 = vmul.f32 0.0078125, %v3900_v1 }
0x1885   : > { %v3898_v16 = vmul.f32 %v7263_v27, %v7263_v27 }
0x1886   : > { %v3923_v19 = vadd.f32 1e-05, %v3915_v6 }
0x1887   : > { %3913 = vadd.xlane.f32.xlu1 %v3898_v16  ;;  %v3902_v53 = vpop.xlane.xlu1 %3901 }
0x1888   : > { %5492 = vrsqrt.f32 %v3923_v19  ;;  %v3916_v39 = vmul.f32 0.0078125, %v3902_v53 }
0x188a   : > { %v3924_v30 = vadd.f32 1e-05, %v3916_v39 }
0x188c   : > { %5494 = vrsqrt.f32 %v3924_v30 }
0x1892   : > { %v5493_v28 = vpop.eup %5492 }
0x1893   : > { %v3939_v8 = vmul.f32 %v5493_v28, %v7236_v41 }
0x1895   : > { %v3951_v62 = vmul.f32 %v3950_v50, %v3939_v8 }
0x1896   : > { %v5495_v14 = vpop.eup %5494 }
0x1897   : > { %v3940_v4 = vmul.f32 %v5495_v14, %v7243_v36  ;;  %v3963_v41 = vadd.f32 %v3962_v15, %v3951_v62 }
0x1899   : > { %v3952_v24 = vmul.f32 %v3950_v50, %v3940_v4 }
0x189b   : > { %v3964_v51 = vadd.f32 %v3962_v15, %v3952_v24 }
0x189d   : > { %v3971_v32 = vpack.c.bf16 %v3964_v51, %v3963_v41 }
0x189f   : > { %4104 = vmatmul.mubr.bf16.vlgmr.msra.gmra.mrb[0].mxu0 %v3971_v32 }
0x18a0   : > { %4113 = vmatprep.mubr.bf16.mxu0 %v5816_v45 }
0x1908   : > { %v3908_v35 = vpop.xlane.xlu0 %3907 }
0x1909   : > { %v3919_v11 = vmul.f32 0.0078125, %v3908_v35 }
0x190b   : > { %v3927_v17 = vadd.f32 1e-05, %v3919_v11 }
0x190c   : > { %v3910_v29 = vpop.xlane.xlu1 %3909  ;;  %v3904_v60 = vpop.xlane.xlu0 %3903 }
0x190d   : > { %v3920_v42 = vmul.f32 0.0078125, %v3910_v29  ;;  %v3917_v63 = vmul.f32 0.0078125, %v3904_v60  ;;  %5496 = vrsqrt.f32 %v3927_v17 }
0x190f   : > { %v3928_v40 = vadd.f32 1e-05, %v3920_v42  ;;  %v3925_v23 = vadd.f32 1e-05, %v3917_v63 }
0x1910   : > { %v3906_v44 = vpop.xlane.xlu1 %3905  ;;  %v3912_v48 = vpop.xlane.xlu0 %3911 }
0x1911   : > { %5498 = vrsqrt.f32 %v3928_v40  ;;  %v3918_v5 = vmul.f32 0.0078125, %v3906_v44  ;;  %v3921_v33 = vmul.f32 0.0078125, %v3912_v48 }
0x1912   : > { %5500 = vrsqrt.f32 %v3925_v23 }
0x1913   : > { %v3926_v22 = vadd.f32 1e-05, %v3918_v5  ;;  %v3929_v21 = vadd.f32 1e-05, %v3921_v33 }
0x1914   : > { %v3914_v55 = vpop.xlane.xlu1 %3913 }
0x1915   : > { %5502 = vrsqrt.f32 %v3926_v22  ;;  %v3922_v37 = vmul.f32 0.0078125, %v3914_v55 }
0x1916   : > { %5504 = vrsqrt.f32 %v3929_v21 }
0x1917   : > { %v3930_v34 = vadd.f32 1e-05, %v3922_v37  ;;  %v5497_v31 = vpop.eup %5496 }
0x1918   : > { %v3943_v49 = vmul.f32 %v5497_v31, %v7238_v3 }
0x1919   : > { %5506 = vrsqrt.f32 %v3930_v34 }
0x191a   : > { %v3955_v26 = vmul.f32 %v3950_v50, %v3943_v49 }
0x191b   : > { %v5499_v10 = vpop.eup %5498 }
0x191c   : > { %v5501_v61 = vpop.eup %5500  ;;  %v3944_v12 = vmul.f32 %v5499_v10, %v7245_v47  ;;  %v3967_v58 = vadd.f32 %v3962_v15, %v3955_v26 }
0x191d   : > { %v3941_v16 = vmul.f32 %v5501_v61, %v7252_v13 }
0x191e   : > { %v3956_v20 = vmul.f32 %v3950_v50, %v3944_v12 }
0x191f   : > { %v5503_v18 = vpop.eup %5502  ;;  %v3953_v3 = vmul.f32 %v3950_v50, %v3941_v16 }
0x1920   : > { %v5505_v36 = vpop.eup %5504  ;;  %v3968_v25 = vadd.f32 %v3962_v15, %v3956_v20  ;;  %v3942_v56 = vmul.f32 %v5503_v18, %v7255_v57 }
0x1921   : > { %v3945_v38 = vmul.f32 %v5505_v36, %v7261_v46  ;;  %v3965_v0 = vadd.f32 %v3962_v15, %v3953_v3 }
0x1922   : > { %v3973_v43 = vpack.c.bf16 %v3968_v25, %v3967_v58  ;;  %v3954_v52 = vmul.f32 %v3950_v50, %v3942_v56 }
0x1923   : > { %v5507_v47 = vpop.eup %5506  ;;  %v3957_v9 = vmul.f32 %v3950_v50, %v3945_v38 }
0x1924   : > { %4124 = vmatmul.mubr.bf16.vlgmr.msra.gmra.mrb[0].mxu1 %v3973_v43  ;;  %v3966_v13 = vadd.f32 %v3962_v15, %v3954_v52  ;;  %v3946_v59 = vmul.f32 %v5507_v47, %v7263_v27 }
0x1925   : > { %4133 = vmatprep.mubr.bf16.mxu1 %v5816_v45  ;;  %v3969_v57 = vadd.f32 %v3962_v15, %v3957_v9 }
0x1926   : > { %v3972_v54 = vpack.c.bf16 %v3966_v13, %v3965_v0  ;;  %v3958_v2 = vmul.f32 %v3950_v50, %v3946_v59 }
0x1928   : > { %4114 = vmatmul.mubr.bf16.gmra.mrb[4].mxu0 %v3972_v54  ;;  %v3970_v1 = vadd.f32 %v3962_v15, %v3958_v2 }
0x192a   : > { %v3974_v6 = vpack.c.bf16 %v3970_v1, %v3969_v57 }
0x192c   : > { %4134 = vmatmul.mubr.bf16.gmra.mrb[4].mxu1 %v3974_v6 }
0x1972   : > { %v4105_v19 = vpop.f32.mrb[0].mxu0 }
0x1973   : > { %v4107_v46 = vpop.f32.mrb[1].mxu0 }
0x1974   : > { %v4564_v53 = vpack.c.bf16 %v4107_v46, %v4105_v19  ;;  %v4109_v35 = vpop.f32.mrb[2].mxu0 }
0x1975   : > { %v4111_v39 = vpop.f32.mrb[3].mxu0 }
0x1976   : > { %4192 = vst [vmem:[#allocation15] sm:$0xff] %v4564_v53  ;;  %v4565_v11 = vpack.c.bf16 %v4111_v39, %v4109_v35 }
0x1978   : > { %4193 = vst [vmem:[#allocation15 + $0x8] sm:$0xff] %v4565_v11 }
0x19f7   : > { %v4125_v30 = vpop.f32.mrb[0].mxu1 }
0x19f8   : > { %v4127_v17 = vpop.f32.mrb[1].mxu1 }
0x19f9   : > { %v4568_v27 = vpack.c.bf16 %v4127_v17, %v4125_v30  ;;  %v4129_v29 = vpop.f32.mrb[2].mxu1 }
0x19fa   : > { %v4131_v45 = vpop.f32.mrb[3].mxu1 }
0x19fb   : > { %4196 = vst [vmem:[#allocation15 + $0x20] sm:$0xff] %v4568_v27  ;;  %v4569_v60 = vpack.c.bf16 %v4131_v45, %v4129_v29  ;;  %v4115_v42 = vpop.f32.mrb[4].mxu0 }
0x19fc   : > { %v4117_v63 = vpop.f32.mrb[5].mxu0 }
0x19fd   : > { %4197 = vst [vmem:[#allocation15 + $0x28] sm:$0xff] %v4569_v60  ;;  %v4566_v40 = vpack.c.bf16 %v4117_v63, %v4115_v42  ;;  %v4119_v23 = vpop.f32.mrb[6].mxu0 }
0x19fe   : > { %v4121_v44 = vpop.f32.mrb[7].mxu0 }
0x19ff   : > { %4194 = vst [vmem:[#allocation15 + $0x10] sm:$0xff] %v4566_v40  ;;  %v4567_v48 = vpack.c.bf16 %v4121_v44, %v4119_v23  ;;  %v4135_v5 = vpop.f32.mrb[4].mxu1 }
0x1a00   : > { %v4137_v33 = vpop.f32.mrb[5].mxu1 }
0x1a01   : > { %4195 = vst [vmem:[#allocation15 + $0x18] sm:$0xff] %v4567_v48  ;;  %v4570_v7 = vpack.c.bf16 %v4137_v33, %v4135_v5  ;;  %v4139_v28 = vpop.f32.mrb[6].mxu1 }
0x1a02   : > { %v4141_v22 = vpop.f32.mrb[7].mxu1 }
0x1a03   : > { %4198 = vst [vmem:[#allocation15 + $0x30] sm:$0xff] %v4570_v7  ;;  %v4571_v21 = vpack.c.bf16 %v4141_v22, %v4139_v28 }
0x1a05   : > { %4199 = vst [vmem:[#allocation15 + $0x38] sm:$0xff] %v4571_v21 }
0x1a06 PF: > { %p5001_p8 = scmp.eq.s32.totalorder %s5889_s13, 1  ;;  %s5817_s19 = smov [#allocation15]  }
0x1a07   : > { %s4206_s21 = sshll.u32 %s5817_s19, 4  ;;  %s4207_s21 = int_to_ptr.vmem [resolvable:$true] %s4206_s21 }
0x1a08   : > { %s5714_s17 = scalar_lea.vmem %s4207_s21, 1024  ;;  %p5721_p2 = scmp.lt.s32.totalorder %s4207_s21, %s4207_s21 }
0x1a09   : > { %p5715_p3 = scmp.ne.s32.totalorder %s4207_s21, %s5714_s17  ;;  %p5722_p13 = scmp.lt.s32.totalorder %s5714_s17, %s5714_s17 }
0x1a0b   : > { %p5716_p10 = pnand %p5715_p3, %p5001_p8  ;;  %p5723_p1 = por %p5722_p13, %p5721_p2 }
0x1a0d   : > { %p5717_p4 = pneg %p5716_p10 }
0x1a0f   : > { %p5724_p11 = pnand %p5723_p1, %p5717_p4 }
0x1a11   : > { %5727 = shalt.err (!%p5724_p11)
}
0x1a12   : > { %s7387_s11 = sld [smem:[#allocation29_spill]] }
0x1a18   : > { %s7388_s27 = smov %s7387_s11  ;;  %s5728_s30 = scalar_lea.hbm %s7387_s11, 1024 }
0x1a19   : > { %p5729_p6 = scmp.ne.s32.totalorder %s7388_s27, %s5728_s30  ;;  %p5734_p12 = scmp.lt.u32.totalorder %s5728_s30, %s7388_s27 }
0x1a1b   : > { %p5730_p9 = pnand %p5729_p6, %p5001_p8 }
0x1a1d   : > { %p5731_p5 = pneg %p5730_p9 }
0x1a1f   : > { %p5736_p0 = pnand %p5734_p12, %p5731_p5 }
0x1a21   : > { %5739 = shalt.err (!%p5736_p0)
}
0x1a22   : > { %s5818_s23 = smov 128   ;;  %s5819_s12 = smov 8  }
0x1a23   : > { %4970 = dma.vmem_to_hbm [thread:$0]  (%p5001_p8), %s4207_s21, 1024, %s7388_s27, [#allocation5], %s5818_s23, %s5818_s23, %s5819_s12  }
0x1a24   : > { %5777 = dma.done.wait (%p5001_p8), [#allocation5], 1024  }
0x1a25   : > { %5779 = vsyncadd (%p5001_p8), [#allocation5], 4294966272 }
0x1a26 PF: > { %s7389_s12 = sld [smem:[#allocation23_spill]]  ;;  %s7390_s20 = sld [smem:[#allocation22_spill]] }
0x1a27   : > { %s7391_s11 = sld [smem:[#allocation24_spill]]  ;;  %s7392_s30 = smov %s5786_s10 }
0x1a2c   : > { %p27_p7 = scmp.ge.s32.totalorder %s7389_s12, 4   ;;  %s7393_s10 = smov %s7390_s20 }
0x1a2e   :  { %29 = sbr.rel (!%p27_p7) target bundleno = 15 (0xf), region = 161 }
0x1a35   :  { %4222 = vsyncpa [#allocation4], 1 }
0x1a36   :  { %4224 = vsyncpa [#allocation4 + $0x1], 1 }
0x1a37   :  { %4225 = vsyncpa [#allocation7], 1 }
0x1a38   :  { %4227 = vsyncpa [#allocation7 + $0x1], 1 }
0x1a39   :  { %4228 = vsyncpa [#allocation10], 1 }
0x1a3a   :  { %4230 = vsyncpa [#allocation10 + $0x1], 1 }
0x1a3b   :  { %4231 = vsyncpa [#allocation13], 1 }
0x1a3c   :  { %4233 = vsyncpa [#allocation13 + $0x1], 1 }
0x1a3d   :  { %4234 = vsyncpa [#allocation5], 1 }
0x1a3e   :  { %4236 = vsyncpa [#allocation5 + $0x1], 1 }

</bundles_post_ra>
